<compile_context>
chip_gen: v5e
topology: v5e:2x2
jax: 0.10.0
libtpu: 0.0.40
codegen_flags: <defaults>
</compile_context>

<pallas_src>
import functools

import jax
import jax.numpy as jnp
from jax.experimental import pallas as pl
from jax.experimental.pallas import tpu as pltpu

_ACT_DTYPE = jnp.bfloat16


# ---------------------------------------------------------------------------
# Pallas kernels
# ---------------------------------------------------------------------------
def _matmul_bn_kernel(w_ref, c_ref, shift_ref, o_ref, *, relu):
    # (O, K) @ (K, TM) on the MXU; the BN scale is pre-folded into w, only the
    # per-channel shift (+ optional ReLU) remains in the epilogue.
    acc = jnp.dot(w_ref[...], c_ref[...], preferred_element_type=jnp.float32)
    y = acc + shift_ref[...]
    if relu:
        y = jnp.maximum(y, 0.0)
    o_ref[...] = y.astype(o_ref.dtype)


def _matmul_bn_res_kernel(w_ref, c_ref, shift_ref, res_ref, o_ref, *, relu):
    # Same, with the residual shortcut add fused into the epilogue.
    acc = jnp.dot(w_ref[...], c_ref[...], preferred_element_type=jnp.float32)
    y = acc + shift_ref[...] + res_ref[...].astype(jnp.float32)
    if relu:
        y = jnp.maximum(y, 0.0)
    o_ref[...] = y.astype(o_ref.dtype)


def _max9_kernel(*refs):
    # 9 shifted pooling taps, each (C, M) -> elementwise max over the window.
    o_ref = refs[-1]
    m = refs[0][...]
    for r in refs[1:-1]:
        m = jnp.maximum(m, r[...])
    o_ref[...] = m


def _chan_mean_kernel(x_ref, o_ref):
    # (C, M) -> (1, M) mean over channels (torch.mean(x, 1, keepdim=True)).
    o_ref[...] = jnp.mean(x_ref[...].astype(jnp.float32), axis=0, keepdims=True)


# ---------------------------------------------------------------------------
# Pallas wrappers
# ---------------------------------------------------------------------------
def _pick_tm(m):
    # Split only the big-M layers into >=2 grid steps (v7x megacore); small
    # layers run as a single whole-M tile (per-step overhead dominates there).
    if m >= 2048 and m % 256 == 0:
        return m // 2
    return m


def _matmul_bn(wm, cols, shift, relu, residual=None):
    o, k = wm.shape
    _, m = cols.shape
    tm = _pick_tm(m)
    grid = (m // tm,)
    in_specs = [
        pl.BlockSpec((o, k), lambda i: (0, 0)),
        pl.BlockSpec((k, tm), lambda i: (0, i)),
        pl.BlockSpec((o, 1), lambda i: (0, 0)),
    ]
    args = [wm, cols, shift.reshape(o, 1)]
    if residual is None:
        kern = functools.partial(_matmul_bn_kernel, relu=relu)
    else:
        kern = functools.partial(_matmul_bn_res_kernel, relu=relu)
        in_specs.append(pl.BlockSpec((o, tm), lambda i: (0, i)))
        args.append(residual)
    return pl.pallas_call(
        kern,
        out_shape=jax.ShapeDtypeStruct((o, m), _ACT_DTYPE),
        grid=grid,
        in_specs=in_specs,
        out_specs=pl.BlockSpec((o, tm), lambda i: (0, i)),
        compiler_params=pltpu.CompilerParams(dimension_semantics=("parallel",)),
    )(*args)


def _im2col_cf(x, kh, kw, stride, pad):
    # x: (C, N, H, W) -> cols (C*kh*kw, N*OH*OW).  K order is (C, kh, kw),
    # which matches the PyTorch weight reshape (O, Cin*kh*kw) directly, so no
    # transposes are needed anywhere.
    c, n, h, w = x.shape
    xp = jnp.pad(x, ((0, 0), (0, 0), (pad, pad), (pad, pad)))
    oh = (h + 2 * pad - kh) // stride + 1
    ow = (w + 2 * pad - kw) // stride + 1
    taps = []
    for i in range(kh):
        for j in range(kw):
            taps.append(jax.lax.slice(
                xp,
                (0, 0, i, j),
                (c, n, i + (oh - 1) * stride + 1, j + (ow - 1) * stride + 1),
                (1, 1, stride, stride)))
    patches = jnp.stack(taps, axis=1)                 # (C, kh*kw, N, OH, OW)
    return patches.reshape(c * kh * kw, n * oh * ow), (n, oh, ow)


def conv_bn(x, w, scale, shift, stride, pad, relu, residual=None):
    # x: (Cin, N, H, W);  w: PyTorch layout (O, Cin, kh, kw).
    o, cin, kh, kw = w.shape
    cols, (n, oh, ow) = _im2col_cf(x, kh, kw, stride, pad)
    # Fold the BN scale into the weights (y = (XW)*s + b == X(W*s) + b).
    wm = (w.reshape(o, cin * kh * kw) * scale[:, None]).astype(_ACT_DTYPE)
    out = _matmul_bn(wm, cols, shift, relu, residual)
    return out.reshape(o, n, oh, ow)


def maxpool3x3_s2p1(x):
    c, n, h, w = x.shape
    neg = jnp.finfo(x.dtype).min
    xp = jnp.pad(x, ((0, 0), (0, 0), (1, 1), (1, 1)), constant_values=neg)
    oh = (h + 2 - 3) // 2 + 1
    ow = (w + 2 - 3) // 2 + 1
    m = n * oh * ow
    taps = []
    for i in range(3):
        for j in range(3):
            taps.append(jax.lax.slice(
                xp, (0, 0, i, j),
                (c, n, i + (oh - 1) * 2 + 1, j + (ow - 1) * 2 + 1),
                (1, 1, 2, 2)).reshape(c, m))
    out = pl.pallas_call(
        _max9_kernel,
        out_shape=jax.ShapeDtypeStruct((c, m), x.dtype),
    )(*taps)
    return out.reshape(c, n, oh, ow)


def basic_block(x, blk):
    s = blk["stride"]
    out1 = conv_bn(x, blk["w1"], blk["s1"], blk["b1"], s, 1, relu=True)
    if "wd" in blk:
        short = conv_bn(x, blk["wd"], blk["sd"], blk["bd"], s, 0, relu=False)
    else:
        short = x
    cout, n, oh, ow = out1.shape
    short_slab = short.reshape(cout, n * oh * ow)
    # conv2 + BN + residual add + ReLU fused in a single kernel epilogue.
    return conv_bn(out1, blk["w2"], blk["s2"], blk["b2"], 1, 1,
                   relu=True, residual=short_slab)


def dasr_resnet_forward(params, x_nchw):
    # NCHW -> internal channels-first slab layout (C, N, H, W) in bf16.
    x = jnp.transpose(x_nchw, (1, 0, 2, 3)).astype(_ACT_DTYPE)
    s1, b1 = params["bn1"]
    x = conv_bn(x, params["conv1_w"], s1, b1, stride=2, pad=3, relu=True)
    x = maxpool3x3_s2p1(x)
    for blocks in params["layers"]:
        for blk in blocks:
            x = basic_block(x, blk)
    c, n, h, w = x.shape
    m = pl.pallas_call(
        _chan_mean_kernel,
        out_shape=jax.ShapeDtypeStruct((1, n * h * w), jnp.float32),
    )(x.reshape(c, n * h * w))
    return jnp.transpose(m.reshape(1, n, h, w), (1, 0, 2, 3))    # (N, 1, H, W)


# ---------------------------------------------------------------------------
# Deterministic parameter init (ResNet-18 topology, scaled-down widths)
# ---------------------------------------------------------------------------
def _conv_w(key, cout, cin, kh, kw):
    # PyTorch layout (O, Cin, kh, kw).
    std = (2.0 / (kh * kw * cin)) ** 0.5
    return std * jax.random.normal(key, (cout, cin, kh, kw), jnp.float32)


def _bn_fold(key, c, eps=1e-5):
    k1, k2, k3, k4 = jax.random.split(key, 4)
    gamma = 1.0 + 0.1 * jax.random.normal(k1, (c,), jnp.float32)
    beta = 0.1 * jax.random.normal(k2, (c,), jnp.float32)
    mean = 0.1 * jax.random.normal(k3, (c,), jnp.float32)
    var = 1.0 + 0.1 * jnp.abs(jax.random.normal(k4, (c,), jnp.float32))
    scale = gamma / jnp.sqrt(var + eps)
    shift = beta - mean * scale
    return scale, shift


def init_params(key, in_ch=3, widths=(8, 16, 32, 64), blocks=(2, 2, 2, 2)):
    params = {}
    key, k = jax.random.split(key)
    params["conv1_w"] = _conv_w(k, widths[0], in_ch, 7, 7)
    key, k = jax.random.split(key)
    params["bn1"] = _bn_fold(k, widths[0])
    layers = []
    cin = widths[0]
    for li, (cout, nblk) in enumerate(zip(widths, blocks)):
        first_stride = 1 if li == 0 else 2
        blks = []
        for bi in range(nblk):
            s = first_stride if bi == 0 else 1
            blk = {"stride": s}
            key, k = jax.random.split(key)
            blk["w1"] = _conv_w(k, cout, cin, 3, 3)
            key, k = jax.random.split(key)
            blk["s1"], blk["b1"] = _bn_fold(k, cout)
            key, k = jax.random.split(key)
            blk["w2"] = _conv_w(k, cout, cout, 3, 3)
            key, k = jax.random.split(key)
            blk["s2"], blk["b2"] = _bn_fold(k, cout)
            if s != 1 or cin != cout:
                key, k = jax.random.split(key)
                blk["wd"] = _conv_w(k, cout, cin, 1, 1)
                key, k = jax.random.split(key)
                blk["sd"], blk["bd"] = _bn_fold(k, cout)
            blks.append(blk)
            cin = cout
        layers.append(blks)
    params["layers"] = layers
    return params


if __name__ == "__main__":
    key = jax.random.PRNGKey(0)
    kp, kx = jax.random.split(key)
    params = init_params(kp)
    # deterministic input, NCHW like PyTorch: (N=2, C=3, H=64, W=64)
    x = jax.random.normal(kx, (2, 3, 64, 64), jnp.float32)

    fwd = jax.jit(lambda inp: dasr_resnet_forward(params, inp))
    y = fwd(x)
    jax.block_until_ready(y)

    assert y.shape == (2, 1, 2, 2), y.shape          # mean over channels, keepdim
    assert bool(jnp.all(jnp.isfinite(y)))
    print("KERNEL_OK")
</pallas_src>

<mosaic_0001>
module attributes {stable_mosaic.version = 11 : i64} {
  func.func @_matmul_bn_kernel(%arg0: i32, %arg1: memref<8x147xbf16, #tpu.memory_space<vmem>>, %arg2: memref<147x1024xbf16, #tpu.memory_space<vmem>>, %arg3: memref<8x1xf32, #tpu.memory_space<vmem>>, %arg4: memref<8x1024xbf16, #tpu.memory_space<vmem>>) attributes {dimension_semantics = [#tpu.dimension_semantics<parallel>], iteration_bounds = array<i64: 2>, scalar_prefetch = 0 : i64, scratch_operands = 0 : i64, tpu.core_type = #tpu.core_type<tc>, window_params = [{pipeline_mode = #tpu.pipeline_mode<synchronous>, transform_indices = @transform_0, window_bounds = array<i64: 8, 147>}, {transform_indices = @transform_1, window_bounds = array<i64: 147, 1024>}, {pipeline_mode = #tpu.pipeline_mode<synchronous>, transform_indices = @transform_2, window_bounds = array<i64: 8, 1>}, {transform_indices = @transform_3, window_bounds = array<i64: 8, 1024>}]} {
    %c0 = arith.constant 0 : index
    %c0_0 = arith.constant 0 : index
    %0 = vector.load %arg1[%c0, %c0_0] : memref<8x147xbf16, #tpu.memory_space<vmem>>, vector<8x147xbf16>
    %c0_1 = arith.constant 0 : index
    %c0_2 = arith.constant 0 : index
    %1 = vector.load %arg2[%c0_1, %c0_2] : memref<147x1024xbf16, #tpu.memory_space<vmem>>, vector<147x1024xbf16>
    %cst = arith.constant dense<0.000000e+00> : vector<8x1024xf32>
    %2 = tpu.matmul %0, %1, %cst {dimension_numbers = #tpu.dot_dimension_numbers<[1], [0], [0], [1], [0, 0, 1, 1], [], []>} : vector<8x147xbf16>, vector<147x1024xbf16>, vector<8x1024xf32> -> vector<8x1024xf32>
    %c0_3 = arith.constant 0 : index
    %c0_4 = arith.constant 0 : index
    %3 = vector.load %arg3[%c0_3, %c0_4] : memref<8x1xf32, #tpu.memory_space<vmem>>, vector<8x1xf32>
    %4 = vector.broadcast %3 : vector<8x1xf32> to vector<8x1024xf32>
    %5 = arith.addf %2, %4 : vector<8x1024xf32>
    %cst_5 = arith.constant 0.000000e+00 : f32
    %6 = vector.broadcast %cst_5 : f32 to vector<8x1024xf32>
    %7 = arith.maximumf %5, %6 : vector<8x1024xf32>
    %8 = arith.truncf %7 : vector<8x1024xf32> to vector<8x1024xbf16>
    %c0_6 = arith.constant 0 : index
    %c0_7 = arith.constant 0 : index
    %9 = vector.load %arg4[%c0_6, %c0_7] : memref<8x1024xbf16, #tpu.memory_space<vmem>>, vector<8x1024xbf16>
    tpu.vector_store %arg4[%c0_6, %c0_7], %8 {strides = array<i32>} : memref<8x1024xbf16, #tpu.memory_space<vmem>>, vector<8x1024xbf16>,
    return
  }
  func.func @transform_0(%arg0: i32) -> (i32, i32) {
    %c0_i32 = arith.constant 0 : i32
    %c0_i32_0 = arith.constant 0 : i32
    %c0_i32_1 = arith.constant 0 : i32
    return %c0_i32, %c0_i32_0 : i32, i32
  }
  func.func @transform_1(%arg0: i32) -> (i32, i32) {
    %c0_i32 = arith.constant 0 : i32
    %c0_i32_0 = arith.constant 0 : i32
    return %c0_i32, %arg0 : i32, i32
  }
  func.func @transform_2(%arg0: i32) -> (i32, i32) {
    %c0_i32 = arith.constant 0 : i32
    %c0_i32_0 = arith.constant 0 : i32
    %c0_i32_1 = arith.constant 0 : i32
    return %c0_i32, %c0_i32_0 : i32, i32
  }
  func.func @transform_3(%arg0: i32) -> (i32, i32) {
    %c0_i32 = arith.constant 0 : i32
    %c0_i32_0 = arith.constant 0 : i32
    return %c0_i32, %arg0 : i32, i32
  }
}

module attributes {stable_mosaic.version = 11 : i64} {
  func.func @_max9_kernel(%arg0: memref<8x512xbf16, #tpu.memory_space<vmem>>, %arg1: memref<8x512xbf16, #tpu.memory_space<vmem>>, %arg2: memref<8x512xbf16, #tpu.memory_space<vmem>>, %arg3: memref<8x512xbf16, #tpu.memory_space<vmem>>, %arg4: memref<8x512xbf16, #tpu.memory_space<vmem>>, %arg5: memref<8x512xbf16, #tpu.memory_space<vmem>>, %arg6: memref<8x512xbf16, #tpu.memory_space<vmem>>, %arg7: memref<8x512xbf16, #tpu.memory_space<vmem>>, %arg8: memref<8x512xbf16, #tpu.memory_space<vmem>>, %arg9: memref<8x512xbf16, #tpu.memory_space<vmem>>) attributes {dimension_semantics = [], scalar_prefetch = 0 : i64, scratch_operands = 0 : i64, tpu.core_type = #tpu.core_type<tc>} {
    %c0 = arith.constant 0 : index
    %c0_0 = arith.constant 0 : index
    %0 = vector.load %arg0[%c0, %c0_0] : memref<8x512xbf16, #tpu.memory_space<vmem>>, vector<8x512xbf16>
    %c0_1 = arith.constant 0 : index
    %c0_2 = arith.constant 0 : index
    %1 = vector.load %arg1[%c0_1, %c0_2] : memref<8x512xbf16, #tpu.memory_space<vmem>>, vector<8x512xbf16>
    %2 = arith.maximumf %0, %1 : vector<8x512xbf16>
    %c0_3 = arith.constant 0 : index
    %c0_4 = arith.constant 0 : index
    %3 = vector.load %arg2[%c0_3, %c0_4] : memref<8x512xbf16, #tpu.memory_space<vmem>>, vector<8x512xbf16>
    %4 = arith.maximumf %2, %3 : vector<8x512xbf16>
    %c0_5 = arith.constant 0 : index
    %c0_6 = arith.constant 0 : index
    %5 = vector.load %arg3[%c0_5, %c0_6] : memref<8x512xbf16, #tpu.memory_space<vmem>>, vector<8x512xbf16>
    %6 = arith.maximumf %4, %5 : vector<8x512xbf16>
    %c0_7 = arith.constant 0 : index
    %c0_8 = arith.constant 0 : index
    %7 = vector.load %arg4[%c0_7, %c0_8] : memref<8x512xbf16, #tpu.memory_space<vmem>>, vector<8x512xbf16>
    %8 = arith.maximumf %6, %7 : vector<8x512xbf16>
    %c0_9 = arith.constant 0 : index
    %c0_10 = arith.constant 0 : index
    %9 = vector.load %arg5[%c0_9, %c0_10] : memref<8x512xbf16, #tpu.memory_space<vmem>>, vector<8x512xbf16>
    %10 = arith.maximumf %8, %9 : vector<8x512xbf16>
    %c0_11 = arith.constant 0 : index
    %c0_12 = arith.constant 0 : index
    %11 = vector.load %arg6[%c0_11, %c0_12] : memref<8x512xbf16, #tpu.memory_space<vmem>>, vector<8x512xbf16>
    %12 = arith.maximumf %10, %11 : vector<8x512xbf16>
    %c0_13 = arith.constant 0 : index
    %c0_14 = arith.constant 0 : index
    %13 = vector.load %arg7[%c0_13, %c0_14] : memref<8x512xbf16, #tpu.memory_space<vmem>>, vector<8x512xbf16>
    %14 = arith.maximumf %12, %13 : vector<8x512xbf16>
    %c0_15 = arith.constant 0 : index
    %c0_16 = arith.constant 0 : index
    %15 = vector.load %arg8[%c0_15, %c0_16] : memref<8x512xbf16, #tpu.memory_space<vmem>>, vector<8x512xbf16>
    %16 = arith.maximumf %14, %15 : vector<8x512xbf16>
    %c0_17 = arith.constant 0 : index
    %c0_18 = arith.constant 0 : index
    %17 = vector.load %arg9[%c0_17, %c0_18] : memref<8x512xbf16, #tpu.memory_space<vmem>>, vector<8x512xbf16>
    tpu.vector_store %arg9[%c0_17, %c0_18], %16 {strides = array<i32>} : memref<8x512xbf16, #tpu.memory_space<vmem>>, vector<8x512xbf16>,
    return
  }
}

module attributes {stable_mosaic.version = 11 : i64} {
  func.func @_matmul_bn_kernel(%arg0: i32, %arg1: memref<8x72xbf16, #tpu.memory_space<vmem>>, %arg2: memref<72x512xbf16, #tpu.memory_space<vmem>>, %arg3: memref<8x1xf32, #tpu.memory_space<vmem>>, %arg4: memref<8x512xbf16, #tpu.memory_space<vmem>>) attributes {dimension_semantics = [#tpu.dimension_semantics<parallel>], iteration_bounds = array<i64: 1>, scalar_prefetch = 0 : i64, scratch_operands = 0 : i64, tpu.core_type = #tpu.core_type<tc>, window_params = [{pipeline_mode = #tpu.pipeline_mode<synchronous>, transform_indices = @transform_0, window_bounds = array<i64: 8, 72>}, {transform_indices = @transform_1, window_bounds = array<i64: 72, 512>}, {pipeline_mode = #tpu.pipeline_mode<synchronous>, transform_indices = @transform_2, window_bounds = array<i64: 8, 1>}, {transform_indices = @transform_3, window_bounds = array<i64: 8, 512>}]} {
    %c0 = arith.constant 0 : index
    %c0_0 = arith.constant 0 : index
    %0 = vector.load %arg1[%c0, %c0_0] : memref<8x72xbf16, #tpu.memory_space<vmem>>, vector<8x72xbf16>
    %c0_1 = arith.constant 0 : index
    %c0_2 = arith.constant 0 : index
    %1 = vector.load %arg2[%c0_1, %c0_2] : memref<72x512xbf16, #tpu.memory_space<vmem>>, vector<72x512xbf16>
    %cst = arith.constant dense<0.000000e+00> : vector<8x512xf32>
    %2 = tpu.matmul %0, %1, %cst {dimension_numbers = #tpu.dot_dimension_numbers<[1], [0], [0], [1], [0, 0, 1, 1], [], []>} : vector<8x72xbf16>, vector<72x512xbf16>, vector<8x512xf32> -> vector<8x512xf32>
    %c0_3 = arith.constant 0 : index
    %c0_4 = arith.constant 0 : index
    %3 = vector.load %arg3[%c0_3, %c0_4] : memref<8x1xf32, #tpu.memory_space<vmem>>, vector<8x1xf32>
    %4 = vector.broadcast %3 : vector<8x1xf32> to vector<8x512xf32>
    %5 = arith.addf %2, %4 : vector<8x512xf32>
    %cst_5 = arith.constant 0.000000e+00 : f32
    %6 = vector.broadcast %cst_5 : f32 to vector<8x512xf32>
    %7 = arith.maximumf %5, %6 : vector<8x512xf32>
    %8 = arith.truncf %7 : vector<8x512xf32> to vector<8x512xbf16>
    %c0_6 = arith.constant 0 : index
    %c0_7 = arith.constant 0 : index
    %9 = vector.load %arg4[%c0_6, %c0_7] : memref<8x512xbf16, #tpu.memory_space<vmem>>, vector<8x512xbf16>
    tpu.vector_store %arg4[%c0_6, %c0_7], %8 {strides = array<i32>} : memref<8x512xbf16, #tpu.memory_space<vmem>>, vector<8x512xbf16>,
    return
  }
  func.func @transform_0(%arg0: i32) -> (i32, i32) {
    %c0_i32 = arith.constant 0 : i32
    %c0_i32_0 = arith.constant 0 : i32
    %c0_i32_1 = arith.constant 0 : i32
    return %c0_i32, %c0_i32_0 : i32, i32
  }
  func.func @transform_1(%arg0: i32) -> (i32, i32) {
    %c0_i32 = arith.constant 0 : i32
    %c0_i32_0 = arith.constant 0 : i32
    return %c0_i32, %arg0 : i32, i32
  }
  func.func @transform_2(%arg0: i32) -> (i32, i32) {
    %c0_i32 = arith.constant 0 : i32
    %c0_i32_0 = arith.constant 0 : i32
    %c0_i32_1 = arith.constant 0 : i32
    return %c0_i32, %c0_i32_0 : i32, i32
  }
  func.func @transform_3(%arg0: i32) -> (i32, i32) {
    %c0_i32 = arith.constant 0 : i32
    %c0_i32_0 = arith.constant 0 : i32
    return %c0_i32, %arg0 : i32, i32
  }
}

module attributes {stable_mosaic.version = 11 : i64} {
  func.func @_matmul_bn_res_kernel(%arg0: i32, %arg1: memref<8x72xbf16, #tpu.memory_space<vmem>>, %arg2: memref<72x512xbf16, #tpu.memory_space<vmem>>, %arg3: memref<8x1xf32, #tpu.memory_space<vmem>>, %arg4: memref<8x512xbf16, #tpu.memory_space<vmem>>, %arg5: memref<8x512xbf16, #tpu.memory_space<vmem>>) attributes {dimension_semantics = [#tpu.dimension_semantics<parallel>], iteration_bounds = array<i64: 1>, scalar_prefetch = 0 : i64, scratch_operands = 0 : i64, tpu.core_type = #tpu.core_type<tc>, window_params = [{pipeline_mode = #tpu.pipeline_mode<synchronous>, transform_indices = @transform_0, window_bounds = array<i64: 8, 72>}, {transform_indices = @transform_1, window_bounds = array<i64: 72, 512>}, {pipeline_mode = #tpu.pipeline_mode<synchronous>, transform_indices = @transform_2, window_bounds = array<i64: 8, 1>}, {transform_indices = @transform_3, window_bounds = array<i64: 8, 512>}, {transform_indices = @transform_4, window_bounds = array<i64: 8, 512>}]} {
    %c0 = arith.constant 0 : index
    %c0_0 = arith.constant 0 : index
    %0 = vector.load %arg1[%c0, %c0_0] : memref<8x72xbf16, #tpu.memory_space<vmem>>, vector<8x72xbf16>
    %c0_1 = arith.constant 0 : index
    %c0_2 = arith.constant 0 : index
    %1 = vector.load %arg2[%c0_1, %c0_2] : memref<72x512xbf16, #tpu.memory_space<vmem>>, vector<72x512xbf16>
    %cst = arith.constant dense<0.000000e+00> : vector<8x512xf32>
    %2 = tpu.matmul %0, %1, %cst {dimension_numbers = #tpu.dot_dimension_numbers<[1], [0], [0], [1], [0, 0, 1, 1], [], []>} : vector<8x72xbf16>, vector<72x512xbf16>, vector<8x512xf32> -> vector<8x512xf32>
    %c0_3 = arith.constant 0 : index
    %c0_4 = arith.constant 0 : index
    %3 = vector.load %arg3[%c0_3, %c0_4] : memref<8x1xf32, #tpu.memory_space<vmem>>, vector<8x1xf32>
    %4 = vector.broadcast %3 : vector<8x1xf32> to vector<8x512xf32>
    %5 = arith.addf %2, %4 : vector<8x512xf32>
    %c0_5 = arith.constant 0 : index
    %c0_6 = arith.constant 0 : index
    %6 = vector.load %arg4[%c0_5, %c0_6] : memref<8x512xbf16, #tpu.memory_space<vmem>>, vector<8x512xbf16>
    %7 = arith.extf %6 : vector<8x512xbf16> to vector<8x512xf32>
    %8 = arith.addf %5, %7 : vector<8x512xf32>
    %cst_7 = arith.constant 0.000000e+00 : f32
    %9 = vector.broadcast %cst_7 : f32 to vector<8x512xf32>
    %10 = arith.maximumf %8, %9 : vector<8x512xf32>
    %11 = arith.truncf %10 : vector<8x512xf32> to vector<8x512xbf16>
    %c0_8 = arith.constant 0 : index
    %c0_9 = arith.constant 0 : index
    %12 = vector.load %arg5[%c0_8, %c0_9] : memref<8x512xbf16, #tpu.memory_space<vmem>>, vector<8x512xbf16>
    tpu.vector_store %arg5[%c0_8, %c0_9], %11 {strides = array<i32>} : memref<8x512xbf16, #tpu.memory_space<vmem>>, vector<8x512xbf16>,
    return
  }
  func.func @transform_0(%arg0: i32) -> (i32, i32) {
    %c0_i32 = arith.constant 0 : i32
    %c0_i32_0 = arith.constant 0 : i32
    %c0_i32_1 = arith.constant 0 : i32
    return %c0_i32, %c0_i32_0 : i32, i32
  }
  func.func @transform_1(%arg0: i32) -> (i32, i32) {
    %c0_i32 = arith.constant 0 : i32
    %c0_i32_0 = arith.constant 0 : i32
    return %c0_i32, %arg0 : i32, i32
  }
  func.func @transform_2(%arg0: i32) -> (i32, i32) {
    %c0_i32 = arith.constant 0 : i32
    %c0_i32_0 = arith.constant 0 : i32
    %c0_i32_1 = arith.constant 0 : i32
    return %c0_i32, %c0_i32_0 : i32, i32
  }
  func.func @transform_3(%arg0: i32) -> (i32, i32) {
    %c0_i32 = arith.constant 0 : i32
    %c0_i32_0 = arith.constant 0 : i32
    return %c0_i32, %arg0 : i32, i32
  }
  func.func @transform_4(%arg0: i32) -> (i32, i32) {
    %c0_i32 = arith.constant 0 : i32
    %c0_i32_0 = arith.constant 0 : i32
    return %c0_i32, %arg0 : i32, i32
  }
}

module attributes {stable_mosaic.version = 11 : i64} {
  func.func @_matmul_bn_kernel(%arg0: i32, %arg1: memref<16x72xbf16, #tpu.memory_space<vmem>>, %arg2: memref<72x128xbf16, #tpu.memory_space<vmem>>, %arg3: memref<16x1xf32, #tpu.memory_space<vmem>>, %arg4: memref<16x128xbf16, #tpu.memory_space<vmem>>) attributes {dimension_semantics = [#tpu.dimension_semantics<parallel>], iteration_bounds = array<i64: 1>, scalar_prefetch = 0 : i64, scratch_operands = 0 : i64, tpu.core_type = #tpu.core_type<tc>, window_params = [{pipeline_mode = #tpu.pipeline_mode<synchronous>, transform_indices = @transform_0, window_bounds = array<i64: 16, 72>}, {transform_indices = @transform_1, window_bounds = array<i64: 72, 128>}, {pipeline_mode = #tpu.pipeline_mode<synchronous>, transform_indices = @transform_2, window_bounds = array<i64: 16, 1>}, {transform_indices = @transform_3, window_bounds = array<i64: 16, 128>}]} {
    %c0 = arith.constant 0 : index
    %c0_0 = arith.constant 0 : index
    %0 = vector.load %arg1[%c0, %c0_0] : memref<16x72xbf16, #tpu.memory_space<vmem>>, vector<16x72xbf16>
    %c0_1 = arith.constant 0 : index
    %c0_2 = arith.constant 0 : index
    %1 = vector.load %arg2[%c0_1, %c0_2] : memref<72x128xbf16, #tpu.memory_space<vmem>>, vector<72x128xbf16>
    %cst = arith.constant dense<0.000000e+00> : vector<16x128xf32>
    %2 = tpu.matmul %0, %1, %cst {dimension_numbers = #tpu.dot_dimension_numbers<[1], [0], [0], [1], [0, 0, 1, 1], [], []>} : vector<16x72xbf16>, vector<72x128xbf16>, vector<16x128xf32> -> vector<16x128xf32>
    %c0_3 = arith.constant 0 : index
    %c0_4 = arith.constant 0 : index
    %3 = vector.load %arg3[%c0_3, %c0_4] : memref<16x1xf32, #tpu.memory_space<vmem>>, vector<16x1xf32>
    %4 = vector.broadcast %3 : vector<16x1xf32> to vector<16x128xf32>
    %5 = arith.addf %2, %4 : vector<16x128xf32>
    %cst_5 = arith.constant 0.000000e+00 : f32
    %6 = vector.broadcast %cst_5 : f32 to vector<16x128xf32>
    %7 = arith.maximumf %5, %6 : vector<16x128xf32>
    %8 = arith.truncf %7 : vector<16x128xf32> to vector<16x128xbf16>
    %c0_6 = arith.constant 0 : index
    %c0_7 = arith.constant 0 : index
    %9 = vector.load %arg4[%c0_6, %c0_7] : memref<16x128xbf16, #tpu.memory_space<vmem>>, vector<16x128xbf16>
    tpu.vector_store %arg4[%c0_6, %c0_7], %8 {strides = array<i32>} : memref<16x128xbf16, #tpu.memory_space<vmem>>, vector<16x128xbf16>,
    return
  }
  func.func @transform_0(%arg0: i32) -> (i32, i32) {
    %c0_i32 = arith.constant 0 : i32
    %c0_i32_0 = arith.constant 0 : i32
    %c0_i32_1 = arith.constant 0 : i32
    return %c0_i32, %c0_i32_0 : i32, i32
  }
  func.func @transform_1(%arg0: i32) -> (i32, i32) {
    %c0_i32 = arith.constant 0 : i32
    %c0_i32_0 = arith.constant 0 : i32
    return %c0_i32, %arg0 : i32, i32
  }
  func.func @transform_2(%arg0: i32) -> (i32, i32) {
    %c0_i32 = arith.constant 0 : i32
    %c0_i32_0 = arith.constant 0 : i32
    %c0_i32_1 = arith.constant 0 : i32
    return %c0_i32, %c0_i32_0 : i32, i32
  }
  func.func @transform_3(%arg0: i32) -> (i32, i32) {
    %c0_i32 = arith.constant 0 : i32
    %c0_i32_0 = arith.constant 0 : i32
    return %c0_i32, %arg0 : i32, i32
  }
}

module attributes {stable_mosaic.version = 11 : i64} {
  func.func @_matmul_bn_kernel(%arg0: i32, %arg1: memref<16x8xbf16, #tpu.memory_space<vmem>>, %arg2: memref<8x128xbf16, #tpu.memory_space<vmem>>, %arg3: memref<16x1xf32, #tpu.memory_space<vmem>>, %arg4: memref<16x128xbf16, #tpu.memory_space<vmem>>) attributes {dimension_semantics = [#tpu.dimension_semantics<parallel>], iteration_bounds = array<i64: 1>, scalar_prefetch = 0 : i64, scratch_operands = 0 : i64, tpu.core_type = #tpu.core_type<tc>, window_params = [{pipeline_mode = #tpu.pipeline_mode<synchronous>, transform_indices = @transform_0, window_bounds = array<i64: 16, 8>}, {transform_indices = @transform_1, window_bounds = array<i64: 8, 128>}, {pipeline_mode = #tpu.pipeline_mode<synchronous>, transform_indices = @transform_2, window_bounds = array<i64: 16, 1>}, {transform_indices = @transform_3, window_bounds = array<i64: 16, 128>}]} {
    %c0 = arith.constant 0 : index
    %c0_0 = arith.constant 0 : index
    %0 = vector.load %arg1[%c0, %c0_0] : memref<16x8xbf16, #tpu.memory_space<vmem>>, vector<16x8xbf16>
    %c0_1 = arith.constant 0 : index
    %c0_2 = arith.constant 0 : index
    %1 = vector.load %arg2[%c0_1, %c0_2] : memref<8x128xbf16, #tpu.memory_space<vmem>>, vector<8x128xbf16>
    %cst = arith.constant dense<0.000000e+00> : vector<16x128xf32>
    %2 = tpu.matmul %0, %1, %cst {dimension_numbers = #tpu.dot_dimension_numbers<[1], [0], [0], [1], [0, 0, 1, 1], [], []>} : vector<16x8xbf16>, vector<8x128xbf16>, vector<16x128xf32> -> vector<16x128xf32>
    %c0_3 = arith.constant 0 : index
    %c0_4 = arith.constant 0 : index
    %3 = vector.load %arg3[%c0_3, %c0_4] : memref<16x1xf32, #tpu.memory_space<vmem>>, vector<16x1xf32>
    %4 = vector.broadcast %3 : vector<16x1xf32> to vector<16x128xf32>
    %5 = arith.addf %2, %4 : vector<16x128xf32>
    %6 = arith.truncf %5 : vector<16x128xf32> to vector<16x128xbf16>
    %c0_5 = arith.constant 0 : index
    %c0_6 = arith.constant 0 : index
    %7 = vector.load %arg4[%c0_5, %c0_6] : memref<16x128xbf16, #tpu.memory_space<vmem>>, vector<16x128xbf16>
    tpu.vector_store %arg4[%c0_5, %c0_6], %6 {strides = array<i32>} : memref<16x128xbf16, #tpu.memory_space<vmem>>, vector<16x128xbf16>,
    return
  }
  func.func @transform_0(%arg0: i32) -> (i32, i32) {
    %c0_i32 = arith.constant 0 : i32
    %c0_i32_0 = arith.constant 0 : i32
    %c0_i32_1 = arith.constant 0 : i32
    return %c0_i32, %c0_i32_0 : i32, i32
  }
  func.func @transform_1(%arg0: i32) -> (i32, i32) {
    %c0_i32 = arith.constant 0 : i32
    %c0_i32_0 = arith.constant 0 : i32
    return %c0_i32, %arg0 : i32, i32
  }
  func.func @transform_2(%arg0: i32) -> (i32, i32) {
    %c0_i32 = arith.constant 0 : i32
    %c0_i32_0 = arith.constant 0 : i32
    %c0_i32_1 = arith.constant 0 : i32
    return %c0_i32, %c0_i32_0 : i32, i32
  }
  func.func @transform_3(%arg0: i32) -> (i32, i32) {
    %c0_i32 = arith.constant 0 : i32
    %c0_i32_0 = arith.constant 0 : i32
    return %c0_i32, %arg0 : i32, i32
  }
}

module attributes {stable_mosaic.version = 11 : i64} {
  func.func @_matmul_bn_res_kernel(%arg0: i32, %arg1: memref<16x144xbf16, #tpu.memory_space<vmem>>, %arg2: memref<144x128xbf16, #tpu.memory_space<vmem>>, %arg3: memref<16x1xf32, #tpu.memory_space<vmem>>, %arg4: memref<16x128xbf16, #tpu.memory_space<vmem>>, %arg5: memref<16x128xbf16, #tpu.memory_space<vmem>>) attributes {dimension_semantics = [#tpu.dimension_semantics<parallel>], iteration_bounds = array<i64: 1>, scalar_prefetch = 0 : i64, scratch_operands = 0 : i64, tpu.core_type = #tpu.core_type<tc>, window_params = [{pipeline_mode = #tpu.pipeline_mode<synchronous>, transform_indices = @transform_0, window_bounds = array<i64: 16, 144>}, {transform_indices = @transform_1, window_bounds = array<i64: 144, 128>}, {pipeline_mode = #tpu.pipeline_mode<synchronous>, transform_indices = @transform_2, window_bounds = array<i64: 16, 1>}, {transform_indices = @transform_3, window_bounds = array<i64: 16, 128>}, {transform_indices = @transform_4, window_bounds = array<i64: 16, 128>}]} {
    %c0 = arith.constant 0 : index
    %c0_0 = arith.constant 0 : index
    %0 = vector.load %arg1[%c0, %c0_0] : memref<16x144xbf16, #tpu.memory_space<vmem>>, vector<16x144xbf16>
    %c0_1 = arith.constant 0 : index
    %c0_2 = arith.constant 0 : index
    %1 = vector.load %arg2[%c0_1, %c0_2] : memref<144x128xbf16, #tpu.memory_space<vmem>>, vector<144x128xbf16>
    %cst = arith.constant dense<0.000000e+00> : vector<16x128xf32>
    %2 = tpu.matmul %0, %1, %cst {dimension_numbers = #tpu.dot_dimension_numbers<[1], [0], [0], [1], [0, 0, 1, 1], [], []>} : vector<16x144xbf16>, vector<144x128xbf16>, vector<16x128xf32> -> vector<16x128xf32>
    %c0_3 = arith.constant 0 : index
    %c0_4 = arith.constant 0 : index
    %3 = vector.load %arg3[%c0_3, %c0_4] : memref<16x1xf32, #tpu.memory_space<vmem>>, vector<16x1xf32>
    %4 = vector.broadcast %3 : vector<16x1xf32> to vector<16x128xf32>
    %5 = arith.addf %2, %4 : vector<16x128xf32>
    %c0_5 = arith.constant 0 : index
    %c0_6 = arith.constant 0 : index
    %6 = vector.load %arg4[%c0_5, %c0_6] : memref<16x128xbf16, #tpu.memory_space<vmem>>, vector<16x128xbf16>
    %7 = arith.extf %6 : vector<16x128xbf16> to vector<16x128xf32>
    %8 = arith.addf %5, %7 : vector<16x128xf32>
    %cst_7 = arith.constant 0.000000e+00 : f32
    %9 = vector.broadcast %cst_7 : f32 to vector<16x128xf32>
    %10 = arith.maximumf %8, %9 : vector<16x128xf32>
    %11 = arith.truncf %10 : vector<16x128xf32> to vector<16x128xbf16>
    %c0_8 = arith.constant 0 : index
    %c0_9 = arith.constant 0 : index
    %12 = vector.load %arg5[%c0_8, %c0_9] : memref<16x128xbf16, #tpu.memory_space<vmem>>, vector<16x128xbf16>
    tpu.vector_store %arg5[%c0_8, %c0_9], %11 {strides = array<i32>} : memref<16x128xbf16, #tpu.memory_space<vmem>>, vector<16x128xbf16>,
    return
  }
  func.func @transform_0(%arg0: i32) -> (i32, i32) {
    %c0_i32 = arith.constant 0 : i32
    %c0_i32_0 = arith.constant 0 : i32
    %c0_i32_1 = arith.constant 0 : i32
    return %c0_i32, %c0_i32_0 : i32, i32
  }
  func.func @transform_1(%arg0: i32) -> (i32, i32) {
    %c0_i32 = arith.constant 0 : i32
    %c0_i32_0 = arith.constant 0 : i32
    return %c0_i32, %arg0 : i32, i32
  }
  func.func @transform_2(%arg0: i32) -> (i32, i32) {
    %c0_i32 = arith.constant 0 : i32
    %c0_i32_0 = arith.constant 0 : i32
    %c0_i32_1 = arith.constant 0 : i32
    return %c0_i32, %c0_i32_0 : i32, i32
  }
  func.func @transform_3(%arg0: i32) -> (i32, i32) {
    %c0_i32 = arith.constant 0 : i32
    %c0_i32_0 = arith.constant 0 : i32
    return %c0_i32, %arg0 : i32, i32
  }
  func.func @transform_4(%arg0: i32) -> (i32, i32) {
    %c0_i32 = arith.constant 0 : i32
    %c0_i32_0 = arith.constant 0 : i32
    return %c0_i32, %arg0 : i32, i32
  }
}

module attributes {stable_mosaic.version = 11 : i64} {
  func.func @_matmul_bn_kernel(%arg0: i32, %arg1: memref<16x144xbf16, #tpu.memory_space<vmem>>, %arg2: memref<144x128xbf16, #tpu.memory_space<vmem>>, %arg3: memref<16x1xf32, #tpu.memory_space<vmem>>, %arg4: memref<16x128xbf16, #tpu.memory_space<vmem>>) attributes {dimension_semantics = [#tpu.dimension_semantics<parallel>], iteration_bounds = array<i64: 1>, scalar_prefetch = 0 : i64, scratch_operands = 0 : i64, tpu.core_type = #tpu.core_type<tc>, window_params = [{pipeline_mode = #tpu.pipeline_mode<synchronous>, transform_indices = @transform_0, window_bounds = array<i64: 16, 144>}, {transform_indices = @transform_1, window_bounds = array<i64: 144, 128>}, {pipeline_mode = #tpu.pipeline_mode<synchronous>, transform_indices = @transform_2, window_bounds = array<i64: 16, 1>}, {transform_indices = @transform_3, window_bounds = array<i64: 16, 128>}]} {
    %c0 = arith.constant 0 : index
    %c0_0 = arith.constant 0 : index
    %0 = vector.load %arg1[%c0, %c0_0] : memref<16x144xbf16, #tpu.memory_space<vmem>>, vector<16x144xbf16>
    %c0_1 = arith.constant 0 : index
    %c0_2 = arith.constant 0 : index
    %1 = vector.load %arg2[%c0_1, %c0_2] : memref<144x128xbf16, #tpu.memory_space<vmem>>, vector<144x128xbf16>
    %cst = arith.constant dense<0.000000e+00> : vector<16x128xf32>
    %2 = tpu.matmul %0, %1, %cst {dimension_numbers = #tpu.dot_dimension_numbers<[1], [0], [0], [1], [0, 0, 1, 1], [], []>} : vector<16x144xbf16>, vector<144x128xbf16>, vector<16x128xf32> -> vector<16x128xf32>
    %c0_3 = arith.constant 0 : index
    %c0_4 = arith.constant 0 : index
    %3 = vector.load %arg3[%c0_3, %c0_4] : memref<16x1xf32, #tpu.memory_space<vmem>>, vector<16x1xf32>
    %4 = vector.broadcast %3 : vector<16x1xf32> to vector<16x128xf32>
    %5 = arith.addf %2, %4 : vector<16x128xf32>
    %cst_5 = arith.constant 0.000000e+00 : f32
    %6 = vector.broadcast %cst_5 : f32 to vector<16x128xf32>
    %7 = arith.maximumf %5, %6 : vector<16x128xf32>
    %8 = arith.truncf %7 : vector<16x128xf32> to vector<16x128xbf16>
    %c0_6 = arith.constant 0 : index
    %c0_7 = arith.constant 0 : index
    %9 = vector.load %arg4[%c0_6, %c0_7] : memref<16x128xbf16, #tpu.memory_space<vmem>>, vector<16x128xbf16>
    tpu.vector_store %arg4[%c0_6, %c0_7], %8 {strides = array<i32>} : memref<16x128xbf16, #tpu.memory_space<vmem>>, vector<16x128xbf16>,
    return
  }
  func.func @transform_0(%arg0: i32) -> (i32, i32) {
    %c0_i32 = arith.constant 0 : i32
    %c0_i32_0 = arith.constant 0 : i32
    %c0_i32_1 = arith.constant 0 : i32
    return %c0_i32, %c0_i32_0 : i32, i32
  }
  func.func @transform_1(%arg0: i32) -> (i32, i32) {
    %c0_i32 = arith.constant 0 : i32
    %c0_i32_0 = arith.constant 0 : i32
    return %c0_i32, %arg0 : i32, i32
  }
  func.func @transform_2(%arg0: i32) -> (i32, i32) {
    %c0_i32 = arith.constant 0 : i32
    %c0_i32_0 = arith.constant 0 : i32
    %c0_i32_1 = arith.constant 0 : i32
    return %c0_i32, %c0_i32_0 : i32, i32
  }
  func.func @transform_3(%arg0: i32) -> (i32, i32) {
    %c0_i32 = arith.constant 0 : i32
    %c0_i32_0 = arith.constant 0 : i32
    return %c0_i32, %arg0 : i32, i32
  }
}

module attributes {stable_mosaic.version = 11 : i64} {
  func.func @_matmul_bn_kernel(%arg0: i32, %arg1: memref<32x144xbf16, #tpu.memory_space<vmem>>, %arg2: memref<144x32xbf16, #tpu.memory_space<vmem>>, %arg3: memref<32x1xf32, #tpu.memory_space<vmem>>, %arg4: memref<32x32xbf16, #tpu.memory_space<vmem>>) attributes {dimension_semantics = [#tpu.dimension_semantics<parallel>], iteration_bounds = array<i64: 1>, scalar_prefetch = 0 : i64, scratch_operands = 0 : i64, tpu.core_type = #tpu.core_type<tc>, window_params = [{pipeline_mode = #tpu.pipeline_mode<synchronous>, transform_indices = @transform_0, window_bounds = array<i64: 32, 144>}, {transform_indices = @transform_1, window_bounds = array<i64: 144, 32>}, {pipeline_mode = #tpu.pipeline_mode<synchronous>, transform_indices = @transform_2, window_bounds = array<i64: 32, 1>}, {transform_indices = @transform_3, window_bounds = array<i64: 32, 32>}]} {
    %c0 = arith.constant 0 : index
    %c0_0 = arith.constant 0 : index
    %0 = vector.load %arg1[%c0, %c0_0] : memref<32x144xbf16, #tpu.memory_space<vmem>>, vector<32x144xbf16>
    %c0_1 = arith.constant 0 : index
    %c0_2 = arith.constant 0 : index
    %1 = vector.load %arg2[%c0_1, %c0_2] : memref<144x32xbf16, #tpu.memory_space<vmem>>, vector<144x32xbf16>
    %cst = arith.constant dense<0.000000e+00> : vector<32x32xf32>
    %2 = tpu.matmul %0, %1, %cst {dimension_numbers = #tpu.dot_dimension_numbers<[1], [0], [0], [1], [0, 0, 1, 1], [], []>} : vector<32x144xbf16>, vector<144x32xbf16>, vector<32x32xf32> -> vector<32x32xf32>
    %c0_3 = arith.constant 0 : index
    %c0_4 = arith.constant 0 : index
    %3 = vector.load %arg3[%c0_3, %c0_4] : memref<32x1xf32, #tpu.memory_space<vmem>>, vector<32x1xf32>
    %4 = vector.broadcast %3 : vector<32x1xf32> to vector<32x32xf32>
    %5 = arith.addf %2, %4 : vector<32x32xf32>
    %cst_5 = arith.constant 0.000000e+00 : f32
    %6 = vector.broadcast %cst_5 : f32 to vector<32x32xf32>
    %7 = arith.maximumf %5, %6 : vector<32x32xf32>
    %8 = arith.truncf %7 : vector<32x32xf32> to vector<32x32xbf16>
    %c0_6 = arith.constant 0 : index
    %c0_7 = arith.constant 0 : index
    %9 = vector.load %arg4[%c0_6, %c0_7] : memref<32x32xbf16, #tpu.memory_space<vmem>>, vector<32x32xbf16>
    tpu.vector_store %arg4[%c0_6, %c0_7], %8 {strides = array<i32>} : memref<32x32xbf16, #tpu.memory_space<vmem>>, vector<32x32xbf16>,
    return
  }
  func.func @transform_0(%arg0: i32) -> (i32, i32) {
    %c0_i32 = arith.constant 0 : i32
    %c0_i32_0 = arith.constant 0 : i32
    %c0_i32_1 = arith.constant 0 : i32
    return %c0_i32, %c0_i32_0 : i32, i32
  }
  func.func @transform_1(%arg0: i32) -> (i32, i32) {
    %c0_i32 = arith.constant 0 : i32
    %c0_i32_0 = arith.constant 0 : i32
    return %c0_i32, %arg0 : i32, i32
  }
  func.func @transform_2(%arg0: i32) -> (i32, i32) {
    %c0_i32 = arith.constant 0 : i32
    %c0_i32_0 = arith.constant 0 : i32
    %c0_i32_1 = arith.constant 0 : i32
    return %c0_i32, %c0_i32_0 : i32, i32
  }
  func.func @transform_3(%arg0: i32) -> (i32, i32) {
    %c0_i32 = arith.constant 0 : i32
    %c0_i32_0 = arith.constant 0 : i32
    return %c0_i32, %arg0 : i32, i32
  }
}

module attributes {stable_mosaic.version = 11 : i64} {
  func.func @_matmul_bn_kernel(%arg0: i32, %arg1: memref<32x16xbf16, #tpu.memory_space<vmem>>, %arg2: memref<16x32xbf16, #tpu.memory_space<vmem>>, %arg3: memref<32x1xf32, #tpu.memory_space<vmem>>, %arg4: memref<32x32xbf16, #tpu.memory_space<vmem>>) attributes {dimension_semantics = [#tpu.dimension_semantics<parallel>], iteration_bounds = array<i64: 1>, scalar_prefetch = 0 : i64, scratch_operands = 0 : i64, tpu.core_type = #tpu.core_type<tc>, window_params = [{pipeline_mode = #tpu.pipeline_mode<synchronous>, transform_indices = @transform_0, window_bounds = array<i64: 32, 16>}, {transform_indices = @transform_1, window_bounds = array<i64: 16, 32>}, {pipeline_mode = #tpu.pipeline_mode<synchronous>, transform_indices = @transform_2, window_bounds = array<i64: 32, 1>}, {transform_indices = @transform_3, window_bounds = array<i64: 32, 32>}]} {
    %c0 = arith.constant 0 : index
    %c0_0 = arith.constant 0 : index
    %0 = vector.load %arg1[%c0, %c0_0] : memref<32x16xbf16, #tpu.memory_space<vmem>>, vector<32x16xbf16>
    %c0_1 = arith.constant 0 : index
    %c0_2 = arith.constant 0 : index
    %1 = vector.load %arg2[%c0_1, %c0_2] : memref<16x32xbf16, #tpu.memory_space<vmem>>, vector<16x32xbf16>
    %cst = arith.constant dense<0.000000e+00> : vector<32x32xf32>
    %2 = tpu.matmul %0, %1, %cst {dimension_numbers = #tpu.dot_dimension_numbers<[1], [0], [0], [1], [0, 0, 1, 1], [], []>} : vector<32x16xbf16>, vector<16x32xbf16>, vector<32x32xf32> -> vector<32x32xf32>
    %c0_3 = arith.constant 0 : index
    %c0_4 = arith.constant 0 : index
    %3 = vector.load %arg3[%c0_3, %c0_4] : memref<32x1xf32, #tpu.memory_space<vmem>>, vector<32x1xf32>
    %4 = vector.broadcast %3 : vector<32x1xf32> to vector<32x32xf32>
    %5 = arith.addf %2, %4 : vector<32x32xf32>
    %6 = arith.truncf %5 : vector<32x32xf32> to vector<32x32xbf16>
    %c0_5 = arith.constant 0 : index
    %c0_6 = arith.constant 0 : index
    %7 = vector.load %arg4[%c0_5, %c0_6] : memref<32x32xbf16, #tpu.memory_space<vmem>>, vector<32x32xbf16>
    tpu.vector_store %arg4[%c0_5, %c0_6], %6 {strides = array<i32>} : memref<32x32xbf16, #tpu.memory_space<vmem>>, vector<32x32xbf16>,
    return
  }
  func.func @transform_0(%arg0: i32) -> (i32, i32) {
    %c0_i32 = arith.constant 0 : i32
    %c0_i32_0 = arith.constant 0 : i32
    %c0_i32_1 = arith.constant 0 : i32
    return %c0_i32, %c0_i32_0 : i32, i32
  }
  func.func @transform_1(%arg0: i32) -> (i32, i32) {
    %c0_i32 = arith.constant 0 : i32
    %c0_i32_0 = arith.constant 0 : i32
    return %c0_i32, %arg0 : i32, i32
  }
  func.func @transform_2(%arg0: i32) -> (i32, i32) {
    %c0_i32 = arith.constant 0 : i32
    %c0_i32_0 = arith.constant 0 : i32
    %c0_i32_1 = arith.constant 0 : i32
    return %c0_i32, %c0_i32_0 : i32, i32
  }
  func.func @transform_3(%arg0: i32) -> (i32, i32) {
    %c0_i32 = arith.constant 0 : i32
    %c0_i32_0 = arith.constant 0 : i32
    return %c0_i32, %arg0 : i32, i32
  }
}

module attributes {stable_mosaic.version = 11 : i64} {
  func.func @_matmul_bn_kernel(%arg0: i32, %arg1: memref<32x288xbf16, #tpu.memory_space<vmem>>, %arg2: memref<288x32xbf16, #tpu.memory_space<vmem>>, %arg3: memref<32x1xf32, #tpu.memory_space<vmem>>, %arg4: memref<32x32xbf16, #tpu.memory_space<vmem>>) attributes {dimension_semantics = [#tpu.dimension_semantics<parallel>], iteration_bounds = array<i64: 1>, scalar_prefetch = 0 : i64, scratch_operands = 0 : i64, tpu.core_type = #tpu.core_type<tc>, window_params = [{pipeline_mode = #tpu.pipeline_mode<synchronous>, transform_indices = @transform_0, window_bounds = array<i64: 32, 288>}, {transform_indices = @transform_1, window_bounds = array<i64: 288, 32>}, {pipeline_mode = #tpu.pipeline_mode<synchronous>, transform_indices = @transform_2, window_bounds = array<i64: 32, 1>}, {transform_indices = @transform_3, window_bounds = array<i64: 32, 32>}]} {
    %c0 = arith.constant 0 : index
    %c0_0 = arith.constant 0 : index
    %0 = vector.load %arg1[%c0, %c0_0] : memref<32x288xbf16, #tpu.memory_space<vmem>>, vector<32x288xbf16>
    %c0_1 = arith.constant 0 : index
    %c0_2 = arith.constant 0 : index
    %1 = vector.load %arg2[%c0_1, %c0_2] : memref<288x32xbf16, #tpu.memory_space<vmem>>, vector<288x32xbf16>
    %cst = arith.constant dense<0.000000e+00> : vector<32x32xf32>
    %2 = tpu.matmul %0, %1, %cst {dimension_numbers = #tpu.dot_dimension_numbers<[1], [0], [0], [1], [0, 0, 1, 1], [], []>} : vector<32x288xbf16>, vector<288x32xbf16>, vector<32x32xf32> -> vector<32x32xf32>
    %c0_3 = arith.constant 0 : index
    %c0_4 = arith.constant 0 : index
    %3 = vector.load %arg3[%c0_3, %c0_4] : memref<32x1xf32, #tpu.memory_space<vmem>>, vector<32x1xf32>
    %4 = vector.broadcast %3 : vector<32x1xf32> to vector<32x32xf32>
    %5 = arith.addf %2, %4 : vector<32x32xf32>
    %cst_5 = arith.constant 0.000000e+00 : f32
    %6 = vector.broadcast %cst_5 : f32 to vector<32x32xf32>
    %7 = arith.maximumf %5, %6 : vector<32x32xf32>
    %8 = arith.truncf %7 : vector<32x32xf32> to vector<32x32xbf16>
    %c0_6 = arith.constant 0 : index
    %c0_7 = arith.constant 0 : index
    %9 = vector.load %arg4[%c0_6, %c0_7] : memref<32x32xbf16, #tpu.memory_space<vmem>>, vector<32x32xbf16>
    tpu.vector_store %arg4[%c0_6, %c0_7], %8 {strides = array<i32>} : memref<32x32xbf16, #tpu.memory_space<vmem>>, vector<32x32xbf16>,
    return
  }
  func.func @transform_0(%arg0: i32) -> (i32, i32) {
    %c0_i32 = arith.constant 0 : i32
    %c0_i32_0 = arith.constant 0 : i32
    %c0_i32_1 = arith.constant 0 : i32
    return %c0_i32, %c0_i32_0 : i32, i32
  }
  func.func @transform_1(%arg0: i32) -> (i32, i32) {
    %c0_i32 = arith.constant 0 : i32
    %c0_i32_0 = arith.constant 0 : i32
    return %c0_i32, %arg0 : i32, i32
  }
  func.func @transform_2(%arg0: i32) -> (i32, i32) {
    %c0_i32 = arith.constant 0 : i32
    %c0_i32_0 = arith.constant 0 : i32
    %c0_i32_1 = arith.constant 0 : i32
    return %c0_i32, %c0_i32_0 : i32, i32
  }
  func.func @transform_3(%arg0: i32) -> (i32, i32) {
    %c0_i32 = arith.constant 0 : i32
    %c0_i32_0 = arith.constant 0 : i32
    return %c0_i32, %arg0 : i32, i32
  }
}

module attributes {stable_mosaic.version = 11 : i64} {
  func.func @_matmul_bn_res_kernel(%arg0: i32, %arg1: memref<32x288xbf16, #tpu.memory_space<vmem>>, %arg2: memref<288x32xbf16, #tpu.memory_space<vmem>>, %arg3: memref<32x1xf32, #tpu.memory_space<vmem>>, %arg4: memref<32x32xbf16, #tpu.memory_space<vmem>>, %arg5: memref<32x32xbf16, #tpu.memory_space<vmem>>) attributes {dimension_semantics = [#tpu.dimension_semantics<parallel>], iteration_bounds = array<i64: 1>, scalar_prefetch = 0 : i64, scratch_operands = 0 : i64, tpu.core_type = #tpu.core_type<tc>, window_params = [{pipeline_mode = #tpu.pipeline_mode<synchronous>, transform_indices = @transform_0, window_bounds = array<i64: 32, 288>}, {transform_indices = @transform_1, window_bounds = array<i64: 288, 32>}, {pipeline_mode = #tpu.pipeline_mode<synchronous>, transform_indices = @transform_2, window_bounds = array<i64: 32, 1>}, {transform_indices = @transform_3, window_bounds = array<i64: 32, 32>}, {transform_indices = @transform_4, window_bounds = array<i64: 32, 32>}]} {
    %c0 = arith.constant 0 : index
    %c0_0 = arith.constant 0 : index
    %0 = vector.load %arg1[%c0, %c0_0] : memref<32x288xbf16, #tpu.memory_space<vmem>>, vector<32x288xbf16>
    %c0_1 = arith.constant 0 : index
    %c0_2 = arith.constant 0 : index
    %1 = vector.load %arg2[%c0_1, %c0_2] : memref<288x32xbf16, #tpu.memory_space<vmem>>, vector<288x32xbf16>
    %cst = arith.constant dense<0.000000e+00> : vector<32x32xf32>
    %2 = tpu.matmul %0, %1, %cst {dimension_numbers = #tpu.dot_dimension_numbers<[1], [0], [0], [1], [0, 0, 1, 1], [], []>} : vector<32x288xbf16>, vector<288x32xbf16>, vector<32x32xf32> -> vector<32x32xf32>
    %c0_3 = arith.constant 0 : index
    %c0_4 = arith.constant 0 : index
    %3 = vector.load %arg3[%c0_3, %c0_4] : memref<32x1xf32, #tpu.memory_space<vmem>>, vector<32x1xf32>
    %4 = vector.broadcast %3 : vector<32x1xf32> to vector<32x32xf32>
    %5 = arith.addf %2, %4 : vector<32x32xf32>
    %c0_5 = arith.constant 0 : index
    %c0_6 = arith.constant 0 : index
    %6 = vector.load %arg4[%c0_5, %c0_6] : memref<32x32xbf16, #tpu.memory_space<vmem>>, vector<32x32xbf16>
    %7 = arith.extf %6 : vector<32x32xbf16> to vector<32x32xf32>
    %8 = arith.addf %5, %7 : vector<32x32xf32>
    %cst_7 = arith.constant 0.000000e+00 : f32
    %9 = vector.broadcast %cst_7 : f32 to vector<32x32xf32>
    %10 = arith.maximumf %8, %9 : vector<32x32xf32>
    %11 = arith.truncf %10 : vector<32x32xf32> to vector<32x32xbf16>
    %c0_8 = arith.constant 0 : index
    %c0_9 = arith.constant 0 : index
    %12 = vector.load %arg5[%c0_8, %c0_9] : memref<32x32xbf16, #tpu.memory_space<vmem>>, vector<32x32xbf16>
    tpu.vector_store %arg5[%c0_8, %c0_9], %11 {strides = array<i32>} : memref<32x32xbf16, #tpu.memory_space<vmem>>, vector<32x32xbf16>,
    return
  }
  func.func @transform_0(%arg0: i32) -> (i32, i32) {
    %c0_i32 = arith.constant 0 : i32
    %c0_i32_0 = arith.constant 0 : i32
    %c0_i32_1 = arith.constant 0 : i32
    return %c0_i32, %c0_i32_0 : i32, i32
  }
  func.func @transform_1(%arg0: i32) -> (i32, i32) {
    %c0_i32 = arith.constant 0 : i32
    %c0_i32_0 = arith.constant 0 : i32
    return %c0_i32, %arg0 : i32, i32
  }
  func.func @transform_2(%arg0: i32) -> (i32, i32) {
    %c0_i32 = arith.constant 0 : i32
    %c0_i32_0 = arith.constant 0 : i32
    %c0_i32_1 = arith.constant 0 : i32
    return %c0_i32, %c0_i32_0 : i32, i32
  }
  func.func @transform_3(%arg0: i32) -> (i32, i32) {
    %c0_i32 = arith.constant 0 : i32
    %c0_i32_0 = arith.constant 0 : i32
    return %c0_i32, %arg0 : i32, i32
  }
  func.func @transform_4(%arg0: i32) -> (i32, i32) {
    %c0_i32 = arith.constant 0 : i32
    %c0_i32_0 = arith.constant 0 : i32
    return %c0_i32, %arg0 : i32, i32
  }
}

module attributes {stable_mosaic.version = 11 : i64} {
  func.func @_matmul_bn_kernel(%arg0: i32, %arg1: memref<64x288xbf16, #tpu.memory_space<vmem>>, %arg2: memref<288x8xbf16, #tpu.memory_space<vmem>>, %arg3: memref<64x1xf32, #tpu.memory_space<vmem>>, %arg4: memref<64x8xbf16, #tpu.memory_space<vmem>>) attributes {dimension_semantics = [#tpu.dimension_semantics<parallel>], iteration_bounds = array<i64: 1>, scalar_prefetch = 0 : i64, scratch_operands = 0 : i64, tpu.core_type = #tpu.core_type<tc>, window_params = [{pipeline_mode = #tpu.pipeline_mode<synchronous>, transform_indices = @transform_0, window_bounds = array<i64: 64, 288>}, {transform_indices = @transform_1, window_bounds = array<i64: 288, 8>}, {pipeline_mode = #tpu.pipeline_mode<synchronous>, transform_indices = @transform_2, window_bounds = array<i64: 64, 1>}, {transform_indices = @transform_3, window_bounds = array<i64: 64, 8>}]} {
    %c0 = arith.constant 0 : index
    %c0_0 = arith.constant 0 : index
    %0 = vector.load %arg1[%c0, %c0_0] : memref<64x288xbf16, #tpu.memory_space<vmem>>, vector<64x288xbf16>
    %c0_1 = arith.constant 0 : index
    %c0_2 = arith.constant 0 : index
    %1 = vector.load %arg2[%c0_1, %c0_2] : memref<288x8xbf16, #tpu.memory_space<vmem>>, vector<288x8xbf16>
    %cst = arith.constant dense<0.000000e+00> : vector<64x8xf32>
    %2 = tpu.matmul %0, %1, %cst {dimension_numbers = #tpu.dot_dimension_numbers<[1], [0], [0], [1], [0, 0, 1, 1], [], []>} : vector<64x288xbf16>, vector<288x8xbf16>, vector<64x8xf32> -> vector<64x8xf32>
    %c0_3 = arith.constant 0 : index
    %c0_4 = arith.constant 0 : index
    %3 = vector.load %arg3[%c0_3, %c0_4] : memref<64x1xf32, #tpu.memory_space<vmem>>, vector<64x1xf32>
    %4 = vector.broadcast %3 : vector<64x1xf32> to vector<64x8xf32>
    %5 = arith.addf %2, %4 : vector<64x8xf32>
    %cst_5 = arith.constant 0.000000e+00 : f32
    %6 = vector.broadcast %cst_5 : f32 to vector<64x8xf32>
    %7 = arith.maximumf %5, %6 : vector<64x8xf32>
    %8 = arith.truncf %7 : vector<64x8xf32> to vector<64x8xbf16>
    %c0_6 = arith.constant 0 : index
    %c0_7 = arith.constant 0 : index
    %9 = vector.load %arg4[%c0_6, %c0_7] : memref<64x8xbf16, #tpu.memory_space<vmem>>, vector<64x8xbf16>
    tpu.vector_store %arg4[%c0_6, %c0_7], %8 {strides = array<i32>} : memref<64x8xbf16, #tpu.memory_space<vmem>>, vector<64x8xbf16>,
    return
  }
  func.func @transform_0(%arg0: i32) -> (i32, i32) {
    %c0_i32 = arith.constant 0 : i32
    %c0_i32_0 = arith.constant 0 : i32
    %c0_i32_1 = arith.constant 0 : i32
    return %c0_i32, %c0_i32_0 : i32, i32
  }
  func.func @transform_1(%arg0: i32) -> (i32, i32) {
    %c0_i32 = arith.constant 0 : i32
    %c0_i32_0 = arith.constant 0 : i32
    return %c0_i32, %arg0 : i32, i32
  }
  func.func @transform_2(%arg0: i32) -> (i32, i32) {
    %c0_i32 = arith.constant 0 : i32
    %c0_i32_0 = arith.constant 0 : i32
    %c0_i32_1 = arith.constant 0 : i32
    return %c0_i32, %c0_i32_0 : i32, i32
  }
  func.func @transform_3(%arg0: i32) -> (i32, i32) {
    %c0_i32 = arith.constant 0 : i32
    %c0_i32_0 = arith.constant 0 : i32
    return %c0_i32, %arg0 : i32, i32
  }
}

module attributes {stable_mosaic.version = 11 : i64} {
  func.func @_matmul_bn_res_kernel(%arg0: i32, %arg1: memref<64x576xbf16, #tpu.memory_space<vmem>>, %arg2: memref<576x8xbf16, #tpu.memory_space<vmem>>, %arg3: memref<64x1xf32, #tpu.memory_space<vmem>>, %arg4: memref<64x8xbf16, #tpu.memory_space<vmem>>, %arg5: memref<64x8xbf16, #tpu.memory_space<vmem>>) attributes {dimension_semantics = [#tpu.dimension_semantics<parallel>], iteration_bounds = array<i64: 1>, scalar_prefetch = 0 : i64, scratch_operands = 0 : i64, tpu.core_type = #tpu.core_type<tc>, window_params = [{pipeline_mode = #tpu.pipeline_mode<synchronous>, transform_indices = @transform_0, window_bounds = array<i64: 64, 576>}, {transform_indices = @transform_1, window_bounds = array<i64: 576, 8>}, {pipeline_mode = #tpu.pipeline_mode<synchronous>, transform_indices = @transform_2, window_bounds = array<i64: 64, 1>}, {transform_indices = @transform_3, window_bounds = array<i64: 64, 8>}, {transform_indices = @transform_4, window_bounds = array<i64: 64, 8>}]} {
    %c0 = arith.constant 0 : index
    %c0_0 = arith.constant 0 : index
    %0 = vector.load %arg1[%c0, %c0_0] : memref<64x576xbf16, #tpu.memory_space<vmem>>, vector<64x576xbf16>
    %c0_1 = arith.constant 0 : index
    %c0_2 = arith.constant 0 : index
    %1 = vector.load %arg2[%c0_1, %c0_2] : memref<576x8xbf16, #tpu.memory_space<vmem>>, vector<576x8xbf16>
    %cst = arith.constant dense<0.000000e+00> : vector<64x8xf32>
    %2 = tpu.matmul %0, %1, %cst {dimension_numbers = #tpu.dot_dimension_numbers<[1], [0], [0], [1], [0, 0, 1, 1], [], []>} : vector<64x576xbf16>, vector<576x8xbf16>, vector<64x8xf32> -> vector<64x8xf32>
    %c0_3 = arith.constant 0 : index
    %c0_4 = arith.constant 0 : index
    %3 = vector.load %arg3[%c0_3, %c0_4] : memref<64x1xf32, #tpu.memory_space<vmem>>, vector<64x1xf32>
    %4 = vector.broadcast %3 : vector<64x1xf32> to vector<64x8xf32>
    %5 = arith.addf %2, %4 : vector<64x8xf32>
    %c0_5 = arith.constant 0 : index
    %c0_6 = arith.constant 0 : index
    %6 = vector.load %arg4[%c0_5, %c0_6] : memref<64x8xbf16, #tpu.memory_space<vmem>>, vector<64x8xbf16>
    %7 = arith.extf %6 : vector<64x8xbf16> to vector<64x8xf32>
    %8 = arith.addf %5, %7 : vector<64x8xf32>
    %cst_7 = arith.constant 0.000000e+00 : f32
    %9 = vector.broadcast %cst_7 : f32 to vector<64x8xf32>
    %10 = arith.maximumf %8, %9 : vector<64x8xf32>
    %11 = arith.truncf %10 : vector<64x8xf32> to vector<64x8xbf16>
    %c0_8 = arith.constant 0 : index
    %c0_9 = arith.constant 0 : index
    %12 = vector.load %arg5[%c0_8, %c0_9] : memref<64x8xbf16, #tpu.memory_space<vmem>>, vector<64x8xbf16>
    tpu.vector_store %arg5[%c0_8, %c0_9], %11 {strides = array<i32>} : memref<64x8xbf16, #tpu.memory_space<vmem>>, vector<64x8xbf16>,
    return
  }
  func.func @transform_0(%arg0: i32) -> (i32, i32) {
    %c0_i32 = arith.constant 0 : i32
    %c0_i32_0 = arith.constant 0 : i32
    %c0_i32_1 = arith.constant 0 : i32
    return %c0_i32, %c0_i32_0 : i32, i32
  }
  func.func @transform_1(%arg0: i32) -> (i32, i32) {
    %c0_i32 = arith.constant 0 : i32
    %c0_i32_0 = arith.constant 0 : i32
    return %c0_i32, %arg0 : i32, i32
  }
  func.func @transform_2(%arg0: i32) -> (i32, i32) {
    %c0_i32 = arith.constant 0 : i32
    %c0_i32_0 = arith.constant 0 : i32
    %c0_i32_1 = arith.constant 0 : i32
    return %c0_i32, %c0_i32_0 : i32, i32
  }
  func.func @transform_3(%arg0: i32) -> (i32, i32) {
    %c0_i32 = arith.constant 0 : i32
    %c0_i32_0 = arith.constant 0 : i32
    return %c0_i32, %arg0 : i32, i32
  }
  func.func @transform_4(%arg0: i32) -> (i32, i32) {
    %c0_i32 = arith.constant 0 : i32
    %c0_i32_0 = arith.constant 0 : i32
    return %c0_i32, %arg0 : i32, i32
  }
}

module attributes {stable_mosaic.version = 11 : i64} {
  func.func @_matmul_bn_kernel(%arg0: i32, %arg1: memref<64x32xbf16, #tpu.memory_space<vmem>>, %arg2: memref<32x8xbf16, #tpu.memory_space<vmem>>, %arg3: memref<64x1xf32, #tpu.memory_space<vmem>>, %arg4: memref<64x8xbf16, #tpu.memory_space<vmem>>) attributes {dimension_semantics = [#tpu.dimension_semantics<parallel>], iteration_bounds = array<i64: 1>, scalar_prefetch = 0 : i64, scratch_operands = 0 : i64, tpu.core_type = #tpu.core_type<tc>, window_params = [{pipeline_mode = #tpu.pipeline_mode<synchronous>, transform_indices = @transform_0, window_bounds = array<i64: 64, 32>}, {transform_indices = @transform_1, window_bounds = array<i64: 32, 8>}, {pipeline_mode = #tpu.pipeline_mode<synchronous>, transform_indices = @transform_2, window_bounds = array<i64: 64, 1>}, {transform_indices = @transform_3, window_bounds = array<i64: 64, 8>}]} {
    %c0 = arith.constant 0 : index
    %c0_0 = arith.constant 0 : index
    %0 = vector.load %arg1[%c0, %c0_0] : memref<64x32xbf16, #tpu.memory_space<vmem>>, vector<64x32xbf16>
    %c0_1 = arith.constant 0 : index
    %c0_2 = arith.constant 0 : index
    %1 = vector.load %arg2[%c0_1, %c0_2] : memref<32x8xbf16, #tpu.memory_space<vmem>>, vector<32x8xbf16>
    %cst = arith.constant dense<0.000000e+00> : vector<64x8xf32>
    %2 = tpu.matmul %0, %1, %cst {dimension_numbers = #tpu.dot_dimension_numbers<[1], [0], [0], [1], [0, 0, 1, 1], [], []>} : vector<64x32xbf16>, vector<32x8xbf16>, vector<64x8xf32> -> vector<64x8xf32>
    %c0_3 = arith.constant 0 : index
    %c0_4 = arith.constant 0 : index
    %3 = vector.load %arg3[%c0_3, %c0_4] : memref<64x1xf32, #tpu.memory_space<vmem>>, vector<64x1xf32>
    %4 = vector.broadcast %3 : vector<64x1xf32> to vector<64x8xf32>
    %5 = arith.addf %2, %4 : vector<64x8xf32>
    %6 = arith.truncf %5 : vector<64x8xf32> to vector<64x8xbf16>
    %c0_5 = arith.constant 0 : index
    %c0_6 = arith.constant 0 : index
    %7 = vector.load %arg4[%c0_5, %c0_6] : memref<64x8xbf16, #tpu.memory_space<vmem>>, vector<64x8xbf16>
    tpu.vector_store %arg4[%c0_5, %c0_6], %6 {strides = array<i32>} : memref<64x8xbf16, #tpu.memory_space<vmem>>, vector<64x8xbf16>,
    return
  }
  func.func @transform_0(%arg0: i32) -> (i32, i32) {
    %c0_i32 = arith.constant 0 : i32
    %c0_i32_0 = arith.constant 0 : i32
    %c0_i32_1 = arith.constant 0 : i32
    return %c0_i32, %c0_i32_0 : i32, i32
  }
  func.func @transform_1(%arg0: i32) -> (i32, i32) {
    %c0_i32 = arith.constant 0 : i32
    %c0_i32_0 = arith.constant 0 : i32
    return %c0_i32, %arg0 : i32, i32
  }
  func.func @transform_2(%arg0: i32) -> (i32, i32) {
    %c0_i32 = arith.constant 0 : i32
    %c0_i32_0 = arith.constant 0 : i32
    %c0_i32_1 = arith.constant 0 : i32
    return %c0_i32, %c0_i32_0 : i32, i32
  }
  func.func @transform_3(%arg0: i32) -> (i32, i32) {
    %c0_i32 = arith.constant 0 : i32
    %c0_i32_0 = arith.constant 0 : i32
    return %c0_i32, %arg0 : i32, i32
  }
}

module attributes {stable_mosaic.version = 11 : i64} {
  func.func @_chan_mean_kernel(%arg0: memref<64x8xbf16, #tpu.memory_space<vmem>>, %arg1: memref<1x8xf32, #tpu.memory_space<vmem>>) attributes {dimension_semantics = [], scalar_prefetch = 0 : i64, scratch_operands = 0 : i64, tpu.core_type = #tpu.core_type<tc>} {
    %c0 = arith.constant 0 : index
    %c0_0 = arith.constant 0 : index
    %0 = vector.load %arg0[%c0, %c0_0] : memref<64x8xbf16, #tpu.memory_space<vmem>>, vector<64x8xbf16>
    %1 = arith.extf %0 : vector<64x8xbf16> to vector<64x8xf32>
    %cst = arith.constant dense<0.000000e+00> : vector<8xf32>
    %2 = vector.multi_reduction <add>, %1, %cst [0] : vector<64x8xf32> to vector<8xf32>
    %3 = vector.shape_cast %2 : vector<8xf32> to vector<1x8xf32>
    %cst_1 = arith.constant 6.400000e+01 : f32
    %4 = vector.broadcast %cst_1 : f32 to vector<1x8xf32>
    %5 = arith.divf %3, %4 : vector<1x8xf32>
    %c0_2 = arith.constant 0 : index
    %c0_3 = arith.constant 0 : index
    %6 = vector.load %arg1[%c0_2, %c0_3] : memref<1x8xf32, #tpu.memory_space<vmem>>, vector<1x8xf32>
    tpu.vector_store %arg1[%c0_2, %c0_3], %5 {strides = array<i32>} : memref<1x8xf32, #tpu.memory_space<vmem>>, vector<1x8xf32>,
    return
  }
}

module attributes {stable_mosaic.version = 11 : i64} {
  func.func @_matmul_bn_kernel(%arg0: i32, %arg1: memref<64x576xbf16, #tpu.memory_space<vmem>>, %arg2: memref<576x8xbf16, #tpu.memory_space<vmem>>, %arg3: memref<64x1xf32, #tpu.memory_space<vmem>>, %arg4: memref<64x8xbf16, #tpu.memory_space<vmem>>) attributes {dimension_semantics = [#tpu.dimension_semantics<parallel>], iteration_bounds = array<i64: 1>, scalar_prefetch = 0 : i64, scratch_operands = 0 : i64, tpu.core_type = #tpu.core_type<tc>, window_params = [{pipeline_mode = #tpu.pipeline_mode<synchronous>, transform_indices = @transform_0, window_bounds = array<i64: 64, 576>}, {transform_indices = @transform_1, window_bounds = array<i64: 576, 8>}, {pipeline_mode = #tpu.pipeline_mode<synchronous>, transform_indices = @transform_2, window_bounds = array<i64: 64, 1>}, {transform_indices = @transform_3, window_bounds = array<i64: 64, 8>}]} {
    %c0 = arith.constant 0 : index
    %c0_0 = arith.constant 0 : index
    %0 = vector.load %arg1[%c0, %c0_0] : memref<64x576xbf16, #tpu.memory_space<vmem>>, vector<64x576xbf16>
    %c0_1 = arith.constant 0 : index
    %c0_2 = arith.constant 0 : index
    %1 = vector.load %arg2[%c0_1, %c0_2] : memref<576x8xbf16, #tpu.memory_space<vmem>>, vector<576x8xbf16>
    %cst = arith.constant dense<0.000000e+00> : vector<64x8xf32>
    %2 = tpu.matmul %0, %1, %cst {dimension_numbers = #tpu.dot_dimension_numbers<[1], [0], [0], [1], [0, 0, 1, 1], [], []>} : vector<64x576xbf16>, vector<576x8xbf16>, vector<64x8xf32> -> vector<64x8xf32>
    %c0_3 = arith.constant 0 : index
    %c0_4 = arith.constant 0 : index
    %3 = vector.load %arg3[%c0_3, %c0_4] : memref<64x1xf32, #tpu.memory_space<vmem>>, vector<64x1xf32>
    %4 = vector.broadcast %3 : vector<64x1xf32> to vector<64x8xf32>
    %5 = arith.addf %2, %4 : vector<64x8xf32>
    %cst_5 = arith.constant 0.000000e+00 : f32
    %6 = vector.broadcast %cst_5 : f32 to vector<64x8xf32>
    %7 = arith.maximumf %5, %6 : vector<64x8xf32>
    %8 = arith.truncf %7 : vector<64x8xf32> to vector<64x8xbf16>
    %c0_6 = arith.constant 0 : index
    %c0_7 = arith.constant 0 : index
    %9 = vector.load %arg4[%c0_6, %c0_7] : memref<64x8xbf16, #tpu.memory_space<vmem>>, vector<64x8xbf16>
    tpu.vector_store %arg4[%c0_6, %c0_7], %8 {strides = array<i32>} : memref<64x8xbf16, #tpu.memory_space<vmem>>, vector<64x8xbf16>,
    return
  }
  func.func @transform_0(%arg0: i32) -> (i32, i32) {
    %c0_i32 = arith.constant 0 : i32
    %c0_i32_0 = arith.constant 0 : i32
    %c0_i32_1 = arith.constant 0 : i32
    return %c0_i32, %c0_i32_0 : i32, i32
  }
  func.func @transform_1(%arg0: i32) -> (i32, i32) {
    %c0_i32 = arith.constant 0 : i32
    %c0_i32_0 = arith.constant 0 : i32
    return %c0_i32, %arg0 : i32, i32
  }
  func.func @transform_2(%arg0: i32) -> (i32, i32) {
    %c0_i32 = arith.constant 0 : i32
    %c0_i32_0 = arith.constant 0 : i32
    %c0_i32_1 = arith.constant 0 : i32
    return %c0_i32, %c0_i32_0 : i32, i32
  }
  func.func @transform_3(%arg0: i32) -> (i32, i32) {
    %c0_i32 = arith.constant 0 : i32
    %c0_i32_0 = arith.constant 0 : i32
    return %c0_i32, %arg0 : i32, i32
  }
}

</mosaic_0001>

<bundles_post_ra>
// kernel: _lambda_.22
= control target key start
LH: loop header
LB: loop body
LE: loop exit
PB: predicated region body
PF: predicated region fallthrough
CT: control target
= control target key end

     0   :  { %s1586_s12 = smov 0   ;;  %s1588_s13 = smov 0   ;;  %s2003_s0 = inlined_call_operand.vmem [shape: bf16[8,147], index: 0, kind: input, shape index: {}]   ;;  %s2004_s1 = inlined_call_operand.vmem [shape: bf16[147,2048], index: 1, kind: input, shape index: {}]   ;;  %s2005_s2 = inlined_call_operand.vmem [shape: f32[8,1], index: 2, kind: input, shape index: {}]   ;;  %s2006_s3 = inlined_call_operand.vmem [shape: bf16[8,2048], index: 3, kind: output, shape index: {}]  }
   0x1   :  { %s1590_s14 = smov 0  }
   0x2 LB: > { %s1131_s15 = sadd.s32 4294967295, %s1562_s14   ;;  %s1603_s16 = sadd.s32 1, %s1562_s14   ;;  %s1562_s14 = sphi %s1590_s14, %s2009_s14   ;;  %s1558_s13 = sphi %s1588_s13, %s2008_s13   ;;  %s1554_s12 = sphi %s1586_s12, %s2007_s12  }
   0x3   : > { %s38_s17 = ssub.s32 %s1562_s14, %s1603_s16  ;;  %s41_s18 = sadd.s32 1, %s1558_s13 }
   0x4   : > { %p39_p0 = scmp.eq.s32.totalorder %s38_s17, 0  ;;  %p48_p1 = scmp.ne.s32.totalorder %s1558_s13, %s1554_s12 }
   0x5   : > { %p49_p2 = scmp.eq.s32.totalorder %s1562_s14, 0  ;;  %p1134_p4 = scmp.ge.s32.totalorder %s1562_s14, 2 }
   0x6   : > { %s1612_s19 = scalar_select %p39_p0, %s1558_s13, %s41_s18  }
   0x7   : > { %p50_p3 = por %p49_p2, %p48_p1  ;;  %127 = sbr.rel (%p1134_p4) target bundleno = 92 (0x5c), region = 24 }
   0xc   : > { %130 = sbr.rel (!%p50_p3) target bundleno = 92 (0x5c), region = 28  ;;  %s132_s20 = sand.u32 (%p50_p3), 1, %s1558_s13  }
   0xd   : > { %s1438_s21 = sshll.u32 (%p50_p3), %s1562_s14, 5  ;;  %s1511_s22 = smul.u32 (%p50_p3), 608, %s132_s20 }
   0xe   : > { %s1620_s25 = scalar_lea.vmem (%p50_p3), %s2004_s1, %s1438_s21 }
   0xf   : > { %v150_v0 = vld [vmem:[%s1620_s25] sm:$0xff] (%p50_p3)  ;;  %v152_v1 = vld [vmem:[%s1620_s25 + $0x8] sm:$0xff] (%p50_p3)  ;;  %v154_v2 = vld [vmem:[%s1620_s25 + $0x10] sm:$0xff] (%p50_p3)  ;;  %s1625_s26 = scalar_lea.vmem (%p50_p3), [#allocation2], %s1511_s22 }
  0x10   : > { %151 = vst [vmem:[%s1625_s26] sm:$0xff] (%p50_p3), %v150_v0  ;;  %v156_v3 = vld [vmem:[%s1620_s25 + $0x18] sm:$0xff] (%p50_p3)  ;;  %v158_v4 = vld [vmem:[%s1620_s25 + $0x40] sm:$0xff] (%p50_p3)  ;;  %v160_v5 = vld [vmem:[%s1620_s25 + $0x48] sm:$0xff] (%p50_p3) }
  0x11   : > { %153 = vst [vmem:[%s1625_s26 + $0x8] sm:$0xff] %v152_v1  ;;  %v162_v6 = vld [vmem:[%s1620_s25 + $0x50] sm:$0xff]  ;;  %v164_v7 = vld [vmem:[%s1620_s25 + $0x58] sm:$0xff]  ;;  %v166_v8 = vld [vmem:[%s1620_s25 + $0x80] sm:$0xff] }
  0x12   : > { %155 = vst [vmem:[%s1625_s26 + $0x10] sm:$0xff] %v154_v2  ;;  %v168_v9 = vld [vmem:[%s1620_s25 + $0x88] sm:$0xff]  ;;  %v170_v10 = vld [vmem:[%s1620_s25 + $0x90] sm:$0xff]  ;;  %v172_v11 = vld [vmem:[%s1620_s25 + $0x98] sm:$0xff] }
  0x13   : > { %157 = vst [vmem:[%s1625_s26 + $0x18] sm:$0xff] %v156_v3  ;;  %v174_v12 = vld [vmem:[%s1620_s25 + $0xc0] sm:$0xff]  ;;  %v176_v13 = vld [vmem:[%s1620_s25 + $0xc8] sm:$0xff]  ;;  %v178_v14 = vld [vmem:[%s1620_s25 + $0xd0] sm:$0xff] }
  0x14   : > { %159 = vst [vmem:[%s1625_s26 + $0x20] sm:$0xff] %v158_v4  ;;  %v180_v15 = vld [vmem:[%s1620_s25 + $0xd8] sm:$0xff]  ;;  %v182_v16 = vld [vmem:[%s1620_s25 + $0x100] sm:$0xff]  ;;  %v184_v17 = vld [vmem:[%s1620_s25 + $0x108] sm:$0xff] }
  0x15   : > { %161 = vst [vmem:[%s1625_s26 + $0x28] sm:$0xff] %v160_v5  ;;  %v186_v18 = vld [vmem:[%s1620_s25 + $0x110] sm:$0xff]  ;;  %v188_v19 = vld [vmem:[%s1620_s25 + $0x118] sm:$0xff]  ;;  %v190_v20 = vld [vmem:[%s1620_s25 + $0x140] sm:$0xff] }
  0x16   : > { %163 = vst [vmem:[%s1625_s26 + $0x30] sm:$0xff] %v162_v6  ;;  %v192_v21 = vld [vmem:[%s1620_s25 + $0x148] sm:$0xff]  ;;  %v194_v22 = vld [vmem:[%s1620_s25 + $0x150] sm:$0xff]  ;;  %v196_v23 = vld [vmem:[%s1620_s25 + $0x158] sm:$0xff] }
  0x17   : > { %165 = vst [vmem:[%s1625_s26 + $0x38] sm:$0xff] %v164_v7  ;;  %v198_v24 = vld [vmem:[%s1620_s25 + $0x180] sm:$0xff]  ;;  %v200_v25 = vld [vmem:[%s1620_s25 + $0x188] sm:$0xff]  ;;  %v202_v26 = vld [vmem:[%s1620_s25 + $0x190] sm:$0xff] }
  0x18   : > { %167 = vst [vmem:[%s1625_s26 + $0x40] sm:$0xff] %v166_v8  ;;  %v204_v27 = vld [vmem:[%s1620_s25 + $0x198] sm:$0xff]  ;;  %v206_v28 = vld [vmem:[%s1620_s25 + $0x1c0] sm:$0xff]  ;;  %v208_v29 = vld [vmem:[%s1620_s25 + $0x1c8] sm:$0xff] }
  0x19   : > { %169 = vst [vmem:[%s1625_s26 + $0x48] sm:$0xff] %v168_v9  ;;  %v210_v30 = vld [vmem:[%s1620_s25 + $0x1d0] sm:$0xff]  ;;  %v212_v31 = vld [vmem:[%s1620_s25 + $0x1d8] sm:$0xff]  ;;  %v214_v32 = vld [vmem:[%s1620_s25 + $0x200] sm:$0xff] }
  0x1a   : > { %171 = vst [vmem:[%s1625_s26 + $0x50] sm:$0xff] %v170_v10  ;;  %v216_v33 = vld [vmem:[%s1620_s25 + $0x208] sm:$0xff]  ;;  %v218_v34 = vld [vmem:[%s1620_s25 + $0x210] sm:$0xff]  ;;  %v220_v35 = vld [vmem:[%s1620_s25 + $0x218] sm:$0xff] }
  0x1b   : > { %173 = vst [vmem:[%s1625_s26 + $0x58] sm:$0xff] %v172_v11  ;;  %v222_v36 = vld [vmem:[%s1620_s25 + $0x240] sm:$0xff]  ;;  %v224_v37 = vld [vmem:[%s1620_s25 + $0x248] sm:$0xff]  ;;  %v226_v38 = vld [vmem:[%s1620_s25 + $0x250] sm:$0xff] }
  0x1c   : > { %175 = vst [vmem:[%s1625_s26 + $0x60] sm:$0xff] %v174_v12  ;;  %v228_v39 = vld [vmem:[%s1620_s25 + $0x258] sm:$0xff]  ;;  %v230_v40 = vld [vmem:[%s1620_s25 + $0x280] sm:$0xff]  ;;  %v232_v41 = vld [vmem:[%s1620_s25 + $0x288] sm:$0xff] }
  0x1d   : > { %177 = vst [vmem:[%s1625_s26 + $0x68] sm:$0xff] %v176_v13  ;;  %v234_v42 = vld [vmem:[%s1620_s25 + $0x290] sm:$0xff]  ;;  %v236_v43 = vld [vmem:[%s1620_s25 + $0x298] sm:$0xff]  ;;  %v238_v44 = vld [vmem:[%s1620_s25 + $0x2c0] sm:$0xff] }
  0x1e   : > { %179 = vst [vmem:[%s1625_s26 + $0x70] sm:$0xff] %v178_v14  ;;  %v240_v45 = vld [vmem:[%s1620_s25 + $0x2c8] sm:$0xff]  ;;  %v242_v46 = vld [vmem:[%s1620_s25 + $0x2d0] sm:$0xff]  ;;  %v244_v47 = vld [vmem:[%s1620_s25 + $0x2d8] sm:$0xff] }
  0x1f   : > { %181 = vst [vmem:[%s1625_s26 + $0x78] sm:$0xff] %v180_v15  ;;  %v246_v48 = vld [vmem:[%s1620_s25 + $0x300] sm:$0xff]  ;;  %v248_v49 = vld [vmem:[%s1620_s25 + $0x308] sm:$0xff]  ;;  %v250_v50 = vld [vmem:[%s1620_s25 + $0x310] sm:$0xff] }
  0x20   : > { %183 = vst [vmem:[%s1625_s26 + $0x80] sm:$0xff] %v182_v16  ;;  %v252_v51 = vld [vmem:[%s1620_s25 + $0x318] sm:$0xff]  ;;  %v254_v52 = vld [vmem:[%s1620_s25 + $0x340] sm:$0xff]  ;;  %v256_v53 = vld [vmem:[%s1620_s25 + $0x348] sm:$0xff] }
  0x21   : > { %185 = vst [vmem:[%s1625_s26 + $0x88] sm:$0xff] %v184_v17  ;;  %v258_v54 = vld [vmem:[%s1620_s25 + $0x350] sm:$0xff]  ;;  %v260_v55 = vld [vmem:[%s1620_s25 + $0x358] sm:$0xff]  ;;  %v262_v56 = vld [vmem:[%s1620_s25 + $0x380] sm:$0xff] }
  0x22   : > { %187 = vst [vmem:[%s1625_s26 + $0x90] sm:$0xff] %v186_v18  ;;  %v264_v57 = vld [vmem:[%s1620_s25 + $0x388] sm:$0xff]  ;;  %v266_v58 = vld [vmem:[%s1620_s25 + $0x390] sm:$0xff]  ;;  %v268_v59 = vld [vmem:[%s1620_s25 + $0x398] sm:$0xff] }
  0x23   : > { %189 = vst [vmem:[%s1625_s26 + $0x98] sm:$0xff] %v188_v19  ;;  %v270_v60 = vld [vmem:[%s1620_s25 + $0x3c0] sm:$0xff]  ;;  %v272_v61 = vld [vmem:[%s1620_s25 + $0x3c8] sm:$0xff]  ;;  %v274_v62 = vld [vmem:[%s1620_s25 + $0x3d0] sm:$0xff] }
  0x24   : > { %191 = vst [vmem:[%s1625_s26 + $0xa0] sm:$0xff] %v190_v20  ;;  %v276_v63 = vld [vmem:[%s1620_s25 + $0x3d8] sm:$0xff]  ;;  %v278_v0 = vld [vmem:[%s1620_s25 + $0x400] sm:$0xff]  ;;  %v280_v1 = vld [vmem:[%s1620_s25 + $0x408] sm:$0xff] }
  0x25   : > { %193 = vst [vmem:[%s1625_s26 + $0xa8] sm:$0xff] %v192_v21  ;;  %v282_v2 = vld [vmem:[%s1620_s25 + $0x410] sm:$0xff]  ;;  %v284_v3 = vld [vmem:[%s1620_s25 + $0x418] sm:$0xff]  ;;  %v286_v4 = vld [vmem:[%s1620_s25 + $0x440] sm:$0xff] }
  0x26   : > { %195 = vst [vmem:[%s1625_s26 + $0xb0] sm:$0xff] %v194_v22  ;;  %v288_v5 = vld [vmem:[%s1620_s25 + $0x448] sm:$0xff]  ;;  %v290_v6 = vld [vmem:[%s1620_s25 + $0x450] sm:$0xff]  ;;  %v292_v7 = vld [vmem:[%s1620_s25 + $0x458] sm:$0xff] }
  0x27   : > { %197 = vst [vmem:[%s1625_s26 + $0xb8] sm:$0xff] %v196_v23  ;;  %v294_v8 = vld [vmem:[%s1620_s25 + $0x480] sm:$0xff]  ;;  %v296_v9 = vld [vmem:[%s1620_s25 + $0x488] sm:$0xff]  ;;  %v298_v10 = vld [vmem:[%s1620_s25 + $0x490] sm:$0xff] }
  0x28   : > { %199 = vst [vmem:[%s1625_s26 + $0xc0] sm:$0xff] %v198_v24  ;;  %v300_v11 = vld [vmem:[%s1620_s25 + $0x498] sm:$0xff] }
  0x29   : > { %201 = vst [vmem:[%s1625_s26 + $0xc8] sm:$0xff] %v200_v25 }
  0x2a   : > { %203 = vst [vmem:[%s1625_s26 + $0xd0] sm:$0xff] %v202_v26 }
  0x2b   : > { %205 = vst [vmem:[%s1625_s26 + $0xd8] sm:$0xff] %v204_v27 }
  0x2c   : > { %207 = vst [vmem:[%s1625_s26 + $0xe0] sm:$0xff] %v206_v28 }
  0x2d   : > { %209 = vst [vmem:[%s1625_s26 + $0xe8] sm:$0xff] %v208_v29 }
  0x2e   : > { %211 = vst [vmem:[%s1625_s26 + $0xf0] sm:$0xff] %v210_v30 }
  0x2f   : > { %213 = vst [vmem:[%s1625_s26 + $0xf8] sm:$0xff] %v212_v31 }
  0x30   : > { %215 = vst [vmem:[%s1625_s26 + $0x100] sm:$0xff] %v214_v32 }
  0x31   : > { %217 = vst [vmem:[%s1625_s26 + $0x108] sm:$0xff] %v216_v33 }
  0x32   : > { %219 = vst [vmem:[%s1625_s26 + $0x110] sm:$0xff] %v218_v34 }
  0x33   : > { %221 = vst [vmem:[%s1625_s26 + $0x118] sm:$0xff] %v220_v35 }
  0x34   : > { %223 = vst [vmem:[%s1625_s26 + $0x120] sm:$0xff] %v222_v36 }
  0x35   : > { %225 = vst [vmem:[%s1625_s26 + $0x128] sm:$0xff] %v224_v37 }
  0x36   : > { %227 = vst [vmem:[%s1625_s26 + $0x130] sm:$0xff] %v226_v38 }
  0x37   : > { %229 = vst [vmem:[%s1625_s26 + $0x138] sm:$0xff] %v228_v39 }
  0x38   : > { %231 = vst [vmem:[%s1625_s26 + $0x140] sm:$0xff] %v230_v40 }
  0x39   : > { %233 = vst [vmem:[%s1625_s26 + $0x148] sm:$0xff] %v232_v41 }
  0x3a   : > { %235 = vst [vmem:[%s1625_s26 + $0x150] sm:$0xff] %v234_v42 }
  0x3b   : > { %237 = vst [vmem:[%s1625_s26 + $0x158] sm:$0xff] %v236_v43 }
  0x3c   : > { %239 = vst [vmem:[%s1625_s26 + $0x160] sm:$0xff] %v238_v44 }
  0x3d   : > { %241 = vst [vmem:[%s1625_s26 + $0x168] sm:$0xff] %v240_v45 }
  0x3e   : > { %243 = vst [vmem:[%s1625_s26 + $0x170] sm:$0xff] %v242_v46 }
  0x3f   : > { %245 = vst [vmem:[%s1625_s26 + $0x178] sm:$0xff] %v244_v47 }
  0x40   : > { %247 = vst [vmem:[%s1625_s26 + $0x180] sm:$0xff] %v246_v48 }
  0x41   : > { %249 = vst [vmem:[%s1625_s26 + $0x188] sm:$0xff] %v248_v49 }
  0x42   : > { %251 = vst [vmem:[%s1625_s26 + $0x190] sm:$0xff] %v250_v50 }
  0x43   : > { %253 = vst [vmem:[%s1625_s26 + $0x198] sm:$0xff] %v252_v51 }
  0x44   : > { %255 = vst [vmem:[%s1625_s26 + $0x1a0] sm:$0xff] %v254_v52 }
  0x45   : > { %257 = vst [vmem:[%s1625_s26 + $0x1a8] sm:$0xff] %v256_v53 }
  0x46   : > { %259 = vst [vmem:[%s1625_s26 + $0x1b0] sm:$0xff] %v258_v54 }
  0x47   : > { %261 = vst [vmem:[%s1625_s26 + $0x1b8] sm:$0xff] %v260_v55 }
  0x48   : > { %263 = vst [vmem:[%s1625_s26 + $0x1c0] sm:$0xff] %v262_v56 }
  0x49   : > { %265 = vst [vmem:[%s1625_s26 + $0x1c8] sm:$0xff] %v264_v57 }
  0x4a   : > { %267 = vst [vmem:[%s1625_s26 + $0x1d0] sm:$0xff] %v266_v58 }
  0x4b   : > { %269 = vst [vmem:[%s1625_s26 + $0x1d8] sm:$0xff] %v268_v59 }
  0x4c   : > { %271 = vst [vmem:[%s1625_s26 + $0x1e0] sm:$0xff] %v270_v60 }
  0x4d   : > { %273 = vst [vmem:[%s1625_s26 + $0x1e8] sm:$0xff] %v272_v61 }
  0x4e   : > { %275 = vst [vmem:[%s1625_s26 + $0x1f0] sm:$0xff] %v274_v62 }
  0x4f   : > { %277 = vst [vmem:[%s1625_s26 + $0x1f8] sm:$0xff] %v276_v63 }
  0x50   : > { %279 = vst [vmem:[%s1625_s26 + $0x200] sm:$0xff] %v278_v0 }
  0x51   : > { %281 = vst [vmem:[%s1625_s26 + $0x208] sm:$0xff] %v280_v1 }
  0x52   : > { %283 = vst [vmem:[%s1625_s26 + $0x210] sm:$0xff] %v282_v2 }
  0x53   : > { %285 = vst [vmem:[%s1625_s26 + $0x218] sm:$0xff] %v284_v3 }
  0x54   : > { %287 = vst [vmem:[%s1625_s26 + $0x220] sm:$0xff] %v286_v4 }
  0x55   : > { %289 = vst [vmem:[%s1625_s26 + $0x228] sm:$0xff] %v288_v5 }
  0x56   : > { %291 = vst [vmem:[%s1625_s26 + $0x230] sm:$0xff] %v290_v6 }
  0x57   : > { %293 = vst [vmem:[%s1625_s26 + $0x238] sm:$0xff] %v292_v7 }
  0x58   : > { %295 = vst [vmem:[%s1625_s26 + $0x240] sm:$0xff] %v294_v8 }
  0x59   : > { %297 = vst [vmem:[%s1625_s26 + $0x248] sm:$0xff] %v296_v9 }
  0x5a   : > { %299 = vst [vmem:[%s1625_s26 + $0x250] sm:$0xff] %v298_v10 }
  0x5b   : > { %301 = vst [vmem:[%s1625_s26 + $0x258] sm:$0xff] %v300_v11 }
  0x5c PF: > { %p1137_p5 = scmp.ge.s32.totalorder %s1562_s14, 1  ;;  %p306_p6 = scmp.lt.s32.totalorder %s1562_s14, 3 }
  0x5e   : > { %p307_p7 = pnand %p1137_p5, %p306_p6 }
  0x5f   : > { %s313_s27 = sand.u32 (!%p307_p7), 1, %s1554_s12   ;;  %s1138_s7 = sshll.u32 (!%p307_p7), %s1131_s15, 3 }
  0x60   : > { %310 = sbr.rel (%p307_p7) target bundleno = 337 (0x151), region = 51  ;;  %p338_p8 = scmp.lt.s32.totalorder (!%p307_p7), %s1138_s7, 15 }
  0x61   : > { %s1512_s28 = smul.u32 (!%p307_p7), 608, %s313_s27 }
  0x63   : > { %s1779_s29 = scalar_lea.vmem (!%p307_p7), [#allocation2], %s1512_s28 }
  0x65   : > { %vm817_vm0 = vcmask 1040384   ;;  %vm818_vm1 = vcmask 1041408   ;;  %v1564_v12 = vmov 65535   ;;  %v1366_v14 = vld [vmem:[%s1779_s29 + $0x1c0] sm:$0xf]  ;;  %vm813_vm2 = vcmask 154624  }
  0x66   : > { %v819_v13 = vsel %vm817_vm0, 4294967295, %v1564_v12  ;;  %v1499_v15 = vld [vmem:[%s1779_s29 + $0x1dc] sm:$0xf0]  ;;  %v1374_v16 = vld [vmem:[%s1779_s29 + $0x1c8] sm:$0xf]  ;;  %s2011_s7 = smov (!%p338_p8, %s1138_s7), 15 }
  0x67   : > { %v1367_v17 = vor.u32 %v1499_v15, %v1366_v14  ;;  %v1500_v18 = vld [vmem:[%s1779_s29 + $0x1e4] sm:$0xf0]  ;;  %v417_v19 = vld [vmem:[%s1779_s29 + $0x240] sm:$0x33]  ;;  %v1791_v27 = vsel %vm818_vm1, %v819_v13, 0  ;;  %s1139_s8 = sshll.u32 %s2011_s7, 2 }
  0x68   : > { %v1334_v20 = vld [vmem:[%s1779_s29 + $0x180] sm:$0xf]  ;;  %v1375_v21 = vor.u32 %v1500_v18, %v1374_v16  ;;  %v653_v22 = vunpack.c.l.b16 %v417_v19  ;;  %v654_v23 = vunpack.c.h.b16 %v417_v19  ;;  %v1342_v25 = vld [vmem:[%s1779_s29 + $0x188] sm:$0xf]  ;;  %v1503_v34 = vld [vmem:[%s1779_s29 + $0x204] sm:$0xf]  ;;  %s1987_s11 = scalar_lea.vmem %s2006_s3, %s1139_s8 }
  0x69   : > { %v1491_v24 = vld [vmem:[%s1779_s29 + $0x19c] sm:$0xf0]  ;;  %v1492_v26 = vld [vmem:[%s1779_s29 + $0x1a4] sm:$0xf0]  ;;  %845 = vmatpush.bf16.msra.mxu0 %v1367_v17  ;;  %v1400_v35 = vld [vmem:[%s1779_s29 + $0x220] sm:$0xf0] }
  0x6a   : > { %v1335_v28 = vor.u32 %v1491_v24, %v1334_v20  ;;  %v1398_v29 = vld [vmem:[%s1779_s29 + $0x200] sm:$0xf]  ;;  %897 = vmatpush.bf16.msra.mxu1 %v1375_v21  ;;  %v733_v31 = vpack.c.b16 %v653_v22, %v653_v22  ;;  %v734_v32 = vpack.c.b16 %v654_v23, %v654_v23  ;;  %v1343_v36 = vor.u32 %v1492_v26, %v1342_v25  ;;  %v1803_v37 = vld [vmem:[%s1779_s29 + $0x248] sm:$0x33]  ;;  %v1495_v42 = vld [vmem:[%s1779_s29 + $0x1c4] sm:$0xf] }
  0x6b   : > { %v1797_v30 = vld [vmem:[%s2003_s0] sm:$0xff]  ;;  %v655_v44 = vunpack.c.l.b16 %v1803_v37  ;;  %v1310_v46 = vld [vmem:[%s1779_s29 + $0x148] sm:$0xf]  ;;  %v1403_v50 = vor.u32 %v1503_v34, %v1400_v35  ;;  %v1496_v61 = vld [vmem:[%s1779_s29 + $0x1cc] sm:$0xf] }
  0x6c   : > { %v1507_v33 = vld [vmem:[%s1779_s29 + $0x21c] sm:$0xf0]  ;;  %v822_v40 = vand.u32 %v1791_v27, %v733_v31  ;;  %v825_v41 = vand.u32 %v1791_v27, %v734_v32  ;;  %v1368_v43 = vld [vmem:[%s1779_s29 + $0x1e0] sm:$0xf0]  ;;  %v1484_v47 = vld [vmem:[%s1779_s29 + $0x164] sm:$0xf0]  ;;  %v429_v48 = vunpack.c.h.b16 %v1797_v30  ;;  %v656_v32 = vunpack.c.h.b16 %v1803_v37 }
  0x6d   : > { %v1302_v38 = vld [vmem:[%s1779_s29 + $0x140] sm:$0xf]  ;;  %846 = vmatpush.bf16.msra.mxu0 %v1335_v28  ;;  %v1399_v49 = vor.u32 %v1507_v33, %v1398_v29  ;;  %v735_v51 = vpack.c.b16 %v655_v44, %v655_v44  ;;  %v1371_v54 = vor.u32 %v1495_v42, %v1368_v43  ;;  %v1487_v55 = vld [vmem:[%s1779_s29 + $0x184] sm:$0xf]  ;;  %v1311_v58 = vor.u32 %v1484_v47, %v1310_v46  ;;  %v1406_v59 = vld [vmem:[%s1779_s29 + $0x208] sm:$0xf] }
  0x6e   : > { %v1483_v39 = vld [vmem:[%s1779_s29 + $0x15c] sm:$0xf0]  ;;  %864 = vmatpush.bf16.msra.mxu2 %v822_v40  ;;  %890 = vmatpush.bf16.msra.mxu3 %v825_v41  ;;  %v1336_v56 = vld [vmem:[%s1779_s29 + $0x1a0] sm:$0xf0]  ;;  %v1508_v60 = vld [vmem:[%s1779_s29 + $0x224] sm:$0xf0]  ;;  %v1823_v62 = vpack.c.b16 %v429_v48, %v429_v48 }
  0x6f   : > { %v1303_v45 = vor.u32 %v1483_v39, %v1302_v38  ;;  %v1270_v52 = vld [vmem:[%s1779_s29 + $0x100] sm:$0xf]  ;;  %898 = vmatpush.bf16.msra.mxu1 %v1343_v36  ;;  %v828_v57 = vand.u32 %v1791_v27, %v735_v51  ;;  %v1376_v0 = vld [vmem:[%s1779_s29 + $0x1e8] sm:$0xf0]  ;;  %v1278_v1 = vld [vmem:[%s1779_s29 + $0x108] sm:$0xf]  ;;  %v1339_v5 = vor.u32 %v1487_v55, %v1336_v56  ;;  %v1407_v6 = vor.u32 %v1508_v60, %v1406_v59 }
  0x70   : > { %v1475_v53 = vld [vmem:[%s1779_s29 + $0x11c] sm:$0xf0]  ;;  %v1476_v2 = vld [vmem:[%s1779_s29 + $0x124] sm:$0xf0]  ;;  %v1379_v7 = vor.u32 %v1496_v61, %v1376_v0  ;;  %v1479_v9 = vld [vmem:[%s1779_s29 + $0x144] sm:$0xf] }
  0x71   : > { %847 = vmatpush.bf16.msra.mxu0 %v1303_v45  ;;  %v1271_v63 = vor.u32 %v1475_v53, %v1270_v52  ;;  %v1238_v3 = vld [vmem:[%s1779_s29 + $0xc0] sm:$0xf]  ;;  %v1279_v8 = vor.u32 %v1476_v2, %v1278_v1  ;;  %v1304_v10 = vld [vmem:[%s1779_s29 + $0x160] sm:$0xf0]  ;;  %v1488_v11 = vld [vmem:[%s1779_s29 + $0x18c] sm:$0xf]  ;;  %v736_v45 = vpack.c.b16 %v656_v32, %v656_v32 }
  0x72   : > { %865 = vmatpush.bf16.msra.mxu2 %v1399_v49  ;;  %891 = vmatpush.bf16.msra.mxu3 %v1403_v50  ;;  %v1467_v4 = vld [vmem:[%s1779_s29 + $0xdc] sm:$0xf0]  ;;  %v1344_v13 = vld [vmem:[%s1779_s29 + $0x1a8] sm:$0xf0]  ;;  %v1246_v14 = vld [vmem:[%s1779_s29 + $0xc8] sm:$0xf]  ;;  %v1307_v18 = vor.u32 %v1479_v9, %v1304_v10 }
  0x73   : > { %899 = vmatpush.bf16.msra.mxu1 %v1311_v58  ;;  %v1239_v12 = vor.u32 %v1467_v4, %v1238_v3  ;;  %v1468_v15 = vld [vmem:[%s1779_s29 + $0xe4] sm:$0xf0]  ;;  %v1206_v16 = vld [vmem:[%s1779_s29 + $0x80] sm:$0xf]  ;;  %v1347_v19 = vor.u32 %v1488_v11, %v1344_v13  ;;  %v1471_v21 = vld [vmem:[%s1779_s29 + $0x104] sm:$0xf]  ;;  %v831_v59 = vand.u32 %v1791_v27, %v736_v45 }
  0x74   : > { %v1459_v17 = vld [vmem:[%s1779_s29 + $0x9c] sm:$0xf0]  ;;  %v1247_v20 = vor.u32 %v1468_v15, %v1246_v14  ;;  %v1272_v22 = vld [vmem:[%s1779_s29 + $0x120] sm:$0xf0]  ;;  %v1480_v23 = vld [vmem:[%s1779_s29 + $0x14c] sm:$0xf] }
  0x75   : > { %1429 = vmatmul.msk.bf16.vlgmr.msra.gmra.mxu3 %vm813_vm2, %v1823_v62  ;;  %848 = vmatpush.bf16.msra.mxu0 %v1271_v63  ;;  %v1207_v24 = vor.u32 %v1459_v17, %v1206_v16  ;;  %v1312_v25 = vld [vmem:[%s1779_s29 + $0x168] sm:$0xf0]  ;;  %v1214_v26 = vld [vmem:[%s1779_s29 + $0x88] sm:$0xf]  ;;  %v1174_v29 = vld [vmem:[%s1779_s29 + $0x40] sm:$0xf]  ;;  %v1275_v33 = vor.u32 %v1471_v21, %v1272_v22 }
  0x76   : > { %871 = vmatpush.bf16.msrb.mxu2 %v1371_v54  ;;  %916 = vmatpush.bf16.msrb.mxu3 %v828_v57  ;;  %v1460_v28 = vld [vmem:[%s1779_s29 + $0xa4] sm:$0xf0]  ;;  %v1451_v31 = vld [vmem:[%s1779_s29 + $0x5c] sm:$0xf0]  ;;  %v1315_v34 = vor.u32 %v1480_v23, %v1312_v25  ;;  %v1463_v36 = vld [vmem:[%s1779_s29 + $0xc4] sm:$0xf]  ;;  %v428_v57 = vunpack.c.l.b16 %v1797_v30 }
  0x77   : > { %1428 = vmatmul.msk.bf16.vlgmr.msra.gmra.mxu2 %vm813_vm2, %v1823_v62  ;;  %900 = vmatpush.bf16.msra.mxu1 %v1279_v8  ;;  %v1215_v35 = vor.u32 %v1460_v28, %v1214_v26  ;;  %v1240_v38 = vld [vmem:[%s1779_s29 + $0xe0] sm:$0xf0]  ;;  %v1472_v39 = vld [vmem:[%s1779_s29 + $0x10c] sm:$0xf]  ;;  %v1175_v40 = vor.u32 %v1451_v31, %v1174_v29  ;;  %v1182_v42 = vld [vmem:[%s1779_s29 + $0x48] sm:$0xf] }
  0x78   : > { %v1280_v41 = vld [vmem:[%s1779_s29 + $0x128] sm:$0xf0]  ;;  %v1452_v43 = vld [vmem:[%s1779_s29 + $0x64] sm:$0xf0]  ;;  %v1142_v37 = vld [vmem:[%s1779_s29] sm:$0xf]  ;;  %v1243_v46 = vor.u32 %v1463_v36, %v1240_v38 }
  0x79   : > { %849 = vmatpush.bf16.msra.mxu0 %v1239_v12  ;;  %v1443_v44 = vld [vmem:[%s1779_s29 + $0x1c] sm:$0xf0]  ;;  %v1455_v47 = vld [vmem:[%s1779_s29 + $0x84] sm:$0xf]  ;;  %v1283_v48 = vor.u32 %v1472_v39, %v1280_v41  ;;  %v1183_v49 = vor.u32 %v1452_v43, %v1182_v42  ;;  %v1464_v51 = vld [vmem:[%s1779_s29 + $0xcc] sm:$0xf] }
  0x7a   : > { %872 = vmatpush.bf16.msrb.mxu2 %v1339_v5  ;;  %917 = vmatpush.bf16.msrb.mxu3 %v1407_v6  ;;  %v1208_v50 = vld [vmem:[%s1779_s29 + $0xa0] sm:$0xf0]  ;;  %v419_v52 = vld [vmem:[%s1779_s29 + $0x250] sm:$0x33]  ;;  %v1143_v53 = vor.u32 %v1443_v44, %v1142_v37  ;;  %v1248_v54 = vld [vmem:[%s1779_s29 + $0xe8] sm:$0xf0]  ;;  %v1875_v6 = vpack.c.b16 %v428_v57, %v428_v57 }
  0x7b   : > { %901 = vmatpush.bf16.msra.mxu1 %v1247_v20  ;;  %v1150_v55 = vld [vmem:[%s1779_s29 + $0x8] sm:$0xf]  ;;  %v657_v58 = vunpack.c.l.b16 %v419_v52  ;;  %v658_v60 = vunpack.c.h.b16 %v419_v52  ;;  %v1211_v61 = vor.u32 %v1455_v47, %v1208_v50  ;;  %v1504_v63 = vld [vmem:[%s1779_s29 + $0x20c] sm:$0xf]  ;;  %v1251_v2 = vor.u32 %v1464_v51, %v1248_v54  ;;  %v1447_v4 = vld [vmem:[%s1779_s29 + $0x44] sm:$0xf] }
  0x7c   : > { %v1444_v56 = vld [vmem:[%s1779_s29 + $0x24] sm:$0xf0]  ;;  %v1408_v0 = vld [vmem:[%s1779_s29 + $0x228] sm:$0xf0]  ;;  %v1176_v30 = vld [vmem:[%s1779_s29 + $0x60] sm:$0xf0] }
  0x7d   : > { %850 = vmatpush.bf16.msra.mxu0 %v1207_v24  ;;  %v737_v1 = vpack.c.b16 %v657_v58, %v657_v58  ;;  %v1151_v3 = vor.u32 %v1444_v56, %v1150_v55  ;;  %v1456_v5 = vld [vmem:[%s1779_s29 + $0x8c] sm:$0xf]  ;;  %v1497_v8 = vld [vmem:[%s1779_s29 + $0x1d4] sm:$0xf]  ;;  %v1411_v11 = vor.u32 %v1504_v63, %v1408_v0  ;;  %v738_v12 = vpack.c.b16 %v658_v60, %v658_v60  ;;  %v1414_v13 = vld [vmem:[%s1779_s29 + $0x210] sm:$0xf] }
  0x7e   : > { %923 = vmatpush.bf16.msra.mxu3 %v1379_v7  ;;  %873 = vmatpush.bf16.msrb.mxu2 %v1307_v18  ;;  %v1216_v7 = vld [vmem:[%s1779_s29 + $0xa8] sm:$0xf0]  ;;  %v1384_v9 = vld [vmem:[%s1779_s29 + $0x1f0] sm:$0xf0]  ;;  %v1509_v14 = vld [vmem:[%s1779_s29 + $0x22c] sm:$0xf0]  ;;  %v1179_v15 = vor.u32 %v1447_v4, %v1176_v30 }
  0x7f   : > { %902 = vmatpush.bf16.msra.mxu1 %v1215_v35  ;;  %v834_v10 = vand.u32 %v1791_v27, %v737_v1  ;;  %v1219_v16 = vor.u32 %v1456_v5, %v1216_v7  ;;  %v1387_v17 = vor.u32 %v1497_v8, %v1384_v9  ;;  %v1439_v18 = vld [vmem:[%s1779_s29 + $0x4] sm:$0xf]  ;;  %v1448_v20 = vld [vmem:[%s1779_s29 + $0x4c] sm:$0xf]  ;;  %v1382_v22 = vld [vmem:[%s1779_s29 + $0x1d0] sm:$0xf]  ;;  %v1415_v24 = vor.u32 %v1509_v14, %v1414_v13 }
  0x80   : > { %v1184_v21 = vld [vmem:[%s1779_s29 + $0x68] sm:$0xf0]  ;;  %v1501_v23 = vld [vmem:[%s1779_s29 + $0x1ec] sm:$0xf0]  ;;  %v1489_v25 = vld [vmem:[%s1779_s29 + $0x194] sm:$0xf]  ;;  %v837_v28 = vand.u32 %v1791_v27, %v738_v12 }
  0x81   : > { %851 = vmatpush.bf16.msra.mxu0 %v1175_v40  ;;  %v1352_v26 = vld [vmem:[%s1779_s29 + $0x1b0] sm:$0xf0]  ;;  %v1565_v29 = vmov 0   ;;  %v421_v31 = vld [vmem:[%s2005_s2] sm:$0xff]  ;;  %v1187_v35 = vor.u32 %v1448_v20, %v1184_v21  ;;  %v1383_v36 = vor.u32 %v1501_v23, %v1382_v22  ;;  %v1440_v38 = vld [vmem:[%s1779_s29 + $0xc] sm:$0xf] }
  0x82   : > { %924 = vmatpush.bf16.msra.mxu3 %v1347_v19  ;;  %874 = vmatpush.bf16.msrb.mxu2 %v1275_v33  ;;  %v1144_v19 = vld [vmem:[%s1779_s29 + $0x20] sm:$0xf0]  ;;  %v1505_v33 = vld [vmem:[%s1779_s29 + $0x214] sm:$0xf]  ;;  %v1152_v39 = vld [vmem:[%s1779_s29 + $0x28] sm:$0xf0]  ;;  %v1355_v40 = vor.u32 %v1489_v25, %v1352_v26 }
  0x83   : > { %903 = vmatpush.bf16.msra.mxu1 %v1183_v49  ;;  %1539 = vset.pattern.permute.xlu0 %v1565_v29  ;;  %v1147_v32 = vor.u32 %v1439_v18, %v1144_v19  ;;  %v1350_v41 = vld [vmem:[%s1779_s29 + $0x190] sm:$0xf]  ;;  %v1481_v43 = vld [vmem:[%s1779_s29 + $0x154] sm:$0xf]  ;;  %v1390_v44 = vld [vmem:[%s1779_s29 + $0x1d8] sm:$0xf]  ;;  %v1155_v47 = vor.u32 %v1440_v38, %v1152_v39 }
  0x84   : > { %v1493_v42 = vld [vmem:[%s1779_s29 + $0x1ac] sm:$0xf0]  ;;  %424 = vperm.xlu0 %1539, %v421_v31   ;;  %v1320_v37 = vld [vmem:[%s1779_s29 + $0x170] sm:$0xf0]  ;;  %v1502_v45 = vld [vmem:[%s1779_s29 + $0x1f4] sm:$0xf0] }
  0x85   : > { %1430 = vmatmul.msk.bf16.vlgmr.msrb.gmra.mxu3 %vm813_vm2, %v1823_v62  ;;  %852 = vmatpush.bf16.msra.mxu0 %v1143_v53  ;;  %v1323_v49 = vor.u32 %v1481_v43, %v1320_v37  ;;  %v1391_v50 = vor.u32 %v1502_v45, %v1390_v44  ;;  %v1318_v51 = vld [vmem:[%s1779_s29 + $0x150] sm:$0xf]  ;;  %v1473_v53 = vld [vmem:[%s1779_s29 + $0x114] sm:$0xf]  ;;  %v1358_v55 = vld [vmem:[%s1779_s29 + $0x198] sm:$0xf] }
  0x86   : > { %925 = vmatpush.bf16.msra.mxu3 %v1315_v34  ;;  %875 = vmatpush.bf16.msrb.mxu2 %v1243_v46  ;;  %v1416_v34 = vld [vmem:[%s1779_s29 + $0x230] sm:$0xf0]  ;;  %v1485_v52 = vld [vmem:[%s1779_s29 + $0x16c] sm:$0xf0]  ;;  %v1494_v56 = vld [vmem:[%s1779_s29 + $0x1b4] sm:$0xf0] }
  0x87   : > { %904 = vmatpush.bf16.msra.mxu1 %v1151_v3  ;;  %v1419_v46 = vor.u32 %v1505_v33, %v1416_v34  ;;  %v1288_v54 = vld [vmem:[%s1779_s29 + $0x130] sm:$0xf0]  ;;  %v1319_v57 = vor.u32 %v1485_v52, %v1318_v51  ;;  %v1286_v58 = vld [vmem:[%s1779_s29 + $0x110] sm:$0xf]  ;;  %v1498_v63 = vld [vmem:[%s1779_s29 + $0x1dc] sm:$0xf] }
  0x88   : > { %853 = vmatmul.bf16.vlgmr.msra.gmra.mxu0 %v1875_v6  ;;  %v1291_v60 = vor.u32 %v1473_v53, %v1288_v54  ;;  %v1392_v0 = vld [vmem:[%s1779_s29 + $0x1f8] sm:$0xf0]  ;;  %v1465_v1 = vld [vmem:[%s1779_s29 + $0xd4] sm:$0xf]  ;;  %v1326_v3 = vld [vmem:[%s1779_s29 + $0x158] sm:$0xf] }
  0x89   : > { %942 = vmatpush.bf16.msrb.mxu0 %v831_v59  ;;  %v1477_v59 = vld [vmem:[%s1779_s29 + $0x12c] sm:$0xf0]  ;;  %v1486_v4 = vld [vmem:[%s1779_s29 + $0x174] sm:$0xf0]  ;;  %v1395_v5 = vor.u32 %v1498_v63, %v1392_v0  ;;  %v1360_v12 = vld [vmem:[%s1779_s29 + $0x1b8] sm:$0xf0] }
  0x8a   : > { %926 = vmatpush.bf16.msra.mxu3 %v1283_v48  ;;  %876 = vmatpush.bf16.msrb.mxu2 %v1211_v61  ;;  %v1351_v48 = vor.u32 %v1493_v42, %v1350_v41  ;;  %v1359_v61 = vor.u32 %v1494_v56, %v1358_v55  ;;  %v1287_v30 = vor.u32 %v1477_v59, %v1286_v58  ;;  %v1254_v7 = vld [vmem:[%s1779_s29 + $0xd0] sm:$0xf]  ;;  %v1457_v13 = vld [vmem:[%s1779_s29 + $0x94] sm:$0xf]  ;;  %v1328_v25 = vld [vmem:[%s1779_s29 + $0x178] sm:$0xf0] }
  0x8b   : > { %968 = vmatpush.bf16.msrb.mxu1 %v834_v10  ;;  %v1469_v8 = vld [vmem:[%s1779_s29 + $0xec] sm:$0xf0]  ;;  %v1327_v10 = vor.u32 %v1486_v4, %v1326_v3  ;;  %v1224_v14 = vld [vmem:[%s1779_s29 + $0xb0] sm:$0xf0]  ;;  %v1262_v29 = vld [vmem:[%s1779_s29 + $0xd8] sm:$0xf] }
  0x8c   : > { %905 = vmatmul.bf16.vlgmr.msra.gmra.mxu1 %v1875_v6  ;;  %v1255_v18 = vor.u32 %v1469_v8, %v1254_v7  ;;  %v1222_v20 = vld [vmem:[%s1779_s29 + $0x90] sm:$0xf]  ;;  %v1227_v22 = vor.u32 %v1457_v13, %v1224_v14  ;;  %v1449_v26 = vld [vmem:[%s1779_s29 + $0x54] sm:$0xf]  ;;  %v1470_v31 = vld [vmem:[%s1779_s29 + $0xf4] sm:$0xf0] }
  0x8d   : > { %943 = vmatpush.bf16.msrb.mxu0 %v1411_v11  ;;  %v1490_v11 = vld [vmem:[%s1779_s29 + $0x19c] sm:$0xf]  ;;  %v1461_v21 = vld [vmem:[%s1779_s29 + $0xac] sm:$0xf0]  ;;  %v1263_v39 = vor.u32 %v1470_v31, %v1262_v29  ;;  %v1441_v42 = vld [vmem:[%s1779_s29 + $0x14] sm:$0xf] }
  0x8e   : > { %927 = vmatpush.bf16.msra.mxu3 %v1251_v2  ;;  %877 = vmatpush.bf16.msrb.mxu2 %v1179_v15  ;;  %v1256_v2 = vld [vmem:[%s1779_s29 + $0xf0] sm:$0xf0]  ;;  %v1294_v15 = vld [vmem:[%s1779_s29 + $0x118] sm:$0xf]  ;;  %v1363_v19 = vor.u32 %v1490_v11, %v1360_v12  ;;  %v1223_v33 = vor.u32 %v1461_v21, %v1222_v20  ;;  %v1296_v41 = vld [vmem:[%s1779_s29 + $0x138] sm:$0xf0] }
  0x8f   : > { %969 = vmatpush.bf16.msrb.mxu1 %v1415_v24  ;;  %v1259_v9 = vor.u32 %v1465_v1, %v1256_v2  ;;  %v1482_v24 = vld [vmem:[%s1779_s29 + $0x15c] sm:$0xf]  ;;  %v1160_v43 = vld [vmem:[%s1779_s29 + $0x30] sm:$0xf0]  ;;  %v1230_v37 = vld [vmem:[%s1779_s29 + $0x98] sm:$0xf] }
  0x90   : > { %v1331_v34 = vor.u32 %v1482_v24, %v1328_v25  ;;  %v1462_v44 = vld [vmem:[%s1779_s29 + $0xb4] sm:$0xf0]  ;;  %v1158_v51 = vld [vmem:[%s1779_s29 + $0x10] sm:$0xf]  ;;  %v1466_v53 = vld [vmem:[%s1779_s29 + $0xdc] sm:$0xf] }
  0x91   : > { %975 = vmatpush.bf16.msra.mxu0 %v1387_v17  ;;  %v420_v17 = vld [vmem:[%s1779_s29 + $0x258] sm:$0x33]  ;;  %v1445_v52 = vld [vmem:[%s1779_s29 + $0x2c] sm:$0xf0] }
  0x92   : > { %928 = vmatpush.bf16.msra.mxu3 %v1219_v16  ;;  %878 = vmatpush.bf16.msrb.mxu2 %v1147_v32  ;;  %v1478_v16 = vld [vmem:[%s1779_s29 + $0x134] sm:$0xf0]  ;;  %v660_v32 = vunpack.c.h.b16 %v420_v17  ;;  %v659_v45 = vunpack.c.l.b16 %v420_v17  ;;  %v1264_v54 = vld [vmem:[%s1779_s29 + $0xf8] sm:$0xf0] }
  0x93   : > { %994 = vmatpush.bf16.msra.mxu1 %v837_v28  ;;  %v1295_v23 = vor.u32 %v1478_v16, %v1294_v15  ;;  %v1192_v28 = vld [vmem:[%s1779_s29 + $0x70] sm:$0xf0]  ;;  %v1198_v55 = vld [vmem:[%s1779_s29 + $0x58] sm:$0xf]  ;;  %v1506_v59 = vld [vmem:[%s1779_s29 + $0x21c] sm:$0xf]  ;;  %v1267_v63 = vor.u32 %v1466_v53, %v1264_v54 }
  0x94   : > { %v1195_v38 = vor.u32 %v1449_v26, %v1192_v28  ;;  %v1454_v56 = vld [vmem:[%s1779_s29 + $0x74] sm:$0xf0]  ;;  %v1458_v1 = vld [vmem:[%s1779_s29 + $0x9c] sm:$0xf] }
  0x95   : > { %976 = vmatpush.bf16.msra.mxu0 %v1355_v40  ;;  %879 = vmatmul.bf16.vlgmr.msrb.gmra.mxu2 %v1875_v6  ;;  %v1474_v40 = vld [vmem:[%s1779_s29 + $0x11c] sm:$0xf]  ;;  %v1199_v0 = vor.u32 %v1454_v56, %v1198_v55  ;;  %v1166_v4 = vld [vmem:[%s1779_s29 + $0x18] sm:$0xf] }
  0x96   : > { %929 = vmatpush.bf16.msra.mxu3 %v1187_v35  ;;  %949 = vmatpush.bf16.msra.mxu2 %v1383_v36  ;;  %v1190_v35 = vld [vmem:[%s1779_s29 + $0x50] sm:$0xf]  ;;  %v1232_v3 = vld [vmem:[%s1779_s29 + $0xb8] sm:$0xf0]  ;;  %v1422_v7 = vld [vmem:[%s1779_s29 + $0x218] sm:$0xf] }
  0x97   : > { %995 = vmatpush.bf16.msra.mxu1 %v1419_v46  ;;  %v1453_v36 = vld [vmem:[%s1779_s29 + $0x6c] sm:$0xf0]  ;;  %v740_v46 = vpack.c.b16 %v660_v32, %v660_v32  ;;  %v1510_v8 = vld [vmem:[%s1779_s29 + $0x234] sm:$0xf0]  ;;  %v1200_v11 = vld [vmem:[%s1779_s29 + $0x78] sm:$0xf0] }
  0x98   : > { %1431 = vmatmul.msk.bf16.vlgmr.msrb.gmra.mxu0 %vm813_vm2, %v1823_v62  ;;  %v1423_v12 = vor.u32 %v1510_v8, %v1422_v7  ;;  %v1442_v14 = vld [vmem:[%s1779_s29 + $0x1c] sm:$0xf] }
  0x99   : > { %977 = vmatpush.bf16.msra.mxu0 %v1323_v49  ;;  %v1163_v49 = vor.u32 %v1441_v42, %v1160_v43  ;;  %v843_v58 = vand.u32 %v1791_v27, %v740_v46  ;;  %v1168_v15 = vld [vmem:[%s1779_s29 + $0x38] sm:$0xf0] }
  0x9a   : > { %930 = vmatpush.bf16.msra.mxu3 %v1155_v47  ;;  %950 = vmatpush.bf16.msra.mxu2 %v1351_v48  ;;  %v1191_v47 = vor.u32 %v1453_v36, %v1190_v35  ;;  %v1299_v48 = vor.u32 %v1474_v40, %v1296_v41  ;;  %v1171_v16 = vor.u32 %v1442_v14, %v1168_v15 }
  0x9c   : > { %1432 = vmatmul.msk.bf16.vlgmr.msrb.gmra.mxu1 %vm813_vm2, %v1823_v62 }
  0x9d   : > { %931 = vmatmul.bf16.vlgmr.msra.gmra.mxu3 %v1875_v6  ;;  %978 = vmatpush.bf16.msra.mxu0 %v1291_v60  ;;  %v1424_v60 = vld [vmem:[%s1779_s29 + $0x238] sm:$0xf0] }
  0x9e   : > { %1001 = vmatpush.bf16.msrb.mxu3 %v1391_v50  ;;  %951 = vmatpush.bf16.msra.mxu2 %v1319_v57  ;;  %v1231_v50 = vor.u32 %v1462_v44, %v1230_v37  ;;  %v739_v57 = vpack.c.b16 %v659_v45, %v659_v45 }
  0x9f   : > { %1027 = vmatpush.bf16.msrb.mxu1 %v1395_v5  ;;  %v1427_v5 = vor.u32 %v1506_v59, %v1424_v60 }
  0xa0   : > { %v840_v2 = vand.u32 %v1791_v27, %v739_v57  ;;  %v1235_v27 = vor.u32 %v1458_v1, %v1232_v3 }
  0xa1   : > { %979 = vmatpush.bf16.msra.mxu0 %v1259_v9 }
  0xa2   : > { %1002 = vmatpush.bf16.msrb.mxu3 %v1359_v61  ;;  %952 = vmatpush.bf16.msra.mxu2 %v1287_v30  ;;  %v1159_v61 = vor.u32 %v1445_v52, %v1158_v51  ;;  %v1446_v30 = vld [vmem:[%s1779_s29 + $0x34] sm:$0xf0] }
  0xa3   : > { %1028 = vmatpush.bf16.msrb.mxu1 %v1363_v19  ;;  %v1167_v9 = vor.u32 %v1446_v30, %v1166_v4 }
  0xa5   : > { %980 = vmatpush.bf16.msra.mxu0 %v1227_v22 }
  0xa6   : > { %1003 = vmatpush.bf16.msrb.mxu3 %v1327_v10  ;;  %953 = vmatpush.bf16.msra.mxu2 %v1255_v18  ;;  %v1450_v10 = vld [vmem:[%s1779_s29 + $0x5c] sm:$0xf] }
  0xa7   : > { %1029 = vmatpush.bf16.msrb.mxu1 %v1331_v34  ;;  %v1203_v13 = vor.u32 %v1450_v10, %v1200_v11 }
  0xa9   : > { %981 = vmatpush.bf16.msra.mxu0 %v1195_v38 }
  0xaa   : > { %1004 = vmatpush.bf16.msrb.mxu3 %v1295_v23  ;;  %954 = vmatpush.bf16.msra.mxu2 %v1223_v33 }
  0xab   : > { %1030 = vmatpush.bf16.msrb.mxu1 %v1299_v48 }
  0xac   : > { %1433 = vmatmul.msk.bf16.vlgmr.msra.gmra.mxu1 %vm813_vm2, %v1823_v62 }
  0xad   : > { %982 = vmatpush.bf16.msra.mxu0 %v1163_v49 }
  0xae   : > { %1005 = vmatpush.bf16.msrb.mxu3 %v1263_v39  ;;  %955 = vmatpush.bf16.msra.mxu2 %v1191_v47 }
  0xaf   : > { %1031 = vmatpush.bf16.msrb.mxu1 %v1267_v63 }
  0xb0   : > { %983 = vmatmul.bf16.vlgmr.msra.gmra.mxu0 %v1875_v6 }
  0xb1   : > { %1046 = vmatpush.bf16.msrb.mxu0 %v843_v58 }
  0xb2   : > { %1006 = vmatpush.bf16.msrb.mxu3 %v1231_v50  ;;  %956 = vmatpush.bf16.msra.mxu2 %v1159_v61 }
  0xb3   : > { %1032 = vmatpush.bf16.msrb.mxu1 %v1235_v27 }
  0xb5   : > { %1047 = vmatpush.bf16.msrb.mxu0 %v1427_v5  ;;  %957 = vmatmul.bf16.vlgmr.msra.gmra.mxu2 %v1875_v6 }
  0xb6   : > { %1007 = vmatpush.bf16.msrb.mxu3 %v1199_v0  ;;  %1020 = vmatpush.bf16.msrb.mxu2 %v840_v2 }
  0xb7   : > { %1033 = vmatpush.bf16.msrb.mxu1 %v1203_v13 }
  0xba   : > { %1008 = vmatpush.bf16.msrb.mxu3 %v1167_v9  ;;  %1021 = vmatpush.bf16.msrb.mxu2 %v1423_v12 }
  0xbb   : > { %1034 = vmatpush.bf16.msrb.mxu1 %v1171_v16 }
  0xbd   : > { %1009 = vmatmul.bf16.vlgmr.msrb.gmra.mxu3 %v1875_v6 }
  0xbe   : > { %1035 = vmatmul.bf16.vlgmr.msrb.gmra.mxu1 %v1875_v6 }
  0xc0   : > { %1435 = vmatmul.msk.bf16.vlgmr.msrb.gmra.mxu0 %vm813_vm2, %v1823_v62 }
  0xc5   : > { %1434 = vmatmul.msk.bf16.vlgmr.msrb.gmra.mxu2 %vm813_vm2, %v1823_v62 }
  0xf6   : > { %v425_v25 = vpop.permute.xlu0 %424 }
  0xf8   : > { %v893_v17 = vpop.f32.mrf.mxu3 }
  0xfa   : > { %v867_v18 = vpop.f32.mrf.mxu2 }
 0x100   : > { %v895_v19 = vpop.f32.mrf.mxu3 }
 0x102   : > { %v869_v20 = vpop.f32.mrf.mxu2 }
 0x105   : > { %v854_v21 = vpop.f32.mrf.mxu0 }
 0x106   : > { %v855_v6 = vadd.f32 %v854_v21, %v425_v25 }
 0x108   : > { %v919_v23 = vpop.f32.mrf.mxu3  ;;  %v868_v31 = vadd.f32 %v867_v18, %v855_v6 }
 0x109   : > { %v906_v22 = vpop.f32.mrf.mxu1 }
 0x10a   : > { %v907_v62 = vadd.f32 %v906_v22, %v425_v25  ;;  %v1053_v36 = vmax.f32 %v868_v31, 0.0 }
 0x10c   : > { %v920_v41 = vadd.f32 %v919_v23, %v907_v62 }
 0x10d   : > { %v856_v24 = vpop.f32.mrf.mxu0 }
 0x10e   : > { %v1055_v44 = vmax.f32 %v920_v41, 0.0 }
 0x110   : > { %v921_v28 = vpop.f32.mrf.mxu3 }
 0x111   : > { %v908_v26 = vpop.f32.mrf.mxu1 }
 0x115   : > { %v945_v33 = vpop.f32.mrf.mxu0 }
 0x118   : > { %v880_v29 = vpop.f32.mrf.mxu2 }
 0x119   : > { %v881_v32 = vadd.f32 %v880_v29, %v425_v25  ;;  %v971_v35 = vpop.f32.mrf.mxu1 }
 0x11b   : > { %v894_v34 = vadd.f32 %v893_v17, %v881_v32 }
 0x11d   : > { %v1054_v38 = vmax.f32 %v894_v34, 0.0  ;;  %v947_v46 = vpop.f32.mrf.mxu0 }
 0x11f   : > { %v1061_v42 = vpack.c.bf16 %v1054_v38, %v1053_v36 }
 0x120   : > { %v932_v39 = vpop.f32.mrf.mxu3  ;;  %v882_v37 = vpop.f32.mrf.mxu2 }
 0x121   : > { %v933_v40 = vadd.f32 %v932_v39, %v425_v25  ;;  %1065 = vst [vmem:[%s1987_s11] sm:$0xff] %v1061_v42  ;;  %v973_v47 = vpop.f32.mrf.mxu1 }
 0x123   : > { %v946_v43 = vadd.f32 %v945_v33, %v933_v40 }
 0x125   : > { %v1056_v45 = vmax.f32 %v946_v43, 0.0 }
 0x127   : > { %v1062_v48 = vpack.c.bf16 %v1056_v45, %v1055_v44 }
 0x128   : > { %v934_v49 = vpop.f32.mrf.mxu3 }
 0x129   : > { %1066 = vst [vmem:[%s1987_s11 + $0x8] sm:$0xff] %v1062_v48  ;;  %v997_v50 = vpop.f32.mrf.mxu1 }
 0x12d   : > { %v984_v51 = vpop.f32.mrf.mxu0 }
 0x12e   : > { %v985_v52 = vadd.f32 %v984_v51, %v425_v25 }
 0x130   : > { %v998_v56 = vadd.f32 %v997_v50, %v985_v52 }
 0x131   : > { %v999_v53 = vpop.f32.mrf.mxu1 }
 0x132   : > { %v1058_v59 = vmax.f32 %v998_v56, 0.0 }
 0x135   : > { %v986_v54 = vpop.f32.mrf.mxu0 }
 0x138   : > { %v958_v55 = vpop.f32.mrf.mxu2 }
 0x139   : > { %v959_v57 = vadd.f32 %v958_v55, %v425_v25 }
 0x13b   : > { %v972_v58 = vadd.f32 %v971_v35, %v959_v57  ;;  %v1036_v0 = vpop.f32.mrf.mxu1 }
 0x13c   : > { %v1037_v3 = vadd.f32 %v1036_v0, %v425_v25 }
 0x13d   : > { %v1057_v60 = vmax.f32 %v972_v58, 0.0  ;;  %v1049_v1 = vpop.f32.mrf.mxu0 }
 0x13e   : > { %v1050_v30 = vadd.f32 %v1049_v1, %v1037_v3 }
 0x13f   : > { %v1063_v63 = vpack.c.bf16 %v1058_v59, %v1057_v60 }
 0x140   : > { %v1010_v61 = vpop.f32.mrf.mxu3  ;;  %v960_v2 = vpop.f32.mrf.mxu2  ;;  %v1060_v9 = vmax.f32 %v1050_v30, 0.0 }
 0x141   : > { %1067 = vst [vmem:[%s1987_s11 + $0x10] sm:$0xff] %v1063_v63  ;;  %v1011_v4 = vadd.f32 %v1010_v61, %v425_v25 }
 0x143   : > { %v1038_v7 = vpop.f32.mrf.mxu1 }
 0x145   : > { %v1051_v8 = vpop.f32.mrf.mxu0 }
 0x148   : > { %v1012_v5 = vpop.f32.mrf.mxu3  ;;  %v1023_v27 = vpop.f32.mrf.mxu2 }
 0x149   : > { %v1024_v10 = vadd.f32 %v1023_v27, %v1011_v4 }
 0x14b   : > { %v1059_v11 = vmax.f32 %v1024_v10, 0.0 }
 0x14d   : > { %v1064_v12 = vpack.c.bf16 %v1060_v9, %v1059_v11 }
 0x14f   : > { %1068 = vst [vmem:[%s1987_s11 + $0x18] sm:$0xff] %v1064_v12 }
 0x150   : > { %v1025_v13 = vpop.f32.mrf.mxu2 }
 0x151 PF: > { %p10_p9 = scmp.ge.s32.totalorder %s1603_s16, 4   ;;  %s2007_s12 = smov %s1558_s13 }
 0x152   : > { %s2008_s13 = smov %s1612_s19  ;;  %s2009_s14 = smov %s1603_s16 }
 0x153   :  { %12 = sbr.rel (!%p10_p9) target bundleno = 2 (0x2), region = 90 }

// kernel: _lambda_.23
= control target key start
LH: loop header
LB: loop body
LE: loop exit
PB: predicated region body
PF: predicated region fallthrough
CT: control target
= control target key end

     0   :  { %s278_s0 = inlined_call_operand.vmem [shape: bf16[8,512], index: 0, kind: input, shape index: {}]   ;;  %s279_s1 = inlined_call_operand.vmem [shape: bf16[8,512], index: 1, kind: input, shape index: {}]   ;;  %s280_s2 = inlined_call_operand.vmem [shape: bf16[8,512], index: 2, kind: input, shape index: {}]   ;;  %s281_s3 = inlined_call_operand.vmem [shape: bf16[8,512], index: 3, kind: input, shape index: {}]   ;;  %s282_s4 = inlined_call_operand.vmem [shape: bf16[8,512], index: 4, kind: input, shape index: {}]   ;;  %s283_s5 = inlined_call_operand.vmem [shape: bf16[8,512], index: 5, kind: input, shape index: {}]   ;;  %s284_s6 = inlined_call_operand.vmem [shape: bf16[8,512], index: 6, kind: input, shape index: {}]   ;;  %s285_s7 = inlined_call_operand.vmem [shape: bf16[8,512], index: 7, kind: input, shape index: {}]   ;;  %s286_s8 = inlined_call_operand.vmem [shape: bf16[8,512], index: 8, kind: input, shape index: {}]   ;;  %s287_s9 = inlined_call_operand.vmem [shape: bf16[8,512], index: 9, kind: output, shape index: {}]  }
   0x1   :  { %v32_v0 = vld [vmem:[%s278_s0] sm:$0xff]  ;;  %v33_v17 = vld [vmem:[%s278_s0 + $0x8] sm:$0xff] }
   0x2   :  { %v34_v1 = vld [vmem:[%s279_s1] sm:$0xff]  ;;  %v36_v3 = vunpack.c.l.bf16 %v32_v0  ;;  %v37_v4 = vunpack.c.h.bf16 %v32_v0  ;;  %v35_v20 = vld [vmem:[%s279_s1 + $0x8] sm:$0xff]  ;;  %v38_v29 = vunpack.c.l.bf16 %v33_v17  ;;  %v39_v30 = vunpack.c.h.bf16 %v33_v17 }
   0x3   :  { %v50_v2 = vld [vmem:[%s280_s2] sm:$0xff]  ;;  %v40_v5 = vunpack.c.l.bf16 %v34_v1  ;;  %v41_v6 = vunpack.c.h.bf16 %v34_v1  ;;  %v51_v25 = vld [vmem:[%s280_s2 + $0x8] sm:$0xff]  ;;  %v42_v34 = vunpack.c.l.bf16 %v35_v20  ;;  %v43_v35 = vunpack.c.h.bf16 %v35_v20 }
   0x4   :  { %v66_v7 = vld [vmem:[%s281_s3] sm:$0xff]  ;;  %v56_v9 = vunpack.c.l.bf16 %v50_v2  ;;  %v57_v10 = vunpack.c.h.bf16 %v50_v2  ;;  %v67_v26 = vld [vmem:[%s281_s3 + $0x8] sm:$0xff]  ;;  %v58_v37 = vunpack.c.l.bf16 %v51_v25  ;;  %v59_v38 = vunpack.c.h.bf16 %v51_v25 }
   0x5   :  { %v82_v8 = vld [vmem:[%s282_s4] sm:$0xff]  ;;  %v44_v12 = vmax.f32 %v36_v3, %v40_v5  ;;  %v45_v13 = vmax.f32 %v37_v4, %v41_v6  ;;  %v72_v14 = vunpack.c.l.bf16 %v66_v7  ;;  %v73_v15 = vunpack.c.h.bf16 %v66_v7  ;;  %v83_v36 = vld [vmem:[%s282_s4 + $0x8] sm:$0xff] }
   0x6   :  { %v98_v11 = vld [vmem:[%s283_s5] sm:$0xff]  ;;  %v88_v18 = vunpack.c.l.bf16 %v82_v8  ;;  %v89_v19 = vunpack.c.h.bf16 %v82_v8  ;;  %v74_v39 = vunpack.c.l.bf16 %v67_v26  ;;  %v75_v40 = vunpack.c.h.bf16 %v67_v26  ;;  %v99_v46 = vld [vmem:[%s283_s5 + $0x8] sm:$0xff] }
   0x7   :  { %v114_v16 = vld [vmem:[%s284_s6] sm:$0xff]  ;;  %v60_v21 = vmax.f32 %v44_v12, %v56_v9  ;;  %v61_v22 = vmax.f32 %v45_v13, %v57_v10  ;;  %v104_v23 = vunpack.c.l.bf16 %v98_v11  ;;  %v105_v24 = vunpack.c.h.bf16 %v98_v11  ;;  %v115_v55 = vld [vmem:[%s284_s6 + $0x8] sm:$0xff] }
   0x8   :  { %v120_v27 = vunpack.c.l.bf16 %v114_v16  ;;  %v121_v28 = vunpack.c.h.bf16 %v114_v16  ;;  %v130_v33 = vld [vmem:[%s285_s7] sm:$0xff]  ;;  %v46_v44 = vmax.f32 %v38_v29, %v42_v34  ;;  %v47_v45 = vmax.f32 %v39_v30, %v43_v35  ;;  %v131_v0 = vld [vmem:[%s285_s7 + $0x8] sm:$0xff] }
   0x9   :  { %v76_v31 = vmax.f32 %v60_v21, %v72_v14  ;;  %v77_v32 = vmax.f32 %v61_v22, %v73_v15  ;;  %v146_v43 = vld [vmem:[%s286_s8] sm:$0xff]  ;;  %v136_v47 = vunpack.c.l.bf16 %v130_v33  ;;  %v137_v48 = vunpack.c.h.bf16 %v130_v33  ;;  %v147_v7 = vld [vmem:[%s286_s8 + $0x8] sm:$0xff] }
   0xa   :  { %v90_v49 = vunpack.c.l.bf16 %v83_v36  ;;  %v91_v50 = vunpack.c.h.bf16 %v83_v36  ;;  %v62_v53 = vmax.f32 %v46_v44, %v58_v37  ;;  %v63_v54 = vmax.f32 %v47_v45, %v59_v38 }
   0xb   :  { %v92_v41 = vmax.f32 %v76_v31, %v88_v18  ;;  %v93_v42 = vmax.f32 %v77_v32, %v89_v19  ;;  %v152_v56 = vunpack.c.l.bf16 %v146_v43  ;;  %v153_v57 = vunpack.c.h.bf16 %v146_v43 }
   0xc   :  { %v106_v58 = vunpack.c.l.bf16 %v99_v46  ;;  %v107_v59 = vunpack.c.h.bf16 %v99_v46  ;;  %v78_v62 = vmax.f32 %v62_v53, %v74_v39  ;;  %v79_v63 = vmax.f32 %v63_v54, %v75_v40 }
   0xd   :  { %v108_v51 = vmax.f32 %v92_v41, %v104_v23  ;;  %v109_v52 = vmax.f32 %v93_v42, %v105_v24  ;;  %v122_v1 = vunpack.c.l.bf16 %v115_v55  ;;  %v123_v2 = vunpack.c.h.bf16 %v115_v55 }
   0xe   :  { %v94_v5 = vmax.f32 %v78_v62, %v90_v49  ;;  %v95_v6 = vmax.f32 %v79_v63, %v91_v50  ;;  %v138_v8 = vunpack.c.l.bf16 %v131_v0  ;;  %v139_v9 = vunpack.c.h.bf16 %v131_v0 }
   0xf   :  { %v124_v60 = vmax.f32 %v108_v51, %v120_v27  ;;  %v125_v61 = vmax.f32 %v109_v52, %v121_v28  ;;  %v154_v14 = vunpack.c.l.bf16 %v147_v7  ;;  %v155_v18 = vunpack.c.h.bf16 %v147_v7 }
  0x10   :  { %v110_v12 = vmax.f32 %v94_v5, %v106_v58  ;;  %v111_v13 = vmax.f32 %v95_v6, %v107_v59 }
  0x11   :  { %v140_v3 = vmax.f32 %v124_v60, %v136_v47  ;;  %v141_v4 = vmax.f32 %v125_v61, %v137_v48 }
  0x12   :  { %v126_v16 = vmax.f32 %v110_v12, %v122_v1  ;;  %v127_v17 = vmax.f32 %v111_v13, %v123_v2 }
  0x13   :  { %v156_v10 = vmax.f32 %v140_v3, %v152_v56  ;;  %v157_v11 = vmax.f32 %v141_v4, %v153_v57 }
  0x14   :  { %v142_v19 = vmax.f32 %v126_v16, %v138_v8  ;;  %v143_v20 = vmax.f32 %v127_v17, %v139_v9 }
  0x15   :  { %v160_v15 = vpack.c.bf16 %v157_v11, %v156_v10 }
  0x16   :  { %v158_v21 = vmax.f32 %v142_v19, %v154_v14  ;;  %v159_v22 = vmax.f32 %v143_v20, %v155_v18 }
  0x17   :  { %162 = vst [vmem:[%s287_s9] sm:$0xff] %v160_v15 }
  0x18   :  { %v161_v23 = vpack.c.bf16 %v159_v22, %v158_v21 }
  0x1a   :  { %163 = vst [vmem:[%s287_s9 + $0x8] sm:$0xff] %v161_v23 }

// kernel: _lambda_.24
= control target key start
LH: loop header
LB: loop body
LE: loop exit
PB: predicated region body
PF: predicated region fallthrough
CT: control target
= control target key end

     0   :  { %v297_v2 = vmov 0   ;;  %vm134_vm0 = vcmask 1043456   ;;  %vm130_vm1 = vcmask 588800   ;;  %s436_s1 = inlined_call_operand.vmem [shape: bf16[72,512], index: 1, kind: input, shape index: {}]   ;;  %s437_s2 = inlined_call_operand.vmem [shape: f32[8,1], index: 2, kind: input, shape index: {}]   ;;  %s438_s0 = inlined_call_operand.vmem [shape: bf16[8,72], index: 0, kind: input, shape index: {}]   ;;  %s439_s3 = inlined_call_operand.vmem [shape: bf16[8,512], index: 3, kind: output, shape index: {}]  }
   0x1   :  { %v32_v0 = vld [vmem:[%s436_s1 + $0x80] sm:$0xff]  ;;  %v33_v1 = vld [vmem:[%s436_s1 + $0x88] sm:$0xff]  ;;  %296 = vset.pattern.permute.xlu0 %v297_v2  ;;  %v293_v8 = vld [vmem:[%s436_s1 + $0x6c] sm:$0xf0] }
   0x2   :  { %v90_v3 = vunpack.c.l.b16 %v32_v0  ;;  %v91_v4 = vunpack.c.h.b16 %v32_v0  ;;  %v92_v5 = vunpack.c.l.b16 %v33_v1  ;;  %v93_v6 = vunpack.c.h.b16 %v33_v1  ;;  %v261_v7 = vld [vmem:[%s436_s1 + $0x60] sm:$0xf]  ;;  %v291_v13 = vld [vmem:[%s436_s1 + $0x64] sm:$0xf]  ;;  %v263_v14 = vld [vmem:[%s436_s1 + $0x70] sm:$0xf0] }
   0x3   :  { %v269_v15 = vld [vmem:[%s436_s1 + $0x68] sm:$0xf]  ;;  %v294_v16 = vld [vmem:[%s436_s1 + $0x74] sm:$0xf0]  ;;  %v292_v17 = vld [vmem:[%s436_s1 + $0x6c] sm:$0xf]  ;;  %v262_v23 = vor.u32 %v293_v8, %v261_v7  ;;  %v266_v24 = vor.u32 %v291_v13, %v263_v14 }
   0x4   :  { %v110_v9 = vpack.c.b16 %v90_v3, %v90_v3  ;;  %v111_v10 = vpack.c.b16 %v91_v4, %v91_v4  ;;  %v112_v11 = vpack.c.b16 %v92_v5, %v92_v5  ;;  %v113_v12 = vpack.c.b16 %v93_v6, %v93_v6  ;;  %v271_v18 = vld [vmem:[%s436_s1 + $0x78] sm:$0xf0]  ;;  %v245_v25 = vld [vmem:[%s436_s1 + $0x40] sm:$0xf]  ;;  %v289_v26 = vld [vmem:[%s436_s1 + $0x4c] sm:$0xf0] }
   0x5   :  { %v270_v27 = vor.u32 %v294_v16, %v269_v15  ;;  %v274_v28 = vor.u32 %v292_v17, %v271_v18  ;;  %v287_v29 = vld [vmem:[%s436_s1 + $0x44] sm:$0xf]  ;;  %v247_v30 = vld [vmem:[%s436_s1 + $0x50] sm:$0xf0]  ;;  %v253_v31 = vld [vmem:[%s436_s1 + $0x48] sm:$0xf]  ;;  %v246_v35 = vor.u32 %v289_v26, %v245_v25 }
   0x6   :  { %v136_v19 = vsel %vm134_vm0, %v110_v9, 0  ;;  %v139_v20 = vsel %vm134_vm0, %v111_v10, 0  ;;  %v142_v21 = vsel %vm134_vm0, %v112_v11, 0  ;;  %v145_v22 = vsel %vm134_vm0, %v113_v12, 0  ;;  %v290_v32 = vld [vmem:[%s436_s1 + $0x54] sm:$0xf0] }
   0x7   :  { %150 = vmatpush.bf16.msra.mxu0 %v136_v19  ;;  %163 = vmatpush.bf16.msra.mxu1 %v139_v20  ;;  %v288_v33 = vld [vmem:[%s436_s1 + $0x4c] sm:$0xf]  ;;  %v255_v34 = vld [vmem:[%s436_s1 + $0x58] sm:$0xf0]  ;;  %v250_v36 = vor.u32 %v287_v29, %v247_v30  ;;  %v229_v37 = vld [vmem:[%s436_s1 + $0x20] sm:$0xf]  ;;  %v254_v40 = vor.u32 %v290_v32, %v253_v31 }
   0x8   :  { %176 = vmatpush.bf16.msra.mxu2 %v142_v21  ;;  %189 = vmatpush.bf16.msra.mxu3 %v145_v22  ;;  %v285_v38 = vld [vmem:[%s436_s1 + $0x2c] sm:$0xf0]  ;;  %v283_v39 = vld [vmem:[%s436_s1 + $0x24] sm:$0xf]  ;;  %v258_v41 = vor.u32 %v288_v33, %v255_v34  ;;  %v231_v42 = vld [vmem:[%s436_s1 + $0x30] sm:$0xf0] }
   0x9   :  { %v237_v43 = vld [vmem:[%s436_s1 + $0x28] sm:$0xf]  ;;  %v286_v44 = vld [vmem:[%s436_s1 + $0x34] sm:$0xf0]  ;;  %v284_v45 = vld [vmem:[%s436_s1 + $0x2c] sm:$0xf]  ;;  %v230_v48 = vor.u32 %v285_v38, %v229_v37  ;;  %v234_v49 = vor.u32 %v283_v39, %v231_v42 }
   0xa   :  { %v239_v46 = vld [vmem:[%s436_s1 + $0x38] sm:$0xf0]  ;;  %v34_v47 = vld [vmem:[%s437_s2] sm:$0xff]  ;;  %v281_v51 = vld [vmem:[%s436_s1 + $0xc] sm:$0xf0]  ;;  %v238_v52 = vor.u32 %v286_v44, %v237_v43 }
   0xb   :  { %151 = vmatpush.bf16.msra.mxu0 %v262_v23  ;;  %164 = vmatpush.bf16.msra.mxu1 %v266_v24  ;;  %v213_v50 = vld [vmem:[%s436_s1] sm:$0xf]  ;;  %v242_v53 = vor.u32 %v284_v45, %v239_v46  ;;  %v279_v54 = vld [vmem:[%s436_s1 + $0x4] sm:$0xf]  ;;  %v215_v55 = vld [vmem:[%s436_s1 + $0x10] sm:$0xf0] }
   0xc   :  { %177 = vmatpush.bf16.msra.mxu2 %v270_v27  ;;  %190 = vmatpush.bf16.msra.mxu3 %v274_v28  ;;  %v221_v56 = vld [vmem:[%s436_s1 + $0x8] sm:$0xf]  ;;  %v282_v57 = vld [vmem:[%s436_s1 + $0x14] sm:$0xf0]  ;;  %v280_v58 = vld [vmem:[%s436_s1 + $0xc] sm:$0xf]  ;;  %v214_v60 = vor.u32 %v281_v51, %v213_v50  ;;  %v218_v61 = vor.u32 %v279_v54, %v215_v55 }
   0xd   :  { %37 = vperm.xlu0 %296, %v34_v47   ;;  %v223_v59 = vld [vmem:[%s436_s1 + $0x18] sm:$0xf0]  ;;  %v222_v62 = vor.u32 %v282_v57, %v221_v56  ;;  %v15_v0 = vld [vmem:[%s438_s0] sm:$0xf] }
   0xe   :  { %v226_v63 = vor.u32 %v280_v58, %v223_v59 }
   0xf   :  { %152 = vmatpush.bf16.msra.mxu0 %v246_v35  ;;  %165 = vmatpush.bf16.msra.mxu1 %v250_v36 }
  0x10   :  { %178 = vmatpush.bf16.msra.mxu2 %v254_v40  ;;  %191 = vmatpush.bf16.msra.mxu3 %v258_v41 }
  0x13   :  { %153 = vmatpush.bf16.msra.mxu0 %v230_v48  ;;  %166 = vmatpush.bf16.msra.mxu1 %v234_v49 }
  0x14   :  { %179 = vmatpush.bf16.msra.mxu2 %v238_v52  ;;  %192 = vmatpush.bf16.msra.mxu3 %v242_v53 }
  0x17   :  { %154 = vmatpush.bf16.msra.mxu0 %v214_v60  ;;  %167 = vmatpush.bf16.msra.mxu1 %v218_v61 }
  0x18   :  { %180 = vmatpush.bf16.msra.mxu2 %v222_v62  ;;  %193 = vmatpush.bf16.msra.mxu3 %v226_v63 }
  0x1a   :  { %275 = vmatmul.msk.bf16.vlgmr.msra.gmra.mxu0 %vm130_vm1, %v15_v0  ;;  %276 = vmatmul.msk.bf16.vlgmr.msra.gmra.mxu1 %vm130_vm1, %v15_v0 }
  0x1b   :  { %277 = vmatmul.msk.bf16.vlgmr.msra.gmra.mxu2 %vm130_vm1, %v15_v0  ;;  %278 = vmatmul.msk.bf16.vlgmr.msra.gmra.mxu3 %vm130_vm1, %v15_v0 }
  0x7f   :  { %v38_v1 = vpop.permute.xlu0 %37 }
  0x97   :  { %v156_v2 = vpop.f32.mrf.mxu0  ;;  %v169_v3 = vpop.f32.mrf.mxu1 }
  0x98   :  { %v157_v4 = vadd.f32 %v156_v2, %v38_v1  ;;  %v170_v5 = vadd.f32 %v169_v3, %v38_v1 }
  0x9a   :  { %v199_v6 = vmax.f32 %v157_v4, 0.0  ;;  %v200_v7 = vmax.f32 %v170_v5, 0.0 }
  0x9c   :  { %v203_v8 = vpack.c.bf16 %v200_v7, %v199_v6 }
  0x9e   :  { %v182_v9 = vpop.f32.mrf.mxu2  ;;  %v195_v10 = vpop.f32.mrf.mxu3  ;;  %205 = vst [vmem:[%s439_s3] sm:$0xff] %v203_v8 }
  0x9f   :  { %v183_v11 = vadd.f32 %v182_v9, %v38_v1  ;;  %v196_v12 = vadd.f32 %v195_v10, %v38_v1  ;;  %v158_v13 = vpop.f32.mrf.mxu0  ;;  %v171_v14 = vpop.f32.mrf.mxu1 }
  0xa1   :  { %v201_v15 = vmax.f32 %v183_v11, 0.0  ;;  %v202_v16 = vmax.f32 %v196_v12, 0.0 }
  0xa3   :  { %v204_v17 = vpack.c.bf16 %v202_v16, %v201_v15 }
  0xa5   :  { %206 = vst [vmem:[%s439_s3 + $0x8] sm:$0xff] %v204_v17 }
  0xa6   :  { %v184_v18 = vpop.f32.mrf.mxu2  ;;  %v197_v19 = vpop.f32.mrf.mxu3 }

// kernel: _lambda_.25
= control target key start
LH: loop header
LB: loop body
LE: loop exit
PB: predicated region body
PF: predicated region fallthrough
CT: control target
= control target key end

     0   :  { %v310_v2 = vmov 0   ;;  %vm137_vm0 = vcmask 1043456   ;;  %vm133_vm1 = vcmask 588800   ;;  %s460_s1 = inlined_call_operand.vmem [shape: bf16[72,512], index: 1, kind: input, shape index: {}]   ;;  %s461_s2 = inlined_call_operand.vmem [shape: f32[8,1], index: 2, kind: input, shape index: {}]   ;;  %s462_s0 = inlined_call_operand.vmem [shape: bf16[8,72], index: 0, kind: input, shape index: {}]   ;;  %s463_s3 = inlined_call_operand.vmem [shape: bf16[8,512], index: 3, kind: input, shape index: {}]   ;;  %s464_s4 = inlined_call_operand.vmem [shape: bf16[8,512], index: 4, kind: output, shape index: {}]  }
   0x1   :  { %v35_v0 = vld [vmem:[%s460_s1 + $0x80] sm:$0xff]  ;;  %v36_v1 = vld [vmem:[%s460_s1 + $0x88] sm:$0xff]  ;;  %309 = vset.pattern.permute.xlu0 %v310_v2  ;;  %v306_v8 = vld [vmem:[%s460_s1 + $0x6c] sm:$0xf0] }
   0x2   :  { %v93_v3 = vunpack.c.l.b16 %v35_v0  ;;  %v94_v4 = vunpack.c.h.b16 %v35_v0  ;;  %v95_v5 = vunpack.c.l.b16 %v36_v1  ;;  %v96_v6 = vunpack.c.h.b16 %v36_v1  ;;  %v274_v7 = vld [vmem:[%s460_s1 + $0x60] sm:$0xf]  ;;  %v304_v13 = vld [vmem:[%s460_s1 + $0x64] sm:$0xf]  ;;  %v276_v14 = vld [vmem:[%s460_s1 + $0x70] sm:$0xf0] }
   0x3   :  { %v282_v15 = vld [vmem:[%s460_s1 + $0x68] sm:$0xf]  ;;  %v307_v16 = vld [vmem:[%s460_s1 + $0x74] sm:$0xf0]  ;;  %v305_v17 = vld [vmem:[%s460_s1 + $0x6c] sm:$0xf]  ;;  %v275_v23 = vor.u32 %v306_v8, %v274_v7  ;;  %v279_v24 = vor.u32 %v304_v13, %v276_v14 }
   0x4   :  { %v113_v9 = vpack.c.b16 %v93_v3, %v93_v3  ;;  %v114_v10 = vpack.c.b16 %v94_v4, %v94_v4  ;;  %v115_v11 = vpack.c.b16 %v95_v5, %v95_v5  ;;  %v116_v12 = vpack.c.b16 %v96_v6, %v96_v6  ;;  %v284_v18 = vld [vmem:[%s460_s1 + $0x78] sm:$0xf0]  ;;  %v258_v25 = vld [vmem:[%s460_s1 + $0x40] sm:$0xf]  ;;  %v302_v26 = vld [vmem:[%s460_s1 + $0x4c] sm:$0xf0] }
   0x5   :  { %v283_v27 = vor.u32 %v307_v16, %v282_v15  ;;  %v287_v28 = vor.u32 %v305_v17, %v284_v18  ;;  %v300_v29 = vld [vmem:[%s460_s1 + $0x44] sm:$0xf]  ;;  %v260_v30 = vld [vmem:[%s460_s1 + $0x50] sm:$0xf0]  ;;  %v266_v31 = vld [vmem:[%s460_s1 + $0x48] sm:$0xf]  ;;  %v259_v35 = vor.u32 %v302_v26, %v258_v25 }
   0x6   :  { %v139_v19 = vsel %vm137_vm0, %v113_v9, 0  ;;  %v142_v20 = vsel %vm137_vm0, %v114_v10, 0  ;;  %v145_v21 = vsel %vm137_vm0, %v115_v11, 0  ;;  %v148_v22 = vsel %vm137_vm0, %v116_v12, 0  ;;  %v303_v32 = vld [vmem:[%s460_s1 + $0x54] sm:$0xf0] }
   0x7   :  { %153 = vmatpush.bf16.msra.mxu0 %v139_v19  ;;  %166 = vmatpush.bf16.msra.mxu1 %v142_v20  ;;  %v301_v33 = vld [vmem:[%s460_s1 + $0x4c] sm:$0xf]  ;;  %v268_v34 = vld [vmem:[%s460_s1 + $0x58] sm:$0xf0]  ;;  %v263_v36 = vor.u32 %v300_v29, %v260_v30  ;;  %v242_v37 = vld [vmem:[%s460_s1 + $0x20] sm:$0xf]  ;;  %v267_v40 = vor.u32 %v303_v32, %v266_v31 }
   0x8   :  { %179 = vmatpush.bf16.msra.mxu2 %v145_v21  ;;  %192 = vmatpush.bf16.msra.mxu3 %v148_v22  ;;  %v298_v38 = vld [vmem:[%s460_s1 + $0x2c] sm:$0xf0]  ;;  %v296_v39 = vld [vmem:[%s460_s1 + $0x24] sm:$0xf]  ;;  %v271_v41 = vor.u32 %v301_v33, %v268_v34  ;;  %v244_v42 = vld [vmem:[%s460_s1 + $0x30] sm:$0xf0] }
   0x9   :  { %v250_v43 = vld [vmem:[%s460_s1 + $0x28] sm:$0xf]  ;;  %v299_v44 = vld [vmem:[%s460_s1 + $0x34] sm:$0xf0]  ;;  %v297_v45 = vld [vmem:[%s460_s1 + $0x2c] sm:$0xf]  ;;  %v243_v48 = vor.u32 %v298_v38, %v242_v37  ;;  %v247_v49 = vor.u32 %v296_v39, %v244_v42 }
   0xa   :  { %v252_v46 = vld [vmem:[%s460_s1 + $0x38] sm:$0xf0]  ;;  %v37_v47 = vld [vmem:[%s461_s2] sm:$0xff]  ;;  %v294_v51 = vld [vmem:[%s460_s1 + $0xc] sm:$0xf0]  ;;  %v251_v52 = vor.u32 %v299_v44, %v250_v43 }
   0xb   :  { %154 = vmatpush.bf16.msra.mxu0 %v275_v23  ;;  %167 = vmatpush.bf16.msra.mxu1 %v279_v24  ;;  %v226_v50 = vld [vmem:[%s460_s1] sm:$0xf]  ;;  %v255_v53 = vor.u32 %v297_v45, %v252_v46  ;;  %v292_v54 = vld [vmem:[%s460_s1 + $0x4] sm:$0xf]  ;;  %v228_v55 = vld [vmem:[%s460_s1 + $0x10] sm:$0xf0] }
   0xc   :  { %180 = vmatpush.bf16.msra.mxu2 %v283_v27  ;;  %193 = vmatpush.bf16.msra.mxu3 %v287_v28  ;;  %v234_v56 = vld [vmem:[%s460_s1 + $0x8] sm:$0xf]  ;;  %v295_v57 = vld [vmem:[%s460_s1 + $0x14] sm:$0xf0]  ;;  %v293_v58 = vld [vmem:[%s460_s1 + $0xc] sm:$0xf]  ;;  %v227_v60 = vor.u32 %v294_v51, %v226_v50  ;;  %v231_v61 = vor.u32 %v292_v54, %v228_v55 }
   0xd   :  { %40 = vperm.xlu0 %309, %v37_v47   ;;  %v236_v59 = vld [vmem:[%s460_s1 + $0x18] sm:$0xf0]  ;;  %v235_v62 = vor.u32 %v295_v57, %v234_v56  ;;  %v18_v0 = vld [vmem:[%s462_s0] sm:$0xf]  ;;  %v203_v11 = vld [vmem:[%s463_s3 + $0x8] sm:$0xff] }
   0xe   :  { %v239_v63 = vor.u32 %v293_v58, %v236_v59  ;;  %v202_v1 = vld [vmem:[%s463_s3] sm:$0xff]  ;;  %v206_v14 = vunpack.c.l.bf16 %v203_v11  ;;  %v207_v15 = vunpack.c.h.bf16 %v203_v11 }
   0xf   :  { %155 = vmatpush.bf16.msra.mxu0 %v259_v35  ;;  %168 = vmatpush.bf16.msra.mxu1 %v263_v36  ;;  %v204_v3 = vunpack.c.l.bf16 %v202_v1  ;;  %v205_v4 = vunpack.c.h.bf16 %v202_v1 }
  0x10   :  { %181 = vmatpush.bf16.msra.mxu2 %v267_v40  ;;  %194 = vmatpush.bf16.msra.mxu3 %v271_v41 }
  0x13   :  { %156 = vmatpush.bf16.msra.mxu0 %v243_v48  ;;  %169 = vmatpush.bf16.msra.mxu1 %v247_v49 }
  0x14   :  { %182 = vmatpush.bf16.msra.mxu2 %v251_v52  ;;  %195 = vmatpush.bf16.msra.mxu3 %v255_v53 }
  0x17   :  { %157 = vmatpush.bf16.msra.mxu0 %v227_v60  ;;  %170 = vmatpush.bf16.msra.mxu1 %v231_v61 }
  0x18   :  { %183 = vmatpush.bf16.msra.mxu2 %v235_v62  ;;  %196 = vmatpush.bf16.msra.mxu3 %v239_v63 }
  0x1a   :  { %288 = vmatmul.msk.bf16.vlgmr.msra.gmra.mxu0 %vm133_vm1, %v18_v0  ;;  %289 = vmatmul.msk.bf16.vlgmr.msra.gmra.mxu1 %vm133_vm1, %v18_v0 }
  0x1b   :  { %290 = vmatmul.msk.bf16.vlgmr.msra.gmra.mxu2 %vm133_vm1, %v18_v0  ;;  %291 = vmatmul.msk.bf16.vlgmr.msra.gmra.mxu3 %vm133_vm1, %v18_v0 }
  0x7f   :  { %v41_v2 = vpop.permute.xlu0 %40 }
  0x97   :  { %v159_v5 = vpop.f32.mrf.mxu0  ;;  %v172_v6 = vpop.f32.mrf.mxu1 }
  0x98   :  { %v160_v7 = vadd.f32 %v159_v5, %v41_v2  ;;  %v173_v8 = vadd.f32 %v172_v6, %v41_v2 }
  0x9a   :  { %v208_v9 = vadd.f32 %v204_v3, %v160_v7  ;;  %v209_v10 = vadd.f32 %v205_v4, %v173_v8 }
  0x9c   :  { %v212_v12 = vmax.f32 %v208_v9, 0.0  ;;  %v213_v13 = vmax.f32 %v209_v10, 0.0 }
  0x9e   :  { %v216_v16 = vpack.c.bf16 %v213_v13, %v212_v12  ;;  %v185_v17 = vpop.f32.mrf.mxu2  ;;  %v198_v18 = vpop.f32.mrf.mxu3 }
  0x9f   :  { %v186_v19 = vadd.f32 %v185_v17, %v41_v2  ;;  %v199_v20 = vadd.f32 %v198_v18, %v41_v2  ;;  %v161_v21 = vpop.f32.mrf.mxu0  ;;  %v174_v22 = vpop.f32.mrf.mxu1 }
  0xa0   :  { %218 = vst [vmem:[%s464_s4] sm:$0xff] %v216_v16 }
  0xa1   :  { %v210_v23 = vadd.f32 %v206_v14, %v186_v19  ;;  %v211_v24 = vadd.f32 %v207_v15, %v199_v20 }
  0xa3   :  { %v214_v25 = vmax.f32 %v210_v23, 0.0  ;;  %v215_v26 = vmax.f32 %v211_v24, 0.0 }
  0xa5   :  { %v217_v27 = vpack.c.bf16 %v215_v26, %v214_v25 }
  0xa6   :  { %v187_v28 = vpop.f32.mrf.mxu2  ;;  %v200_v29 = vpop.f32.mrf.mxu3 }
  0xa7   :  { %219 = vst [vmem:[%s464_s4 + $0x8] sm:$0xff] %v217_v27 }

// kernel: _lambda_.28
= control target key start
LH: loop header
LB: loop body
LE: loop exit
PB: predicated region body
PF: predicated region fallthrough
CT: control target
= control target key end

     0   :  { %v135_v1 = vmov 0   ;;  %vm74_vm0 = vcmask 1043456   ;;  %vm70_vm1 = vcmask 588800   ;;  %s183_s1 = inlined_call_operand.vmem [shape: bf16[72,128], index: 1, kind: input, shape index: {}]   ;;  %s184_s2 = inlined_call_operand.vmem [shape: f32[16,1], index: 2, kind: input, shape index: {}]   ;;  %s185_s0 = inlined_call_operand.vmem [shape: bf16[16,72], index: 0, kind: input, shape index: {}]   ;;  %s186_s3 = inlined_call_operand.vmem [shape: bf16[16,128], index: 3, kind: output, shape index: {}]  }
   0x1   :  { %v25_v0 = vld [vmem:[%s183_s1 + $0x20] sm:$0xf]  ;;  %134 = vset.pattern.permute.xlu0 %v135_v1  ;;  %v127_v6 = vld [vmem:[%s183_s1 + $0x18] sm:$0xff]  ;;  %v27_v7 = vld [vmem:[%s184_s2 + $0x8] sm:$0xff] }
   0x2   :  { %v60_v2 = vunpack.c.l.b16 %v25_v0  ;;  %v26_v3 = vld [vmem:[%s184_s2] sm:$0xff]  ;;  %v126_v8 = vld [vmem:[%s183_s1 + $0x10] sm:$0xff]  ;;  %v125_v9 = vld [vmem:[%s183_s1 + $0x8] sm:$0xff] }
   0x3   :  { %30 = vperm.xlu0 %134, %v26_v3   ;;  %v124_v10 = vld [vmem:[%s183_s1] sm:$0xff] }
   0x4   :  { %v65_v4 = vpack.c.b16 %v60_v2, %v60_v2  ;;  %v123_v11 = vld [vmem:[%s185_s0] sm:$0xff] }
   0x6   :  { %v76_v5 = vsel %vm74_vm0, %v65_v4, 0 }
   0x7   :  { %81 = vmatpush.bf16.msra.mxu0 %v76_v5 }
   0xb   :  { %82 = vmatpush.bf16.msra.mxu0 %v127_v6  ;;  %35 = vperm.xlu0 %134, %v27_v7  }
   0xf   :  { %83 = vmatpush.bf16.msra.mxu0 %v126_v8 }
  0x13   :  { %84 = vmatpush.bf16.msra.mxu0 %v125_v9 }
  0x17   :  { %85 = vmatpush.bf16.msra.mxu0 %v124_v10 }
  0x1a   :  { %122 = vmatmul.msk.bf16.vlgmr.msra.gmra.mxu0 %vm70_vm1, %v123_v11 }
  0x75   :  { %v31_v12 = vpop.permute.xlu0 %30 }
  0x7d   :  { %v36_v15 = vpop.permute.xlu0 %35 }
  0x97   :  { %v87_v13 = vpop.f32.mrf.mxu0 }
  0x98   :  { %v88_v14 = vadd.f32 %v87_v13, %v31_v12 }
  0x9a   :  { %v92_v18 = vmax.f32 %v88_v14, 0.0 }
  0x9f   :  { %v89_v16 = vpop.f32.mrf.mxu0 }
  0xa0   :  { %v90_v17 = vadd.f32 %v89_v16, %v36_v15 }
  0xa2   :  { %v93_v19 = vmax.f32 %v90_v17, 0.0 }
  0xa4   :  { %v131_v20 = vpack.c.bf16 %v93_v19, %v92_v18 }
  0xa6   :  { %132 = vst [vmem:[%s186_s3] sm:$0xff] %v131_v20  }

// kernel: _lambda_.29
= control target key start
LH: loop header
LB: loop body
LE: loop exit
PB: predicated region body
PF: predicated region fallthrough
CT: control target
= control target key end

     0   :  { %vm39_vm0 = vcmask 1043456   ;;  %v78_v1 = vmov 0   ;;  %vm35_vm1 = vcmask 64512   ;;  %s114_s1 = inlined_call_operand.vmem [shape: bf16[8,128], index: 1, kind: input, shape index: {}]   ;;  %s115_s0 = inlined_call_operand.vmem [shape: bf16[16,8], index: 0, kind: input, shape index: {}]   ;;  %s116_s2 = inlined_call_operand.vmem [shape: f32[16,1], index: 2, kind: input, shape index: {}]   ;;  %s117_s3 = inlined_call_operand.vmem [shape: bf16[16,128], index: 3, kind: output, shape index: {}]  }
   0x1   :  { %v17_v0 = vld [vmem:[%s114_s1] sm:$0xf]  ;;  %77 = vset.pattern.permute.xlu0 %v78_v1  ;;  %v19_v5 = vld [vmem:[%s116_s2 + $0x8] sm:$0xff] }
   0x2   :  { %v18_v2 = vld [vmem:[%s116_s2] sm:$0xff]  ;;  %v41_v3 = vsel %vm39_vm0, %v17_v0, 0 }
   0x3   :  { %v70_v4 = vld [vmem:[%s115_s0] sm:$0xff]  ;;  %22 = vperm.xlu0 %77, %v18_v2   ;;  %50 = vmatpush.bf16.msra.mxu0 %v41_v3 }
   0x6   :  { %69 = vmatmul.msk.bf16.vlgmr.msra.gmra.mxu0 %vm35_vm1, %v70_v4 }
   0xb   :  { %27 = vperm.xlu0 %77, %v19_v5  }
  0x75   :  { %v23_v6 = vpop.permute.xlu0 %22 }
  0x7d   :  { %v28_v8 = vpop.permute.xlu0 %27 }
  0x83   :  { %v52_v7 = vpop.f32.mrf.mxu0 }
  0x84   :  { %v53_v10 = vadd.f32 %v52_v7, %v23_v6 }
  0x8b   :  { %v54_v9 = vpop.f32.mrf.mxu0 }
  0x8c   :  { %v55_v11 = vadd.f32 %v54_v9, %v28_v8 }
  0x8e   :  { %v74_v12 = vpack.c.bf16 %v55_v11, %v53_v10 }
  0x90   :  { %75 = vst [vmem:[%s117_s3] sm:$0xff] %v74_v12  }

// kernel: _lambda_.30
= control target key start
LH: loop header
LB: loop body
LE: loop exit
PB: predicated region body
PF: predicated region fallthrough
CT: control target
= control target key end

     0   :  { %v228_v4 = vmov 0   ;;  %vm113_vm0 = vcmask 130048   ;;  %s305_s1 = inlined_call_operand.vmem [shape: bf16[144,128], index: 1, kind: input, shape index: {}]   ;;  %s306_s0 = inlined_call_operand.vmem [shape: bf16[16,144], index: 0, kind: input, shape index: {}]   ;;  %s307_s2 = inlined_call_operand.vmem [shape: f32[16,1], index: 2, kind: input, shape index: {}]   ;;  %s308_s3 = inlined_call_operand.vmem [shape: bf16[16,128], index: 3, kind: input, shape index: {}]   ;;  %s309_s4 = inlined_call_operand.vmem [shape: bf16[16,128], index: 4, kind: output, shape index: {}]  }
   0x1   :  { %v215_v0 = vld [vmem:[%s305_s1 + $0x38] sm:$0xff]  ;;  %v214_v1 = vld [vmem:[%s305_s1 + $0x30] sm:$0xff]  ;;  %v216_v2 = vld [vmem:[%s305_s1 + $0x40] sm:$0xff]  ;;  %227 = vset.pattern.permute.xlu0 %v228_v4 }
   0x2   :  { %117 = vmatpush.bf16.msra.mxu0 %v215_v0  ;;  %v206_v3 = vld [vmem:[%s306_s0 + $0x4] sm:$0xf]  ;;  %v165_v5 = vld [vmem:[%s306_s0 + $0x8] sm:$0xf0]  ;;  %138 = vmatpush.bf16.msra.mxu1 %v216_v2  ;;  %v211_v11 = vld [vmem:[%s305_s1 + $0x18] sm:$0xff] }
   0x3   :  { %v168_v6 = vor.u32 %v206_v3, %v165_v5  ;;  %v38_v7 = vld [vmem:[%s307_s2] sm:$0xff]  ;;  %v213_v8 = vld [vmem:[%s305_s1 + $0x28] sm:$0xff]  ;;  %v210_v12 = vld [vmem:[%s305_s1 + $0x10] sm:$0xff] }
   0x4   :  { %42 = vperm.xlu0 %227, %v38_v7   ;;  %v212_v9 = vld [vmem:[%s305_s1 + $0x20] sm:$0xff]  ;;  %v39_v10 = vld [vmem:[%s307_s2 + $0x8] sm:$0xff] }
   0x5   :  { %205 = vmatmul.msk.bf16.vlgmr.msra.gmra.mxu1 %vm113_vm0, %v168_v6  ;;  %v209_v13 = vld [vmem:[%s305_s1 + $0x8] sm:$0xff]  ;;  %v208_v14 = vld [vmem:[%s305_s1] sm:$0xff] }
   0x6   :  { %118 = vmatpush.bf16.msra.mxu0 %v214_v1  ;;  %v163_v15 = vld [vmem:[%s306_s0] sm:$0xf]  ;;  %v207_v16 = vld [vmem:[%s306_s0 + $0x4] sm:$0xf0] }
   0x7   :  { %v164_v17 = vor.u32 %v207_v16, %v163_v15  ;;  %v218_v22 = vld [vmem:[%s308_s3] sm:$0xff]  }
   0x8   :  { %v219_v24 = vunpack.c.l.bf16 %v218_v22  ;;  %v220_v28 = vunpack.c.h.bf16 %v218_v22 }
   0xa   :  { %119 = vmatpush.bf16.msra.mxu0 %v213_v8 }
   0xc   :  { %47 = vperm.xlu0 %227, %v39_v10  }
   0xe   :  { %120 = vmatpush.bf16.msra.mxu0 %v212_v9 }
  0x12   :  { %121 = vmatpush.bf16.msra.mxu0 %v211_v11 }
  0x16   :  { %122 = vmatpush.bf16.msra.mxu0 %v210_v12 }
  0x1a   :  { %123 = vmatpush.bf16.msra.mxu0 %v209_v13 }
  0x1e   :  { %124 = vmatpush.bf16.msra.mxu0 %v208_v14 }
  0x21   :  { %125 = vmatmul.bf16.vlgmr.msra.gmra.mxu0 %v164_v17 }
  0x76   :  { %v43_v18 = vpop.permute.xlu0 %42 }
  0x7e   :  { %v48_v25 = vpop.permute.xlu0 %47 }
  0x82   :  { %v140_v19 = vpop.f32.mrf.mxu1 }
  0x8a   :  { %v142_v29 = vpop.f32.mrf.mxu1 }
  0x9e   :  { %v126_v20 = vpop.f32.mrf.mxu0 }
  0x9f   :  { %v127_v21 = vadd.f32 %v126_v20, %v43_v18 }
  0xa1   :  { %v141_v23 = vadd.f32 %v140_v19, %v127_v21 }
  0xa3   :  { %v149_v30 = vadd.f32 %v219_v24, %v141_v23 }
  0xa5   :  { %v151_v33 = vmax.f32 %v149_v30, 0.0 }
  0xa6   :  { %v128_v26 = vpop.f32.mrf.mxu0 }
  0xa7   :  { %v129_v27 = vadd.f32 %v128_v26, %v48_v25 }
  0xa9   :  { %v143_v31 = vadd.f32 %v142_v29, %v129_v27 }
  0xab   :  { %v150_v32 = vadd.f32 %v220_v28, %v143_v31 }
  0xad   :  { %v152_v34 = vmax.f32 %v150_v32, 0.0 }
  0xaf   :  { %v224_v35 = vpack.c.bf16 %v152_v34, %v151_v33 }
  0xb1   :  { %225 = vst [vmem:[%s309_s4] sm:$0xff] %v224_v35  }

// kernel: _lambda_.31
= control target key start
LH: loop header
LB: loop body
LE: loop exit
PB: predicated region body
PF: predicated region fallthrough
CT: control target
= control target key end

     0   :  { %v215_v4 = vmov 0   ;;  %vm110_vm0 = vcmask 130048   ;;  %s284_s1 = inlined_call_operand.vmem [shape: bf16[144,128], index: 1, kind: input, shape index: {}]   ;;  %s285_s0 = inlined_call_operand.vmem [shape: bf16[16,144], index: 0, kind: input, shape index: {}]   ;;  %s286_s2 = inlined_call_operand.vmem [shape: f32[16,1], index: 2, kind: input, shape index: {}]   ;;  %s287_s3 = inlined_call_operand.vmem [shape: bf16[16,128], index: 3, kind: output, shape index: {}]  }
   0x1   :  { %v206_v0 = vld [vmem:[%s284_s1 + $0x38] sm:$0xff]  ;;  %v205_v1 = vld [vmem:[%s284_s1 + $0x30] sm:$0xff]  ;;  %v207_v2 = vld [vmem:[%s284_s1 + $0x40] sm:$0xff]  ;;  %214 = vset.pattern.permute.xlu0 %v215_v4 }
   0x2   :  { %114 = vmatpush.bf16.msra.mxu0 %v206_v0  ;;  %v197_v3 = vld [vmem:[%s285_s0 + $0x4] sm:$0xf]  ;;  %v156_v5 = vld [vmem:[%s285_s0 + $0x8] sm:$0xf0]  ;;  %135 = vmatpush.bf16.msra.mxu1 %v207_v2  ;;  %v202_v11 = vld [vmem:[%s284_s1 + $0x18] sm:$0xff] }
   0x3   :  { %v159_v6 = vor.u32 %v197_v3, %v156_v5  ;;  %v35_v7 = vld [vmem:[%s286_s2] sm:$0xff]  ;;  %v204_v8 = vld [vmem:[%s284_s1 + $0x28] sm:$0xff]  ;;  %v201_v12 = vld [vmem:[%s284_s1 + $0x10] sm:$0xff] }
   0x4   :  { %39 = vperm.xlu0 %214, %v35_v7   ;;  %v203_v9 = vld [vmem:[%s284_s1 + $0x20] sm:$0xff]  ;;  %v36_v10 = vld [vmem:[%s286_s2 + $0x8] sm:$0xff] }
   0x5   :  { %196 = vmatmul.msk.bf16.vlgmr.msra.gmra.mxu1 %vm110_vm0, %v159_v6  ;;  %v200_v13 = vld [vmem:[%s284_s1 + $0x8] sm:$0xff]  ;;  %v199_v14 = vld [vmem:[%s284_s1] sm:$0xff] }
   0x6   :  { %115 = vmatpush.bf16.msra.mxu0 %v205_v1  ;;  %v154_v15 = vld [vmem:[%s285_s0] sm:$0xf]  ;;  %v198_v16 = vld [vmem:[%s285_s0 + $0x4] sm:$0xf0] }
   0x7   :  { %v155_v17 = vor.u32 %v198_v16, %v154_v15 }
   0xa   :  { %116 = vmatpush.bf16.msra.mxu0 %v204_v8 }
   0xc   :  { %44 = vperm.xlu0 %214, %v36_v10  }
   0xe   :  { %117 = vmatpush.bf16.msra.mxu0 %v203_v9 }
  0x12   :  { %118 = vmatpush.bf16.msra.mxu0 %v202_v11 }
  0x16   :  { %119 = vmatpush.bf16.msra.mxu0 %v201_v12 }
  0x1a   :  { %120 = vmatpush.bf16.msra.mxu0 %v200_v13 }
  0x1e   :  { %121 = vmatpush.bf16.msra.mxu0 %v199_v14 }
  0x21   :  { %122 = vmatmul.bf16.vlgmr.msra.gmra.mxu0 %v155_v17 }
  0x76   :  { %v40_v18 = vpop.permute.xlu0 %39 }
  0x7e   :  { %v45_v22 = vpop.permute.xlu0 %44 }
  0x82   :  { %v137_v19 = vpop.f32.mrf.mxu1 }
  0x8a   :  { %v139_v26 = vpop.f32.mrf.mxu1 }
  0x9e   :  { %v123_v20 = vpop.f32.mrf.mxu0 }
  0x9f   :  { %v124_v21 = vadd.f32 %v123_v20, %v40_v18 }
  0xa1   :  { %v138_v24 = vadd.f32 %v137_v19, %v124_v21 }
  0xa3   :  { %v142_v28 = vmax.f32 %v138_v24, 0.0 }
  0xa6   :  { %v125_v23 = vpop.f32.mrf.mxu0 }
  0xa7   :  { %v126_v25 = vadd.f32 %v125_v23, %v45_v22 }
  0xa9   :  { %v140_v27 = vadd.f32 %v139_v26, %v126_v25 }
  0xab   :  { %v143_v29 = vmax.f32 %v140_v27, 0.0 }
  0xad   :  { %v211_v30 = vpack.c.bf16 %v143_v29, %v142_v28 }
  0xaf   :  { %212 = vst [vmem:[%s287_s3] sm:$0xff] %v211_v30  }

// kernel: _lambda_.33
= control target key start
LH: loop header
LB: loop body
LE: loop exit
PB: predicated region body
PF: predicated region fallthrough
CT: control target
= control target key end

     0   :  { %v273_v6 = vmov 0   ;;  %vm133_vm0 = vcmask 130048   ;;  %vm186_vm1 = vcmask 257024   ;;  %s375_s1 = inlined_call_operand.vmem [shape: bf16[144,32], index: 1, kind: input, shape index: {}]   ;;  %s376_s0 = inlined_call_operand.vmem [shape: bf16[32,144], index: 0, kind: input, shape index: {}]   ;;  %s377_s2 = inlined_call_operand.vmem [shape: f32[32,1], index: 2, kind: input, shape index: {}]   ;;  %s378_s3 = inlined_call_operand.vmem [shape: bf16[32,32], index: 3, kind: output, shape index: {}]  }
   0x1   :  { %v260_v0 = vld [vmem:[%s375_s1 + $0x38] sm:$0xff]  ;;  %v261_v1 = vld [vmem:[%s375_s1 + $0x40] sm:$0xff]  ;;  %v259_v3 = vld [vmem:[%s375_s1 + $0x30] sm:$0xff]  ;;  %272 = vset.pattern.permute.xlu1 %v273_v6  ;;  %271 = vset.pattern.permute.xlu0 %v273_v6 }
   0x2   :  { %v249_v2 = vld [vmem:[%s376_s0 + $0x4] sm:$0xf]  ;;  %140 = vmatpush.bf16.msra.mxu0 %v260_v0  ;;  %262 = vmatpush.bf16.msra.mxu2 %v260_v0  ;;  %v199_v4 = vld [vmem:[%s376_s0 + $0x8] sm:$0xf0]  ;;  %v39_v7 = vld [vmem:[%s377_s2 + $0x10] sm:$0xff] }
   0x3   :  { %166 = vmatpush.bf16.msra.mxu1 %v261_v1  ;;  %v202_v5 = vor.u32 %v249_v2, %v199_v4  ;;  %v258_v8 = vld [vmem:[%s375_s1 + $0x28] sm:$0xff]  ;;  %v37_v9 = vld [vmem:[%s377_s2] sm:$0xff]  ;;  %53 = vperm.xlu1 %272, %v39_v7   ;;  %v40_v11 = vld [vmem:[%s377_s2 + $0x18] sm:$0xff] }
   0x4   :  { %43 = vperm.xlu0 %271, %v37_v9   ;;  %v257_v10 = vld [vmem:[%s375_s1 + $0x20] sm:$0xff]  ;;  %v38_v12 = vld [vmem:[%s377_s2 + $0x8] sm:$0xff]  ;;  %v256_v13 = vld [vmem:[%s375_s1 + $0x18] sm:$0xff] }
   0x5   :  { %v251_v14 = vld [vmem:[%s376_s0 + $0x14] sm:$0xf]  ;;  %v207_v15 = vld [vmem:[%s376_s0 + $0x18] sm:$0xf0]  ;;  %v254_v18 = vld [vmem:[%s375_s1 + $0x8] sm:$0xff] }
   0x6   :  { %141 = vmatpush.bf16.msra.mxu0 %v259_v3  ;;  %263 = vmatpush.bf16.msra.mxu2 %v259_v3  ;;  %v255_v16 = vld [vmem:[%s375_s1 + $0x10] sm:$0xff]  ;;  %v210_v17 = vor.u32 %v251_v14, %v207_v15  ;;  %v253_v19 = vld [vmem:[%s375_s1] sm:$0xff]  ;;  %v250_v21 = vld [vmem:[%s376_s0 + $0x4] sm:$0xf0] }
   0x7   :  { %247 = vmatmul.msk.bf16.vlgmr.msra.gmra.mxu1 %vm133_vm0, %v202_v5  ;;  %v197_v20 = vld [vmem:[%s376_s0] sm:$0xf]  ;;  %v205_v22 = vld [vmem:[%s376_s0 + $0x10] sm:$0xf]  ;;  %v252_v23 = vld [vmem:[%s376_s0 + $0x14] sm:$0xf0] }
   0x8   :  { %v198_v24 = vor.u32 %v250_v21, %v197_v20  ;;  %v206_v25 = vor.u32 %v252_v23, %v205_v22 }
   0xa   :  { %142 = vmatpush.bf16.msra.mxu0 %v258_v8  ;;  %264 = vmatpush.bf16.msra.mxu2 %v258_v8 }
   0xb   :  { %58 = vperm.xlu1 %272, %v40_v11  }
   0xc   :  { %48 = vperm.xlu0 %271, %v38_v12  }
   0xe   :  { %143 = vmatpush.bf16.msra.mxu0 %v257_v10  ;;  %265 = vmatpush.bf16.msra.mxu2 %v257_v10 }
  0x12   :  { %144 = vmatpush.bf16.msra.mxu0 %v256_v13  ;;  %266 = vmatpush.bf16.msra.mxu2 %v256_v13 }
  0x16   :  { %145 = vmatpush.bf16.msra.mxu0 %v255_v16  ;;  %267 = vmatpush.bf16.msra.mxu2 %v255_v16 }
  0x17   :  { %248 = vmatmul.msk.bf16.gmra.mxu1 %vm133_vm0, %v210_v17 }
  0x1a   :  { %146 = vmatpush.bf16.msra.mxu0 %v254_v18  ;;  %268 = vmatpush.bf16.msra.mxu2 %v254_v18 }
  0x1e   :  { %147 = vmatpush.bf16.msra.mxu0 %v253_v19  ;;  %269 = vmatpush.bf16.msra.mxu2 %v253_v19 }
  0x21   :  { %148 = vmatmul.bf16.vlgmr.msra.gmra.mxu0 %v198_v24  ;;  %153 = vmatmul.bf16.vlgmr.msra.gmra.mxu2 %v206_v25 }
  0x75   :  { %v54_v32 = vpop.permute.xlu1 %53 }
  0x76   :  { %v44_v28 = vpop.permute.xlu0 %43 }
  0x7d   :  { %v59_v46 = vpop.permute.xlu1 %58 }
  0x7e   :  { %v49_v38 = vpop.permute.xlu0 %48 }
  0x84   :  { %v168_v26 = vpop.f32.mrf.mxu1 }
  0x8c   :  { %v170_v27 = vpop.f32.mrf.mxu1 }
  0x94   :  { %v173_v34 = vpop.f32.mrf.mxu1 }
  0x9c   :  { %v175_v50 = vpop.f32.mrf.mxu1 }
  0x9e   :  { %v149_v29 = vpop.f32.mrf.mxu0 }
  0x9f   :  { %v150_v30 = vadd.f32 %v149_v29, %v44_v28 }
  0xa1   :  { %v169_v31 = vadd.f32 %v168_v26, %v150_v30 }
  0xa3   :  { %v178_v33 = vmax.f32 %v169_v31, 0.0 }
  0xa4   :  { %v154_v35 = vpop.f32.mrf.mxu2 }
  0xa5   :  { %v182_v36 = vpack.c.bf16 %v178_v33, %v178_v33  ;;  %v155_v37 = vadd.f32 %v154_v35, %v54_v32 }
  0xa6   :  { %v151_v39 = vpop.f32.mrf.mxu0 }
  0xa7   :  { %187 = vst.msk [vmem:[%s378_s3] sm:$0xf] %vm186_vm1, %v182_v36  ;;  %v174_v40 = vadd.f32 %v173_v34, %v155_v37  ;;  %v152_v41 = vadd.f32 %v151_v39, %v49_v38 }
  0xa9   :  { %v180_v42 = vmax.f32 %v174_v40, 0.0  ;;  %v171_v43 = vadd.f32 %v170_v27, %v152_v41 }
  0xab   :  { %v184_v44 = vpack.c.bf16 %v180_v42, %v180_v42  ;;  %v179_v45 = vmax.f32 %v171_v43, 0.0 }
  0xac   :  { %v156_v47 = vpop.f32.mrf.mxu2 }
  0xad   :  { %189 = vst.msk [vmem:[%s378_s3 + $0x8] sm:$0xf] %vm186_vm1, %v184_v44  ;;  %v183_v48 = vpack.c.bf16 %v179_v45, %v179_v45  ;;  %v157_v49 = vadd.f32 %v156_v47, %v59_v46 }
  0xaf   :  { %188 = vst.msk [vmem:[%s378_s3 + $0x4] sm:$0xf] %vm186_vm1, %v183_v48  ;;  %v176_v51 = vadd.f32 %v175_v50, %v157_v49 }
  0xb1   :  { %v181_v52 = vmax.f32 %v176_v51, 0.0 }
  0xb3   :  { %v185_v53 = vpack.c.bf16 %v181_v52, %v181_v52 }
  0xb5   :  { %190 = vst.msk [vmem:[%s378_s3 + $0xc] sm:$0xf] %vm186_vm1, %v185_v53 }

// kernel: _lambda_.34
= control target key start
LH: loop header
LB: loop body
LE: loop exit
PB: predicated region body
PF: predicated region fallthrough
CT: control target
= control target key end

     0   :  { %v121_v2 = vmov 0   ;;  %vm61_vm0 = vcmask 130048   ;;  %vm91_vm1 = vcmask 257024   ;;  %s175_s1 = inlined_call_operand.vmem [shape: bf16[16,32], index: 1, kind: input, shape index: {}]   ;;  %s176_s0 = inlined_call_operand.vmem [shape: bf16[32,16], index: 0, kind: input, shape index: {}]   ;;  %s177_s2 = inlined_call_operand.vmem [shape: f32[32,1], index: 2, kind: input, shape index: {}]   ;;  %s178_s3 = inlined_call_operand.vmem [shape: bf16[32,32], index: 3, kind: output, shape index: {}]  }
   0x1   :  { %v116_v0 = vld [vmem:[%s175_s1] sm:$0xff]  ;;  %120 = vset.pattern.permute.xlu1 %v121_v2  ;;  %119 = vset.pattern.permute.xlu0 %v121_v2  ;;  %v115_v3 = vld [vmem:[%s176_s0 + $0x8] sm:$0xff]  ;;  %v23_v4 = vld [vmem:[%s177_s2 + $0x10] sm:$0xff] }
   0x2   :  { %v114_v1 = vld [vmem:[%s176_s0] sm:$0xff]  ;;  %75 = vmatpush.bf16.msra.mxu0 %v116_v0  ;;  %117 = vmatpush.bf16.msra.mxu1 %v116_v0  ;;  %v24_v6 = vld [vmem:[%s177_s2 + $0x18] sm:$0xff]  ;;  %v22_v7 = vld [vmem:[%s177_s2 + $0x8] sm:$0xff] }
   0x3   :  { %v21_v5 = vld [vmem:[%s177_s2] sm:$0xff]  ;;  %37 = vperm.xlu1 %120, %v23_v4  }
   0x4   :  { %27 = vperm.xlu0 %119, %v21_v5  }
   0x5   :  { %112 = vmatmul.msk.bf16.vlgmr.msra.gmra.mxu0 %vm61_vm0, %v114_v1  ;;  %113 = vmatmul.msk.bf16.vlgmr.msra.gmra.mxu1 %vm61_vm0, %v115_v3 }
   0xb   :  { %42 = vperm.xlu1 %120, %v24_v6  }
   0xc   :  { %32 = vperm.xlu0 %119, %v22_v7  }
  0x75   :  { %v38_v8 = vpop.permute.xlu1 %37 }
  0x76   :  { %v28_v9 = vpop.permute.xlu0 %27 }
  0x7d   :  { %v43_v16 = vpop.permute.xlu1 %42 }
  0x7e   :  { %v33_v17 = vpop.permute.xlu0 %32 }
  0x82   :  { %v77_v10 = vpop.f32.mrf.mxu0  ;;  %v82_v11 = vpop.f32.mrf.mxu1 }
  0x83   :  { %v78_v12 = vadd.f32 %v77_v10, %v28_v9  ;;  %v83_v13 = vadd.f32 %v82_v11, %v38_v8 }
  0x85   :  { %v87_v14 = vpack.c.bf16 %v78_v12, %v78_v12  ;;  %v89_v15 = vpack.c.bf16 %v83_v13, %v83_v13 }
  0x87   :  { %92 = vst.msk [vmem:[%s178_s3] sm:$0xf] %vm91_vm1, %v87_v14 }
  0x88   :  { %94 = vst.msk [vmem:[%s178_s3 + $0x8] sm:$0xf] %vm91_vm1, %v89_v15 }
  0x8a   :  { %v79_v18 = vpop.f32.mrf.mxu0  ;;  %v84_v19 = vpop.f32.mrf.mxu1 }
  0x8b   :  { %v80_v20 = vadd.f32 %v79_v18, %v33_v17  ;;  %v85_v21 = vadd.f32 %v84_v19, %v43_v16 }
  0x8d   :  { %v88_v22 = vpack.c.bf16 %v80_v20, %v80_v20  ;;  %v90_v23 = vpack.c.bf16 %v85_v21, %v85_v21 }
  0x8f   :  { %93 = vst.msk [vmem:[%s178_s3 + $0x4] sm:$0xf] %vm91_vm1, %v88_v22 }
  0x90   :  { %95 = vst.msk [vmem:[%s178_s3 + $0xc] sm:$0xf] %vm91_vm1, %v90_v23 }

// kernel: _lambda_.36
= control target key start
LH: loop header
LB: loop body
LE: loop exit
PB: predicated region body
PF: predicated region fallthrough
CT: control target
= control target key end

     0   :  { %v435_v5 = vmov 0   ;;  %vm221_vm0 = vcmask 261120   ;;  %vm293_vm1 = vcmask 257024   ;;  %s576_s1 = inlined_call_operand.vmem [shape: bf16[288,32], index: 1, kind: input, shape index: {}]   ;;  %s577_s0 = inlined_call_operand.vmem [shape: bf16[32,288], index: 0, kind: input, shape index: {}]   ;;  %s578_s2 = inlined_call_operand.vmem [shape: f32[32,1], index: 2, kind: input, shape index: {}]   ;;  %s579_s3 = inlined_call_operand.vmem [shape: bf16[32,32], index: 3, kind: output, shape index: {}]  }
   0x1   :  { %v413_v0 = vld [vmem:[%s576_s1 + $0x38] sm:$0xff]  ;;  %v412_v2 = vld [vmem:[%s576_s1 + $0x30] sm:$0xff]  ;;  %v423_v3 = vld [vmem:[%s576_s1 + $0x88] sm:$0xff]  ;;  %433 = vset.pattern.permute.xlu0 %v435_v5  ;;  %434 = vset.pattern.permute.xlu1 %v435_v5 }
   0x2   :  { %v421_v1 = vld [vmem:[%s576_s1 + $0x78] sm:$0xff]  ;;  %228 = vmatpush.bf16.msra.mxu0 %v413_v0  ;;  %424 = vmatpush.bf16.msra.mxu3 %v413_v0  ;;  %v420_v4 = vld [vmem:[%s576_s1 + $0x70] sm:$0xff]  ;;  %v422_v6 = vld [vmem:[%s576_s1 + $0x80] sm:$0xff] }
   0x3   :  { %247 = vmatpush.bf16.msra.mxu1 %v421_v1  ;;  %272 = vmatpush.bf16.msra.mxu2 %v423_v3  ;;  %v312_v7 = vld [vmem:[%s577_s0 + $0x8] sm:$0xf]  ;;  %v402_v8 = vld [vmem:[%s577_s0 + $0x10] sm:$0xf0]  ;;  %v59_v12 = vld [vmem:[%s578_s2] sm:$0xff] }
   0x4   :  { %v411_v9 = vld [vmem:[%s576_s1 + $0x28] sm:$0xff]  ;;  %v313_v11 = vor.u32 %v402_v8, %v312_v7  ;;  %v410_v13 = vld [vmem:[%s576_s1 + $0x20] sm:$0xff]  ;;  %65 = vperm.xlu0 %433, %v59_v12   ;;  %v409_v15 = vld [vmem:[%s576_s1 + $0x18] sm:$0xff] }
   0x5   :  { %v419_v10 = vld [vmem:[%s576_s1 + $0x68] sm:$0xff]  ;;  %v418_v14 = vld [vmem:[%s576_s1 + $0x60] sm:$0xff]  ;;  %v417_v16 = vld [vmem:[%s576_s1 + $0x58] sm:$0xff] }
   0x6   :  { %229 = vmatpush.bf16.msra.mxu0 %v412_v2  ;;  %425 = vmatpush.bf16.msra.mxu3 %v412_v2  ;;  %v408_v17 = vld [vmem:[%s576_s1 + $0x10] sm:$0xff]  ;;  %v60_v19 = vld [vmem:[%s578_s2 + $0x8] sm:$0xff]  ;;  %v324_v21 = vld [vmem:[%s577_s0 + $0x20] sm:$0xf] }
   0x7   :  { %248 = vmatpush.bf16.msra.mxu1 %v420_v4  ;;  %273 = vmatpush.bf16.msra.mxu2 %v422_v6  ;;  %v61_v18 = vld [vmem:[%s578_s2 + $0x10] sm:$0xff]  ;;  %v405_v22 = vld [vmem:[%s577_s0 + $0x28] sm:$0xf0]  ;;  %v406_v26 = vld [vmem:[%s576_s1] sm:$0xff] }
   0x8   :  { %v416_v20 = vld [vmem:[%s576_s1 + $0x50] sm:$0xff]  ;;  %75 = vperm.xlu1 %434, %v61_v18   ;;  %v407_v23 = vld [vmem:[%s576_s1 + $0x8] sm:$0xff]  ;;  %v325_v25 = vor.u32 %v405_v22, %v324_v21  ;;  %v304_v27 = vld [vmem:[%s577_s0] sm:$0xf] }
   0x9   :  { %v415_v24 = vld [vmem:[%s576_s1 + $0x48] sm:$0xff]  ;;  %v62_v28 = vld [vmem:[%s578_s2 + $0x18] sm:$0xff]  ;;  %v404_v31 = vld [vmem:[%s577_s0 + $0x20] sm:$0xf0] }
   0xa   :  { %230 = vmatpush.bf16.msra.mxu0 %v411_v9  ;;  %426 = vmatpush.bf16.msra.mxu3 %v411_v9  ;;  %v401_v29 = vld [vmem:[%s577_s0 + $0x8] sm:$0xf0]  ;;  %v316_v30 = vld [vmem:[%s577_s0 + $0x18] sm:$0xf]  ;;  %v414_v32 = vld [vmem:[%s576_s1 + $0x40] sm:$0xff] }
   0xb   :  { %249 = vmatpush.bf16.msra.mxu1 %v419_v10  ;;  %398 = vmatmul.msk.bf16.vlgmr.msra.gmra.mxu2 %vm221_vm0, %v313_v11  ;;  %v400_v33 = vld [vmem:[%s577_s0 + $0x4] sm:$0xf]  ;;  %v306_v34 = vld [vmem:[%s577_s0 + $0xc] sm:$0xf0]  ;;  %v305_v35 = vor.u32 %v401_v29, %v304_v27  ;;  %v317_v36 = vor.u32 %v404_v31, %v316_v30  ;;  %v403_v38 = vld [vmem:[%s577_s0 + $0x1c] sm:$0xf] }
   0xc   :  { %70 = vperm.xlu0 %433, %v60_v19   ;;  %v309_v37 = vor.u32 %v400_v33, %v306_v34  ;;  %v318_v39 = vld [vmem:[%s577_s0 + $0x24] sm:$0xf0] }
   0xd   :  { %v321_v40 = vor.u32 %v403_v38, %v318_v39 }
   0xe   :  { %231 = vmatpush.bf16.msra.mxu0 %v410_v13  ;;  %427 = vmatpush.bf16.msra.mxu3 %v410_v13 }
   0xf   :  { %250 = vmatpush.bf16.msra.mxu1 %v418_v14 }
  0x10   :  { %80 = vperm.xlu1 %434, %v62_v28  }
  0x12   :  { %232 = vmatpush.bf16.msra.mxu0 %v409_v15  ;;  %428 = vmatpush.bf16.msra.mxu3 %v409_v15 }
  0x13   :  { %251 = vmatpush.bf16.msra.mxu1 %v417_v16 }
  0x16   :  { %233 = vmatpush.bf16.msra.mxu0 %v408_v17  ;;  %429 = vmatpush.bf16.msra.mxu3 %v408_v17 }
  0x17   :  { %252 = vmatpush.bf16.msra.mxu1 %v416_v20 }
  0x1a   :  { %234 = vmatpush.bf16.msra.mxu0 %v407_v23  ;;  %430 = vmatpush.bf16.msra.mxu3 %v407_v23 }
  0x1b   :  { %253 = vmatpush.bf16.msra.mxu1 %v415_v24  ;;  %399 = vmatmul.msk.bf16.gmra.mxu2 %vm221_vm0, %v325_v25 }
  0x1e   :  { %235 = vmatpush.bf16.msra.mxu0 %v406_v26  ;;  %431 = vmatpush.bf16.msra.mxu3 %v406_v26 }
  0x1f   :  { %254 = vmatpush.bf16.msra.mxu1 %v414_v32 }
  0x21   :  { %236 = vmatmul.bf16.vlgmr.msra.gmra.mxu0 %v305_v35  ;;  %241 = vmatmul.bf16.vlgmr.msra.gmra.mxu3 %v317_v36 }
  0x22   :  { %255 = vmatmul.bf16.vlgmr.msra.gmra.mxu1 %v309_v37 }
  0x32   :  { %260 = vmatmul.bf16.gmra.mxu1 %v321_v40 }
  0x76   :  { %v66_v41 = vpop.permute.xlu0 %65 }
  0x7a   :  { %v76_v55 = vpop.permute.xlu1 %75 }
  0x7e   :  { %v71_v48 = vpop.permute.xlu0 %70 }
  0x82   :  { %v81_v2 = vpop.permute.xlu1 %80 }
  0x8e   :  { %v275_v42 = vpop.f32.mrf.mxu2 }
  0x96   :  { %v277_v50 = vpop.f32.mrf.mxu2 }
  0x9e   :  { %v237_v43 = vpop.f32.mrf.mxu0  ;;  %v280_v62 = vpop.f32.mrf.mxu2 }
  0x9f   :  { %v238_v44 = vadd.f32 %v237_v43, %v66_v41  ;;  %v256_v45 = vpop.f32.mrf.mxu1 }
  0xa1   :  { %v257_v46 = vadd.f32 %v256_v45, %v238_v44 }
  0xa3   :  { %v276_v47 = vadd.f32 %v275_v42, %v257_v46 }
  0xa4   :  { %v242_v56 = vpop.f32.mrf.mxu3 }
  0xa5   :  { %v285_v49 = vmax.f32 %v276_v47, 0.0  ;;  %v243_v59 = vadd.f32 %v242_v56, %v76_v55 }
  0xa6   :  { %v239_v51 = vpop.f32.mrf.mxu0  ;;  %v282_v9 = vpop.f32.mrf.mxu2 }
  0xa7   :  { %v289_v52 = vpack.c.bf16 %v285_v49, %v285_v49  ;;  %v240_v53 = vadd.f32 %v239_v51, %v71_v48  ;;  %v258_v54 = vpop.f32.mrf.mxu1 }
  0xa9   :  { %294 = vst.msk [vmem:[%s579_s3] sm:$0xf] %vm293_vm1, %v289_v52  ;;  %v259_v57 = vadd.f32 %v258_v54, %v240_v53 }
  0xab   :  { %v278_v58 = vadd.f32 %v277_v50, %v259_v57 }
  0xac   :  { %v244_v3 = vpop.f32.mrf.mxu3 }
  0xad   :  { %v286_v60 = vmax.f32 %v278_v58, 0.0  ;;  %v245_v5 = vadd.f32 %v244_v3, %v81_v2 }
  0xaf   :  { %v290_v61 = vpack.c.bf16 %v286_v60, %v286_v60  ;;  %v261_v63 = vpop.f32.mrf.mxu1 }
  0xb0   :  { %v262_v0 = vadd.f32 %v261_v63, %v243_v59 }
  0xb1   :  { %295 = vst.msk [vmem:[%s579_s3 + $0x4] sm:$0xf] %vm293_vm1, %v290_v61 }
  0xb2   :  { %v281_v1 = vadd.f32 %v280_v62, %v262_v0 }
  0xb4   :  { %v287_v4 = vmax.f32 %v281_v1, 0.0 }
  0xb6   :  { %v291_v6 = vpack.c.bf16 %v287_v4, %v287_v4 }
  0xb7   :  { %v263_v7 = vpop.f32.mrf.mxu1 }
  0xb8   :  { %296 = vst.msk [vmem:[%s579_s3 + $0x8] sm:$0xf] %vm293_vm1, %v291_v6  ;;  %v264_v8 = vadd.f32 %v263_v7, %v245_v5 }
  0xba   :  { %v283_v10 = vadd.f32 %v282_v9, %v264_v8 }
  0xbc   :  { %v288_v11 = vmax.f32 %v283_v10, 0.0 }
  0xbe   :  { %v292_v12 = vpack.c.bf16 %v288_v11, %v288_v11 }
  0xc0   :  { %297 = vst.msk [vmem:[%s579_s3 + $0xc] sm:$0xf] %vm293_vm1, %v292_v12 }

// kernel: _lambda_.35
= control target key start
LH: loop header
LB: loop body
LE: loop exit
PB: predicated region body
PF: predicated region fallthrough
CT: control target
= control target key end

     0   :  { %v459_v5 = vmov 0   ;;  %vm224_vm0 = vcmask 261120   ;;  %vm308_vm1 = vcmask 257024   ;;  %s611_s1 = inlined_call_operand.vmem [shape: bf16[288,32], index: 1, kind: input, shape index: {}]   ;;  %s612_s0 = inlined_call_operand.vmem [shape: bf16[32,288], index: 0, kind: input, shape index: {}]   ;;  %s613_s2 = inlined_call_operand.vmem [shape: f32[32,1], index: 2, kind: input, shape index: {}]   ;;  %s614_s3 = inlined_call_operand.vmem [shape: bf16[32,32], index: 3, kind: input, shape index: {}]   ;;  %s615_s4 = inlined_call_operand.vmem [shape: bf16[32,32], index: 4, kind: output, shape index: {}]  }
   0x1   :  { %v428_v0 = vld [vmem:[%s611_s1 + $0x38] sm:$0xff]  ;;  %v427_v2 = vld [vmem:[%s611_s1 + $0x30] sm:$0xff]  ;;  %v438_v3 = vld [vmem:[%s611_s1 + $0x88] sm:$0xff]  ;;  %457 = vset.pattern.permute.xlu0 %v459_v5  ;;  %458 = vset.pattern.permute.xlu1 %v459_v5 }
   0x2   :  { %v436_v1 = vld [vmem:[%s611_s1 + $0x78] sm:$0xff]  ;;  %231 = vmatpush.bf16.msra.mxu0 %v428_v0  ;;  %448 = vmatpush.bf16.msra.mxu3 %v428_v0  ;;  %v435_v4 = vld [vmem:[%s611_s1 + $0x70] sm:$0xff]  ;;  %v437_v6 = vld [vmem:[%s611_s1 + $0x80] sm:$0xff] }
   0x3   :  { %250 = vmatpush.bf16.msra.mxu1 %v436_v1  ;;  %275 = vmatpush.bf16.msra.mxu2 %v438_v3  ;;  %v327_v7 = vld [vmem:[%s612_s0 + $0x8] sm:$0xf]  ;;  %v417_v8 = vld [vmem:[%s612_s0 + $0x10] sm:$0xf0]  ;;  %v62_v12 = vld [vmem:[%s613_s2] sm:$0xff] }
   0x4   :  { %v426_v9 = vld [vmem:[%s611_s1 + $0x28] sm:$0xff]  ;;  %v328_v11 = vor.u32 %v417_v8, %v327_v7  ;;  %v425_v13 = vld [vmem:[%s611_s1 + $0x20] sm:$0xff]  ;;  %68 = vperm.xlu0 %457, %v62_v12   ;;  %v424_v15 = vld [vmem:[%s611_s1 + $0x18] sm:$0xff] }
   0x5   :  { %v434_v10 = vld [vmem:[%s611_s1 + $0x68] sm:$0xff]  ;;  %v433_v14 = vld [vmem:[%s611_s1 + $0x60] sm:$0xff]  ;;  %v432_v16 = vld [vmem:[%s611_s1 + $0x58] sm:$0xff] }
   0x6   :  { %232 = vmatpush.bf16.msra.mxu0 %v427_v2  ;;  %449 = vmatpush.bf16.msra.mxu3 %v427_v2  ;;  %v423_v17 = vld [vmem:[%s611_s1 + $0x10] sm:$0xff]  ;;  %v63_v19 = vld [vmem:[%s613_s2 + $0x8] sm:$0xff]  ;;  %v339_v21 = vld [vmem:[%s612_s0 + $0x20] sm:$0xf] }
   0x7   :  { %251 = vmatpush.bf16.msra.mxu1 %v435_v4  ;;  %276 = vmatpush.bf16.msra.mxu2 %v437_v6  ;;  %v64_v18 = vld [vmem:[%s613_s2 + $0x10] sm:$0xff]  ;;  %v420_v22 = vld [vmem:[%s612_s0 + $0x28] sm:$0xf0]  ;;  %v421_v26 = vld [vmem:[%s611_s1] sm:$0xff] }
   0x8   :  { %v431_v20 = vld [vmem:[%s611_s1 + $0x50] sm:$0xff]  ;;  %78 = vperm.xlu1 %458, %v64_v18   ;;  %v422_v23 = vld [vmem:[%s611_s1 + $0x8] sm:$0xff]  ;;  %v340_v25 = vor.u32 %v420_v22, %v339_v21  ;;  %v319_v27 = vld [vmem:[%s612_s0] sm:$0xf] }
   0x9   :  { %v430_v24 = vld [vmem:[%s611_s1 + $0x48] sm:$0xff]  ;;  %v65_v28 = vld [vmem:[%s613_s2 + $0x18] sm:$0xff]  ;;  %v419_v31 = vld [vmem:[%s612_s0 + $0x20] sm:$0xf0] }
   0xa   :  { %233 = vmatpush.bf16.msra.mxu0 %v426_v9  ;;  %450 = vmatpush.bf16.msra.mxu3 %v426_v9  ;;  %v416_v29 = vld [vmem:[%s612_s0 + $0x8] sm:$0xf0]  ;;  %v331_v30 = vld [vmem:[%s612_s0 + $0x18] sm:$0xf]  ;;  %v429_v32 = vld [vmem:[%s611_s1 + $0x40] sm:$0xff] }
   0xb   :  { %252 = vmatpush.bf16.msra.mxu1 %v434_v10  ;;  %413 = vmatmul.msk.bf16.vlgmr.msra.gmra.mxu2 %vm224_vm0, %v328_v11  ;;  %v415_v33 = vld [vmem:[%s612_s0 + $0x4] sm:$0xf]  ;;  %v321_v34 = vld [vmem:[%s612_s0 + $0xc] sm:$0xf0]  ;;  %v320_v35 = vor.u32 %v416_v29, %v319_v27  ;;  %v332_v36 = vor.u32 %v419_v31, %v331_v30  ;;  %v418_v38 = vld [vmem:[%s612_s0 + $0x1c] sm:$0xf] }
   0xc   :  { %73 = vperm.xlu0 %457, %v63_v19   ;;  %v324_v37 = vor.u32 %v415_v33, %v321_v34  ;;  %v333_v39 = vld [vmem:[%s612_s0 + $0x24] sm:$0xf0]  ;;  %v440_v44 = vld [vmem:[%s614_s3] sm:$0xff]  }
   0xd   :  { %v336_v40 = vor.u32 %v418_v38, %v333_v39  ;;  %v441_v48 = vunpack.c.l.bf16 %v440_v44  ;;  %v442_v61 = vunpack.c.h.bf16 %v440_v44  ;;  %v447_v1 = vld [vmem:[%s614_s3 + $0x8] sm:$0xff]  }
   0xe   :  { %234 = vmatpush.bf16.msra.mxu0 %v425_v13  ;;  %451 = vmatpush.bf16.msra.mxu3 %v425_v13  ;;  %v445_v6 = vunpack.c.l.bf16 %v447_v1 }
   0xf   :  { %253 = vmatpush.bf16.msra.mxu1 %v433_v14 }
  0x10   :  { %83 = vperm.xlu1 %458, %v65_v28  }
  0x12   :  { %235 = vmatpush.bf16.msra.mxu0 %v424_v15  ;;  %452 = vmatpush.bf16.msra.mxu3 %v424_v15 }
  0x13   :  { %254 = vmatpush.bf16.msra.mxu1 %v432_v16 }
  0x16   :  { %236 = vmatpush.bf16.msra.mxu0 %v423_v17  ;;  %453 = vmatpush.bf16.msra.mxu3 %v423_v17  ;;  %v446_v17 = vunpack.c.h.bf16 %v447_v1 }
  0x17   :  { %255 = vmatpush.bf16.msra.mxu1 %v431_v20 }
  0x1a   :  { %237 = vmatpush.bf16.msra.mxu0 %v422_v23  ;;  %454 = vmatpush.bf16.msra.mxu3 %v422_v23 }
  0x1b   :  { %256 = vmatpush.bf16.msra.mxu1 %v430_v24  ;;  %414 = vmatmul.msk.bf16.gmra.mxu2 %vm224_vm0, %v340_v25 }
  0x1e   :  { %238 = vmatpush.bf16.msra.mxu0 %v421_v26  ;;  %455 = vmatpush.bf16.msra.mxu3 %v421_v26 }
  0x1f   :  { %257 = vmatpush.bf16.msra.mxu1 %v429_v32 }
  0x21   :  { %239 = vmatmul.bf16.vlgmr.msra.gmra.mxu0 %v320_v35  ;;  %244 = vmatmul.bf16.vlgmr.msra.gmra.mxu3 %v332_v36 }
  0x22   :  { %258 = vmatmul.bf16.vlgmr.msra.gmra.mxu1 %v324_v37 }
  0x32   :  { %263 = vmatmul.bf16.gmra.mxu1 %v336_v40 }
  0x76   :  { %v69_v41 = vpop.permute.xlu0 %68 }
  0x7a   :  { %v79_v58 = vpop.permute.xlu1 %78 }
  0x7e   :  { %v74_v50 = vpop.permute.xlu0 %73 }
  0x82   :  { %v84_v9 = vpop.permute.xlu1 %83 }
  0x8e   :  { %v278_v42 = vpop.f32.mrf.mxu2 }
  0x96   :  { %v280_v52 = vpop.f32.mrf.mxu2 }
  0x9e   :  { %v240_v43 = vpop.f32.mrf.mxu0  ;;  %v283_v3 = vpop.f32.mrf.mxu2 }
  0x9f   :  { %v241_v45 = vadd.f32 %v240_v43, %v69_v41  ;;  %v259_v46 = vpop.f32.mrf.mxu1 }
  0xa1   :  { %v260_v47 = vadd.f32 %v259_v46, %v241_v45 }
  0xa3   :  { %v279_v49 = vadd.f32 %v278_v42, %v260_v47 }
  0xa4   :  { %v245_v59 = vpop.f32.mrf.mxu3 }
  0xa5   :  { %v296_v51 = vadd.f32 %v441_v48, %v279_v49  ;;  %v246_v63 = vadd.f32 %v245_v59, %v79_v58 }
  0xa6   :  { %v242_v53 = vpop.f32.mrf.mxu0  ;;  %v285_v18 = vpop.f32.mrf.mxu2 }
  0xa7   :  { %v300_v54 = vmax.f32 %v296_v51, 0.0  ;;  %v243_v55 = vadd.f32 %v242_v53, %v74_v50  ;;  %v261_v56 = vpop.f32.mrf.mxu1 }
  0xa9   :  { %v304_v57 = vpack.c.bf16 %v300_v54, %v300_v54  ;;  %v262_v60 = vadd.f32 %v261_v56, %v243_v55 }
  0xab   :  { %309 = vst.msk [vmem:[%s615_s4] sm:$0xf] %vm308_vm1, %v304_v57  ;;  %v281_v62 = vadd.f32 %v280_v52, %v262_v60 }
  0xac   :  { %v247_v10 = vpop.f32.mrf.mxu3 }
  0xad   :  { %v297_v0 = vadd.f32 %v442_v61, %v281_v62  ;;  %v248_v12 = vadd.f32 %v247_v10, %v84_v9 }
  0xaf   :  { %v301_v2 = vmax.f32 %v297_v0, 0.0  ;;  %v264_v4 = vpop.f32.mrf.mxu1 }
  0xb0   :  { %v265_v5 = vadd.f32 %v264_v4, %v246_v63 }
  0xb1   :  { %v305_v7 = vpack.c.bf16 %v301_v2, %v301_v2 }
  0xb2   :  { %v284_v8 = vadd.f32 %v283_v3, %v265_v5 }
  0xb3   :  { %310 = vst.msk [vmem:[%s615_s4 + $0x4] sm:$0xf] %vm308_vm1, %v305_v7 }
  0xb4   :  { %v298_v11 = vadd.f32 %v445_v6, %v284_v8 }
  0xb6   :  { %v302_v13 = vmax.f32 %v298_v11, 0.0 }
  0xb7   :  { %v266_v14 = vpop.f32.mrf.mxu1 }
  0xb8   :  { %v306_v15 = vpack.c.bf16 %v302_v13, %v302_v13  ;;  %v267_v16 = vadd.f32 %v266_v14, %v248_v12 }
  0xba   :  { %311 = vst.msk [vmem:[%s615_s4 + $0x8] sm:$0xf] %vm308_vm1, %v306_v15  ;;  %v286_v19 = vadd.f32 %v285_v18, %v267_v16 }
  0xbc   :  { %v299_v20 = vadd.f32 %v446_v17, %v286_v19 }
  0xbe   :  { %v303_v21 = vmax.f32 %v299_v20, 0.0 }
  0xc0   :  { %v307_v22 = vpack.c.bf16 %v303_v21, %v303_v21 }
  0xc2   :  { %312 = vst.msk [vmem:[%s615_s4 + $0xc] sm:$0xf] %vm308_vm1, %v307_v22 }

// kernel: _lambda_.38
= control target key start
LH: loop header
LB: loop body
LE: loop exit
PB: predicated region body
PF: predicated region fallthrough
CT: control target
= control target key end

     0   :  { %vm283_vm0 = vcmask 261120   ;;  %v586_v15 = vmov 0   ;;  %vm399_vm1 = vcmask 60416   ;;  %s813_s1 = inlined_call_operand.vmem [shape: bf16[288,8], index: 1, kind: input, shape index: {}]   ;;  %s814_s0 = inlined_call_operand.vmem [shape: bf16[64,288], index: 0, kind: input, shape index: {}]   ;;  %s815_s2 = inlined_call_operand.vmem [shape: f32[64,1], index: 2, kind: input, shape index: {}]   ;;  %s816_s3 = inlined_call_operand.vmem [shape: bf16[64,8], index: 3, kind: output, shape index: {}]  }
   0x1   :  { %v555_v0 = vld [vmem:[%s813_s1 + $0x38] sm:$0xff]  ;;  %v565_v2 = vld [vmem:[%s813_s1 + $0x88] sm:$0xff]  ;;  %v554_v3 = vld [vmem:[%s813_s1 + $0x30] sm:$0xff]  ;;  %584 = vset.pattern.permute.xlu1 %v586_v15  ;;  %583 = vset.pattern.permute.xlu0 %v586_v15 }
   0x2   :  { %v613_v1 = vld [vmem:[%s813_s1 + $0x78] sm:$0xff]  ;;  %296 = vmatpush.bf16.msra.mxu0 %v555_v0  ;;  %566 = vmatpush.bf16.msra.mxu3 %v555_v0  ;;  %v625_v4 = vld [vmem:[%s813_s1 + $0x70] sm:$0xff]  ;;  %v564_v5 = vld [vmem:[%s813_s1 + $0x80] sm:$0xff] }
   0x3   :  { %574 = vmatpush.bf16.msra.mxu1 %v613_v1  ;;  %360 = vmatpush.bf16.msra.mxu2 %v565_v2  ;;  %v422_v6 = vld [vmem:[%s814_s0 + $0x8] sm:$0xf]  ;;  %v538_v7 = vld [vmem:[%s814_s0 + $0x10] sm:$0xf0]  ;;  %v552_v11 = vld [vmem:[%s813_s1 + $0x20] sm:$0xff] }
   0x4   :  { %v553_v8 = vld [vmem:[%s813_s1 + $0x28] sm:$0xff]  ;;  %v423_v10 = vor.u32 %v538_v7, %v422_v6  ;;  %v653_v12 = vld [vmem:[%s813_s1 + $0x60] sm:$0xff]  ;;  %v551_v13 = vld [vmem:[%s813_s1 + $0x18] sm:$0xff]  ;;  %585 = vset.pattern.permute.xlu2 %v586_v15 }
   0x5   :  { %v643_v9 = vld [vmem:[%s813_s1 + $0x68] sm:$0xff]  ;;  %v662_v14 = vld [vmem:[%s813_s1 + $0x58] sm:$0xff]  ;;  %v550_v16 = vld [vmem:[%s813_s1 + $0x10] sm:$0xff] }
   0x6   :  { %297 = vmatpush.bf16.msra.mxu0 %v554_v3  ;;  %567 = vmatpush.bf16.msra.mxu3 %v554_v3  ;;  %v69_v17 = vld [vmem:[%s815_s2 + $0x10] sm:$0xff]  ;;  %v434_v19 = vld [vmem:[%s814_s0 + $0x20] sm:$0xf]  ;;  %v541_v20 = vld [vmem:[%s814_s0 + $0x28] sm:$0xf0] }
   0x7   :  { %575 = vmatpush.bf16.msra.mxu1 %v625_v4  ;;  %361 = vmatpush.bf16.msra.mxu2 %v564_v5  ;;  %v558_v18 = vld [vmem:[%s813_s1 + $0x50] sm:$0xff]  ;;  %v549_v21 = vld [vmem:[%s813_s1 + $0x8] sm:$0xff]  ;;  %v435_v23 = vor.u32 %v541_v20, %v434_v19  ;;  %v67_v24 = vld [vmem:[%s815_s2] sm:$0xff] }
   0x8   :  { %87 = vperm.xlu1 %584, %v69_v17   ;;  %v557_v22 = vld [vmem:[%s813_s1 + $0x48] sm:$0xff]  ;;  %77 = vperm.xlu0 %583, %v67_v24   ;;  %v548_v25 = vld [vmem:[%s813_s1] sm:$0xff]  ;;  %v426_v26 = vld [vmem:[%s814_s0 + $0x18] sm:$0xf] }
   0x9   :  { %v70_v27 = vld [vmem:[%s815_s2 + $0x18] sm:$0xff]  ;;  %v540_v28 = vld [vmem:[%s814_s0 + $0x20] sm:$0xf0]  ;;  %v414_v29 = vld [vmem:[%s814_s0] sm:$0xf] }
   0xa   :  { %298 = vmatpush.bf16.msra.mxu0 %v553_v8  ;;  %568 = vmatpush.bf16.msra.mxu3 %v553_v8  ;;  %v537_v30 = vld [vmem:[%s814_s0 + $0x8] sm:$0xf0]  ;;  %v556_v31 = vld [vmem:[%s813_s1 + $0x40] sm:$0xff]  ;;  %v539_v32 = vld [vmem:[%s814_s0 + $0x1c] sm:$0xf]  ;;  %v427_v34 = vor.u32 %v540_v28, %v426_v26 }
   0xb   :  { %576 = vmatpush.bf16.msra.mxu1 %v643_v9  ;;  %532 = vmatmul.msk.bf16.vlgmr.msra.gmra.mxu2 %vm283_vm0, %v423_v10  ;;  %v428_v33 = vld [vmem:[%s814_s0 + $0x24] sm:$0xf0]  ;;  %v415_v35 = vor.u32 %v537_v30, %v414_v29  ;;  %v74_v38 = vld [vmem:[%s815_s2 + $0x38] sm:$0xff]  ;;  %v71_v39 = vld [vmem:[%s815_s2 + $0x20] sm:$0xff] }
   0xc   :  { %v431_v36 = vor.u32 %v539_v32, %v428_v33  ;;  %v68_v37 = vld [vmem:[%s815_s2 + $0x8] sm:$0xff]  ;;  %v446_v40 = vld [vmem:[%s814_s0 + $0x38] sm:$0xf]  ;;  %v544_v41 = vld [vmem:[%s814_s0 + $0x40] sm:$0xf0]  ;;  %97 = vperm.xlu2 %585, %v71_v39  }
   0xd   :  { %v447_v42 = vor.u32 %v544_v41, %v446_v40  ;;  %v73_v43 = vld [vmem:[%s815_s2 + $0x30] sm:$0xff]  ;;  %v72_v44 = vld [vmem:[%s815_s2 + $0x28] sm:$0xff]  ;;  %v543_v46 = vld [vmem:[%s814_s0 + $0x38] sm:$0xf0] }
   0xe   :  { %299 = vmatpush.bf16.msra.mxu0 %v552_v11  ;;  %569 = vmatpush.bf16.msra.mxu3 %v552_v11  ;;  %v438_v45 = vld [vmem:[%s814_s0 + $0x30] sm:$0xf]  ;;  %v542_v47 = vld [vmem:[%s814_s0 + $0x34] sm:$0xf]  ;;  %v440_v48 = vld [vmem:[%s814_s0 + $0x3c] sm:$0xf0] }
   0xf   :  { %577 = vmatpush.bf16.msra.mxu1 %v653_v12  ;;  %v439_v49 = vor.u32 %v543_v46, %v438_v45  ;;  %v443_v50 = vor.u32 %v542_v47, %v440_v48  ;;  %v458_v51 = vld [vmem:[%s814_s0 + $0x50] sm:$0xf]  ;;  %v547_v52 = vld [vmem:[%s814_s0 + $0x58] sm:$0xf0]  ;;  %v536_v54 = vld [vmem:[%s814_s0 + $0x4] sm:$0xf] }
  0x10   :  { %92 = vperm.xlu1 %584, %v70_v27   ;;  %82 = vperm.xlu0 %583, %v68_v37   ;;  %v459_v53 = vor.u32 %v547_v52, %v458_v51  ;;  %v416_v55 = vld [vmem:[%s814_s0 + $0xc] sm:$0xf0]  ;;  %v450_v57 = vld [vmem:[%s814_s0 + $0x48] sm:$0xf]  ;;  %v546_v58 = vld [vmem:[%s814_s0 + $0x50] sm:$0xf0] }
  0x11   :  { %v419_v56 = vor.u32 %v536_v54, %v416_v55  ;;  %v545_v59 = vld [vmem:[%s814_s0 + $0x4c] sm:$0xf]  ;;  %v452_v60 = vld [vmem:[%s814_s0 + $0x54] sm:$0xf0]  ;;  %v451_v61 = vor.u32 %v546_v58, %v450_v57 }
  0x12   :  { %300 = vmatpush.bf16.msra.mxu0 %v551_v13  ;;  %570 = vmatpush.bf16.msra.mxu3 %v551_v13  ;;  %v455_v62 = vor.u32 %v545_v59, %v452_v60 }
  0x13   :  { %578 = vmatpush.bf16.msra.mxu1 %v662_v14 }
  0x14   :  { %102 = vperm.xlu2 %585, %v72_v44  }
  0x16   :  { %301 = vmatpush.bf16.msra.mxu0 %v550_v16  ;;  %571 = vmatpush.bf16.msra.mxu3 %v550_v16 }
  0x17   :  { %579 = vmatpush.bf16.msra.mxu1 %v558_v18 }
  0x18   :  { %112 = vperm.xlu1 %584, %v74_v38   ;;  %107 = vperm.xlu0 %583, %v73_v43  }
  0x1a   :  { %302 = vmatpush.bf16.msra.mxu0 %v549_v21  ;;  %572 = vmatpush.bf16.msra.mxu3 %v549_v21 }
  0x1b   :  { %580 = vmatpush.bf16.msra.mxu1 %v557_v22  ;;  %533 = vmatmul.msk.bf16.gmra.mxu2 %vm283_vm0, %v435_v23 }
  0x1e   :  { %303 = vmatpush.bf16.msra.mxu0 %v548_v25  ;;  %573 = vmatpush.bf16.msra.mxu3 %v548_v25 }
  0x1f   :  { %581 = vmatpush.bf16.msra.mxu1 %v556_v31 }
  0x21   :  { %309 = vmatmul.bf16.vlgmr.msra.gmra.mxu3 %v427_v34  ;;  %304 = vmatmul.bf16.vlgmr.msra.gmra.mxu0 %v415_v35 }
  0x22   :  { %325 = vmatpush.bf16.msrb.mxu0 %v613_v1  ;;  %338 = vmatmul.bf16.vlgmr.msra.gmra.mxu1 %v431_v36 }
  0x26   :  { %326 = vmatpush.bf16.msrb.mxu0 %v625_v4 }
  0x2a   :  { %327 = vmatpush.bf16.msrb.mxu0 %v643_v9 }
  0x2b   :  { %534 = vmatmul.msk.bf16.gmra.mxu2 %vm283_vm0, %v447_v42 }
  0x2e   :  { %328 = vmatpush.bf16.msrb.mxu0 %v653_v12 }
  0x31   :  { %314 = vmatmul.bf16.gmra.mxu3 %v439_v49 }
  0x32   :  { %329 = vmatpush.bf16.msrb.mxu0 %v662_v14  ;;  %343 = vmatmul.bf16.gmra.mxu1 %v443_v50 }
  0x36   :  { %330 = vmatpush.bf16.msrb.mxu0 %v558_v18 }
  0x3a   :  { %331 = vmatpush.bf16.msrb.mxu0 %v557_v22 }
  0x3b   :  { %535 = vmatmul.msk.bf16.gmra.mxu2 %vm283_vm0, %v459_v53 }
  0x3e   :  { %332 = vmatpush.bf16.msrb.mxu0 %v556_v31 }
  0x41   :  { %333 = vmatmul.bf16.vlgmr.msrb.gmra.mxu0 %v419_v56  ;;  %319 = vmatmul.bf16.gmra.mxu3 %v451_v61 }
  0x42   :  { %348 = vmatmul.bf16.gmra.mxu1 %v455_v62 }
  0x66   :  { %v98_v19 = vpop.permute.xlu2 %97 }
  0x6e   :  { %v103_v32 = vpop.permute.xlu2 %102 }
  0x7a   :  { %v88_v3 = vpop.permute.xlu1 %87  ;;  %v78_v16 = vpop.permute.xlu0 %77 }
  0x82   :  { %v93_v11 = vpop.permute.xlu1 %92  ;;  %v83_v28 = vpop.permute.xlu0 %82 }
  0x8a   :  { %v108_v46 = vpop.permute.xlu0 %107  ;;  %v113_v61 = vpop.permute.xlu1 %112 }
  0x8e   :  { %v363_v63 = vpop.f32.mrf.mxu2 }
  0x96   :  { %v365_v0 = vpop.f32.mrf.mxu2 }
  0x9e   :  { %v368_v1 = vpop.f32.mrf.mxu2  ;;  %v305_v8 = vpop.f32.mrf.mxu0 }
  0x9f   :  { %v339_v2 = vpop.f32.mrf.mxu1  ;;  %v306_v30 = vadd.f32 %v305_v8, %v78_v16 }
  0xa4   :  { %v310_v4 = vpop.f32.mrf.mxu3 }
  0xa5   :  { %v311_v5 = vadd.f32 %v310_v4, %v88_v3 }
  0xa6   :  { %v370_v9 = vpop.f32.mrf.mxu2  ;;  %v307_v21 = vpop.f32.mrf.mxu0 }
  0xa7   :  { %v340_v6 = vadd.f32 %v339_v2, %v311_v5  ;;  %v341_v7 = vpop.f32.mrf.mxu1  ;;  %v308_v44 = vadd.f32 %v307_v21, %v83_v28 }
  0xa9   :  { %v369_v10 = vadd.f32 %v368_v1, %v340_v6 }
  0xab   :  { %v385_v12 = vmax.f32 %v369_v10, 0.0 }
  0xac   :  { %v312_v13 = vpop.f32.mrf.mxu3 }
  0xad   :  { %v393_v14 = vpack.c.bf16 %v385_v12, %v385_v12  ;;  %v313_v15 = vadd.f32 %v312_v13, %v93_v11 }
  0xae   :  { %v373_v22 = vpop.f32.mrf.mxu2 }
  0xaf   :  { %402 = vst.msk [vmem:[%s816_s3 + $0x8] sm:$0xf] %vm399_vm1, %v393_v14  ;;  %v342_v17 = vadd.f32 %v341_v7, %v313_v15  ;;  %v344_v18 = vpop.f32.mrf.mxu1 }
  0xb1   :  { %v371_v20 = vadd.f32 %v370_v9, %v342_v17 }
  0xb3   :  { %v386_v23 = vmax.f32 %v371_v20, 0.0 }
  0xb4   :  { %v315_v24 = vpop.f32.mrf.mxu3 }
  0xb5   :  { %v394_v25 = vpack.c.bf16 %v386_v23, %v386_v23  ;;  %v316_v26 = vadd.f32 %v315_v24, %v98_v19 }
  0xb6   :  { %v375_v35 = vpop.f32.mrf.mxu2 }
  0xb7   :  { %403 = vst.msk [vmem:[%s816_s3 + $0xc] sm:$0xf] %vm399_vm1, %v394_v25  ;;  %v345_v27 = vadd.f32 %v344_v18, %v316_v26  ;;  %v346_v31 = vpop.f32.mrf.mxu1 }
  0xb9   :  { %v374_v29 = vadd.f32 %v373_v22, %v345_v27 }
  0xbb   :  { %v387_v33 = vmax.f32 %v374_v29, 0.0 }
  0xbc   :  { %v317_v37 = vpop.f32.mrf.mxu3 }
  0xbd   :  { %v395_v38 = vpack.c.bf16 %v387_v33, %v387_v33  ;;  %v318_v39 = vadd.f32 %v317_v37, %v103_v32 }
  0xbe   :  { %v334_v34 = vpop.f32.mrf.mxu0  ;;  %v378_v54 = vpop.f32.mrf.mxu2 }
  0xbf   :  { %v335_v36 = vadd.f32 %v334_v34, %v306_v30  ;;  %404 = vst.msk [vmem:[%s816_s3 + $0x10] sm:$0xf] %vm399_vm1, %v395_v38  ;;  %v347_v41 = vadd.f32 %v346_v31, %v318_v39  ;;  %v349_v49 = vpop.f32.mrf.mxu1 }
  0xc1   :  { %v364_v40 = vadd.f32 %v363_v63, %v335_v36  ;;  %v376_v43 = vadd.f32 %v375_v35, %v347_v41 }
  0xc3   :  { %v383_v42 = vmax.f32 %v364_v40, 0.0  ;;  %v388_v47 = vmax.f32 %v376_v43, 0.0 }
  0xc4   :  { %v320_v51 = vpop.f32.mrf.mxu3 }
  0xc5   :  { %v391_v45 = vpack.c.bf16 %v383_v42, %v383_v42  ;;  %v396_v52 = vpack.c.bf16 %v388_v47, %v388_v47  ;;  %v321_v53 = vadd.f32 %v320_v51, %v108_v46 }
  0xc6   :  { %v336_v48 = vpop.f32.mrf.mxu0  ;;  %v380_v3 = vpop.f32.mrf.mxu2 }
  0xc7   :  { %400 = vst.msk [vmem:[%s816_s3] sm:$0xf] %vm399_vm1, %v391_v45  ;;  %v337_v50 = vadd.f32 %v336_v48, %v308_v44  ;;  %v350_v56 = vadd.f32 %v349_v49, %v321_v53 }
  0xc8   :  { %405 = vst.msk [vmem:[%s816_s3 + $0x14] sm:$0xf] %vm399_vm1, %v396_v52 }
  0xc9   :  { %v366_v55 = vadd.f32 %v365_v0, %v337_v50  ;;  %v379_v58 = vadd.f32 %v378_v54, %v350_v56  ;;  %v351_v0 = vpop.f32.mrf.mxu1 }
  0xcb   :  { %v384_v57 = vmax.f32 %v366_v55, 0.0  ;;  %v389_v60 = vmax.f32 %v379_v58, 0.0 }
  0xcc   :  { %v322_v62 = vpop.f32.mrf.mxu3 }
  0xcd   :  { %v392_v59 = vpack.c.bf16 %v384_v57, %v384_v57  ;;  %v397_v63 = vpack.c.bf16 %v389_v60, %v389_v60  ;;  %v323_v1 = vadd.f32 %v322_v62, %v113_v61 }
  0xcf   :  { %401 = vst.msk [vmem:[%s816_s3 + $0x4] sm:$0xf] %vm399_vm1, %v392_v59  ;;  %v352_v2 = vadd.f32 %v351_v0, %v323_v1 }
  0xd0   :  { %406 = vst.msk [vmem:[%s816_s3 + $0x18] sm:$0xf] %vm399_vm1, %v397_v63 }
  0xd1   :  { %v381_v4 = vadd.f32 %v380_v3, %v352_v2 }
  0xd3   :  { %v390_v5 = vmax.f32 %v381_v4, 0.0 }
  0xd5   :  { %v398_v6 = vpack.c.bf16 %v390_v5, %v390_v5 }
  0xd7   :  { %407 = vst.msk [vmem:[%s816_s3 + $0x1c] sm:$0xf] %vm399_vm1, %v398_v6 }

// kernel: _lambda_.39
= control target key start
LH: loop header
LB: loop body
LE: loop exit
PB: predicated region body
PF: predicated region fallthrough
CT: control target
= control target key end

     0   :  { %v214_v0 = vmov 0   ;;  %vm107_vm0 = vcmask 261120   ;;  %vm157_vm1 = vcmask 60416   ;;  %s309_s2 = inlined_call_operand.vmem [shape: f32[64,1], index: 2, kind: input, shape index: {}]   ;;  %s310_s1 = inlined_call_operand.vmem [shape: bf16[32,8], index: 1, kind: input, shape index: {}]   ;;  %s311_s0 = inlined_call_operand.vmem [shape: bf16[64,32], index: 0, kind: input, shape index: {}]   ;;  %s312_s3 = inlined_call_operand.vmem [shape: bf16[64,8], index: 3, kind: output, shape index: {}]  }
   0x1   :  { %212 = vset.pattern.permute.xlu1 %v214_v0  ;;  %211 = vset.pattern.permute.xlu0 %v214_v0  ;;  %v29_v1 = vld [vmem:[%s309_s2 + $0x10] sm:$0xff]  ;;  %v27_v2 = vld [vmem:[%s309_s2] sm:$0xff]  ;;  %v203_v3 = vld [vmem:[%s310_s1 + $0x8] sm:$0xff] }
   0x2   :  { %47 = vperm.xlu1 %212, %v29_v1   ;;  %37 = vperm.xlu0 %211, %v27_v2   ;;  %v202_v4 = vld [vmem:[%s310_s1] sm:$0xff]  ;;  %v199_v7 = vld [vmem:[%s311_s0 + $0x8] sm:$0xff]  ;;  %v200_v8 = vld [vmem:[%s311_s0 + $0x10] sm:$0xff] }
   0x3   :  { %126 = vmatpush.bf16.msra.mxu0 %v203_v3  ;;  %204 = vmatpush.bf16.msra.mxu1 %v203_v3  ;;  %v31_v5 = vld [vmem:[%s309_s2 + $0x20] sm:$0xff]  ;;  %v201_v9 = vld [vmem:[%s311_s0 + $0x18] sm:$0xff]  ;;  %v28_v11 = vld [vmem:[%s309_s2 + $0x8] sm:$0xff] }
   0x4   :  { %205 = vmatpush.bf16.msra.mxu2 %v203_v3  ;;  %206 = vmatpush.bf16.msra.mxu3 %v203_v3  ;;  %v198_v6 = vld [vmem:[%s311_s0] sm:$0xff]  ;;  %v30_v10 = vld [vmem:[%s309_s2 + $0x18] sm:$0xff]  ;;  %v32_v12 = vld [vmem:[%s309_s2 + $0x28] sm:$0xff] }
   0x5   :  { %213 = vset.pattern.permute.xlu2 %v214_v0  ;;  %v34_v13 = vld [vmem:[%s309_s2 + $0x38] sm:$0xff]  ;;  %v33_v14 = vld [vmem:[%s309_s2 + $0x30] sm:$0xff] }
   0x6   :  { %57 = vperm.xlu2 %213, %v31_v5  }
   0x7   :  { %127 = vmatpush.bf16.msra.mxu0 %v202_v4  ;;  %207 = vmatpush.bf16.msra.mxu1 %v202_v4 }
   0x8   :  { %208 = vmatpush.bf16.msra.mxu2 %v202_v4  ;;  %209 = vmatpush.bf16.msra.mxu3 %v202_v4 }
   0xa   :  { %194 = vmatmul.msk.bf16.vlgmr.msra.gmra.mxu0 %vm107_vm0, %v198_v6  ;;  %195 = vmatmul.msk.bf16.vlgmr.msra.gmra.mxu1 %vm107_vm0, %v199_v7 }
   0xb   :  { %196 = vmatmul.msk.bf16.vlgmr.msra.gmra.mxu2 %vm107_vm0, %v200_v8  ;;  %197 = vmatmul.msk.bf16.vlgmr.msra.gmra.mxu3 %vm107_vm0, %v201_v9 }
   0xc   :  { %52 = vperm.xlu1 %212, %v30_v10   ;;  %42 = vperm.xlu0 %211, %v28_v11  }
   0xe   :  { %62 = vperm.xlu2 %213, %v32_v12  }
  0x14   :  { %72 = vperm.xlu1 %212, %v34_v13   ;;  %67 = vperm.xlu0 %211, %v33_v14  }
  0x60   :  { %v58_v25 = vpop.permute.xlu2 %57 }
  0x68   :  { %v63_v40 = vpop.permute.xlu2 %62 }
  0x74   :  { %v38_v15 = vpop.permute.xlu0 %37  ;;  %v48_v16 = vpop.permute.xlu1 %47 }
  0x7e   :  { %v43_v17 = vpop.permute.xlu0 %42  ;;  %v53_v24 = vpop.permute.xlu1 %52 }
  0x86   :  { %v68_v26 = vpop.permute.xlu0 %67  ;;  %v73_v39 = vpop.permute.xlu1 %72 }
  0x87   :  { %v129_v18 = vpop.f32.mrf.mxu0  ;;  %v134_v19 = vpop.f32.mrf.mxu1 }
  0x88   :  { %v130_v20 = vadd.f32 %v129_v18, %v38_v15  ;;  %v135_v21 = vadd.f32 %v134_v19, %v48_v16 }
  0x8a   :  { %v149_v22 = vpack.c.bf16 %v130_v20, %v130_v20  ;;  %v151_v23 = vpack.c.bf16 %v135_v21, %v135_v21 }
  0x8c   :  { %158 = vst.msk [vmem:[%s312_s3] sm:$0xf] %vm157_vm1, %v149_v22 }
  0x8d   :  { %160 = vst.msk [vmem:[%s312_s3 + $0x8] sm:$0xf] %vm157_vm1, %v151_v23 }
  0x8e   :  { %v139_v27 = vpop.f32.mrf.mxu2  ;;  %v144_v28 = vpop.f32.mrf.mxu3 }
  0x8f   :  { %v140_v29 = vadd.f32 %v139_v27, %v58_v25  ;;  %v145_v30 = vadd.f32 %v144_v28, %v68_v26  ;;  %v131_v31 = vpop.f32.mrf.mxu0  ;;  %v136_v32 = vpop.f32.mrf.mxu1 }
  0x90   :  { %v132_v33 = vadd.f32 %v131_v31, %v43_v17  ;;  %v137_v34 = vadd.f32 %v136_v32, %v53_v24 }
  0x91   :  { %v153_v35 = vpack.c.bf16 %v140_v29, %v140_v29  ;;  %v155_v36 = vpack.c.bf16 %v145_v30, %v145_v30 }
  0x92   :  { %v150_v37 = vpack.c.bf16 %v132_v33, %v132_v33  ;;  %v152_v38 = vpack.c.bf16 %v137_v34, %v137_v34 }
  0x93   :  { %162 = vst.msk [vmem:[%s312_s3 + $0x10] sm:$0xf] %vm157_vm1, %v153_v35 }
  0x94   :  { %164 = vst.msk [vmem:[%s312_s3 + $0x18] sm:$0xf] %vm157_vm1, %v155_v36 }
  0x95   :  { %159 = vst.msk [vmem:[%s312_s3 + $0x4] sm:$0xf] %vm157_vm1, %v150_v37 }
  0x96   :  { %161 = vst.msk [vmem:[%s312_s3 + $0xc] sm:$0xf] %vm157_vm1, %v152_v38  ;;  %v141_v41 = vpop.f32.mrf.mxu2  ;;  %v146_v42 = vpop.f32.mrf.mxu3 }
  0x97   :  { %v142_v43 = vadd.f32 %v141_v41, %v63_v40  ;;  %v147_v44 = vadd.f32 %v146_v42, %v73_v39 }
  0x99   :  { %v154_v45 = vpack.c.bf16 %v142_v43, %v142_v43  ;;  %v156_v46 = vpack.c.bf16 %v147_v44, %v147_v44 }
  0x9b   :  { %163 = vst.msk [vmem:[%s312_s3 + $0x14] sm:$0xf] %vm157_vm1, %v154_v45 }
  0x9c   :  { %165 = vst.msk [vmem:[%s312_s3 + $0x1c] sm:$0xf] %vm157_vm1, %v156_v46 }

// kernel: _lambda_.40
= control target key start
LH: loop header
LB: loop body
LE: loop exit
PB: predicated region body
PF: predicated region fallthrough
CT: control target
= control target key end

     0   :  { %v1012_v6 = vmov 0   ;;  %vm478_vm0 = vcmask 523264   ;;  %vm676_vm1 = vcmask 60416   ;;  %s1350_s1 = inlined_call_operand.vmem [shape: bf16[576,8], index: 1, kind: input, shape index: {}]   ;;  %s1351_s2 = inlined_call_operand.vmem [shape: f32[64,1], index: 2, kind: input, shape index: {}]   ;;  %s1352_s0 = inlined_call_operand.vmem [shape: bf16[64,576], index: 0, kind: input, shape index: {}]   ;;  %s1353_s3 = inlined_call_operand.vmem [shape: bf16[64,8], index: 3, kind: input, shape index: {}]   ;;  %s1354_s4 = inlined_call_operand.vmem [shape: bf16[64,8], index: 4, kind: output, shape index: {}]  }
   0x1   :  { %v944_v0 = vld [vmem:[%s1350_s1 + $0x38] sm:$0xff]  ;;  %v943_v1 = vld [vmem:[%s1350_s1 + $0x30] sm:$0xff]  ;;  %v942_v4 = vld [vmem:[%s1350_s1 + $0x28] sm:$0xff]  ;;  %1010 = vset.pattern.permute.xlu1 %v1012_v6  ;;  %1009 = vset.pattern.permute.xlu0 %v1012_v6 }
   0x2   :  { %992 = vmatpush.bf16.msra.mxu1 %v944_v0  ;;  %993 = vmatpush.bf16.msra.mxu2 %v944_v0  ;;  %v968_v2 = vld [vmem:[%s1350_s1 + $0xf8] sm:$0xff]  ;;  %v967_v3 = vld [vmem:[%s1350_s1 + $0xf0] sm:$0xff]  ;;  %v966_v5 = vld [vmem:[%s1350_s1 + $0xe8] sm:$0xff] }
   0x3   :  { %491 = vmatpush.bf16.msra.mxu0 %v944_v0  ;;  %578 = vmatpush.bf16.msra.mxu3 %v968_v2  ;;  %v941_v7 = vld [vmem:[%s1350_s1 + $0x20] sm:$0xff]  ;;  %v116_v8 = vld [vmem:[%s1351_s2 + $0x10] sm:$0xff]  ;;  %v940_v11 = vld [vmem:[%s1350_s1 + $0x18] sm:$0xff] }
   0x4   :  { %1011 = vset.pattern.permute.xlu2 %v1012_v6  ;;  %v965_v9 = vld [vmem:[%s1350_s1 + $0xe0] sm:$0xff]  ;;  %134 = vperm.xlu1 %1010, %v116_v8   ;;  %v964_v12 = vld [vmem:[%s1350_s1 + $0xd8] sm:$0xff]  ;;  %v939_v13 = vld [vmem:[%s1350_s1 + $0x10] sm:$0xff] }
   0x5   :  { %v114_v10 = vld [vmem:[%s1351_s2] sm:$0xff]  ;;  %v117_v14 = vld [vmem:[%s1351_s2 + $0x18] sm:$0xff]  ;;  %v963_v15 = vld [vmem:[%s1350_s1 + $0xd0] sm:$0xff] }
   0x6   :  { %994 = vmatpush.bf16.msra.mxu1 %v943_v1  ;;  %995 = vmatpush.bf16.msra.mxu2 %v943_v1  ;;  %v115_v16 = vld [vmem:[%s1351_s2 + $0x8] sm:$0xff]  ;;  %v937_v19 = vld [vmem:[%s1350_s1] sm:$0xff]  ;;  %v924_v21 = vld [vmem:[%s1352_s0 + $0x38] sm:$0xf0] }
   0x7   :  { %492 = vmatpush.bf16.msra.mxu0 %v943_v1  ;;  %579 = vmatpush.bf16.msra.mxu3 %v967_v3  ;;  %v938_v17 = vld [vmem:[%s1350_s1 + $0x8] sm:$0xff]  ;;  %v751_v22 = vld [vmem:[%s1352_s0 + $0x78] sm:$0xf]  ;;  %v691_v26 = vld [vmem:[%s1352_s0] sm:$0xf] }
   0x8   :  { %124 = vperm.xlu0 %1009, %v114_v10   ;;  %v962_v18 = vld [vmem:[%s1350_s1 + $0xc8] sm:$0xff]  ;;  %v960_v24 = vld [vmem:[%s1350_s1 + $0xb8] sm:$0xff]  ;;  %v961_v27 = vld [vmem:[%s1350_s1 + $0xc0] sm:$0xff] }
   0x9   :  { %v711_v20 = vld [vmem:[%s1352_s0 + $0x28] sm:$0xf]  ;;  %v934_v23 = vld [vmem:[%s1352_s0 + $0x88] sm:$0xf0]  ;;  %v952_v25 = vld [vmem:[%s1350_s1 + $0x78] sm:$0xff] }
   0xa   :  { %996 = vmatpush.bf16.msra.mxu1 %v942_v4  ;;  %997 = vmatpush.bf16.msra.mxu2 %v942_v4  ;;  %v712_v28 = vor.u32 %v924_v21, %v711_v20  ;;  %v752_v29 = vor.u32 %v934_v23, %v751_v22  ;;  %v919_v30 = vld [vmem:[%s1352_s0 + $0x10] sm:$0xf0]  ;;  %v918_v31 = vld [vmem:[%s1352_s0 + $0xc] sm:$0xf]  ;;  %v701_v32 = vld [vmem:[%s1352_s0 + $0x1c] sm:$0xf0] }
   0xb   :  { %493 = vmatpush.bf16.msra.mxu0 %v942_v4  ;;  %580 = vmatpush.bf16.msra.mxu3 %v966_v5  ;;  %v972_v33 = vld [vmem:[%s1350_s1 + $0x118] sm:$0xff]  ;;  %v959_v34 = vld [vmem:[%s1350_s1 + $0xb0] sm:$0xff]  ;;  %v692_v37 = vor.u32 %v919_v30, %v691_v26  ;;  %v704_v38 = vor.u32 %v918_v31, %v701_v32  ;;  %v958_v41 = vld [vmem:[%s1350_s1 + $0xa8] sm:$0xff] }
   0xc   :  { %139 = vperm.xlu1 %1010, %v117_v14   ;;  %v951_v35 = vld [vmem:[%s1350_s1 + $0x70] sm:$0xff]  ;;  %v121_v36 = vld [vmem:[%s1351_s2 + $0x38] sm:$0xff]  ;;  %v950_v42 = vld [vmem:[%s1350_s1 + $0x68] sm:$0xff] }
   0xd   :  { %v971_v39 = vld [vmem:[%s1350_s1 + $0x110] sm:$0xff]  ;;  %v970_v43 = vld [vmem:[%s1350_s1 + $0x108] sm:$0xff]  ;;  %v957_v44 = vld [vmem:[%s1350_s1 + $0xa0] sm:$0xff] }
   0xe   :  { %998 = vmatpush.bf16.msra.mxu1 %v941_v7  ;;  %999 = vmatpush.bf16.msra.mxu2 %v941_v7  ;;  %v120_v40 = vld [vmem:[%s1351_s2 + $0x30] sm:$0xff]  ;;  %v949_v45 = vld [vmem:[%s1350_s1 + $0x60] sm:$0xff]  ;;  %v956_v49 = vld [vmem:[%s1350_s1 + $0x98] sm:$0xff] }
   0xf   :  { %494 = vmatpush.bf16.msra.mxu0 %v941_v7  ;;  %581 = vmatpush.bf16.msra.mxu3 %v965_v9  ;;  %v731_v46 = vld [vmem:[%s1352_s0 + $0x50] sm:$0xf]  ;;  %v929_v47 = vld [vmem:[%s1352_s0 + $0x60] sm:$0xf0]  ;;  %v948_v50 = vld [vmem:[%s1350_s1 + $0x58] sm:$0xff] }
  0x10   :  { %129 = vperm.xlu0 %1009, %v115_v16   ;;  %v969_v48 = vld [vmem:[%s1350_s1 + $0x100] sm:$0xff]  ;;  %v707_v51 = vld [vmem:[%s1352_s0 + $0x10] sm:$0xf]  ;;  %v732_v52 = vor.u32 %v929_v47, %v731_v46  ;;  %v923_v54 = vld [vmem:[%s1352_s0 + $0x34] sm:$0xf] }
  0x11   :  { %v921_v53 = vld [vmem:[%s1352_s0 + $0x20] sm:$0xf0]  ;;  %v721_v55 = vld [vmem:[%s1352_s0 + $0x44] sm:$0xf0]  ;;  %v955_v56 = vld [vmem:[%s1350_s1 + $0x90] sm:$0xff] }
  0x12   :  { %1000 = vmatpush.bf16.msra.mxu1 %v940_v11  ;;  %1001 = vmatpush.bf16.msra.mxu2 %v940_v11  ;;  %v947_v57 = vld [vmem:[%s1350_s1 + $0x50] sm:$0xff]  ;;  %v708_v58 = vor.u32 %v921_v53, %v707_v51  ;;  %v724_v59 = vor.u32 %v923_v54, %v721_v55  ;;  %v118_v60 = vld [vmem:[%s1351_s2 + $0x20] sm:$0xff]  ;;  %v954_v61 = vld [vmem:[%s1350_s1 + $0x88] sm:$0xff] }
  0x13   :  { %495 = vmatpush.bf16.msra.mxu0 %v940_v11  ;;  %582 = vmatpush.bf16.msra.mxu3 %v964_v12  ;;  %v946_v62 = vld [vmem:[%s1350_s1 + $0x48] sm:$0xff]  ;;  %v953_v63 = vld [vmem:[%s1350_s1 + $0x80] sm:$0xff]  ;;  %v920_v2 = vld [vmem:[%s1352_s0 + $0x18] sm:$0xf0] }
  0x14   :  { %159 = vperm.xlu1 %1010, %v121_v36   ;;  %144 = vperm.xlu2 %1011, %v118_v60   ;;  %v945_v0 = vld [vmem:[%s1350_s1 + $0x40] sm:$0xff]  ;;  %v699_v1 = vld [vmem:[%s1352_s0 + $0x8] sm:$0xf]  ;;  %v693_v6 = vld [vmem:[%s1352_s0 + $0x14] sm:$0xf0] }
  0x15   :  { %v119_v3 = vld [vmem:[%s1351_s2 + $0x28] sm:$0xff]  ;;  %v700_v4 = vor.u32 %v920_v2, %v699_v1  ;;  %v917_v5 = vld [vmem:[%s1352_s0 + $0x4] sm:$0xf]  ;;  %v727_v7 = vld [vmem:[%s1352_s0 + $0x38] sm:$0xf] }
  0x16   :  { %1002 = vmatpush.bf16.msra.mxu1 %v939_v13  ;;  %1003 = vmatpush.bf16.msra.mxu2 %v939_v13  ;;  %v696_v8 = vor.u32 %v917_v5, %v693_v6  ;;  %v926_v9 = vld [vmem:[%s1352_s0 + $0x48] sm:$0xf0]  ;;  %v928_v10 = vld [vmem:[%s1352_s0 + $0x5c] sm:$0xf]  ;;  %v741_v11 = vld [vmem:[%s1352_s0 + $0x6c] sm:$0xf0] }
  0x17   :  { %496 = vmatpush.bf16.msra.mxu0 %v939_v13  ;;  %583 = vmatpush.bf16.msra.mxu3 %v963_v15  ;;  %v728_v12 = vor.u32 %v926_v9, %v727_v7  ;;  %v744_v13 = vor.u32 %v928_v10, %v741_v11  ;;  %v719_v14 = vld [vmem:[%s1352_s0 + $0x30] sm:$0xf]  ;;  %v925_v15 = vld [vmem:[%s1352_s0 + $0x40] sm:$0xf0]  ;;  %v931_v21 = vld [vmem:[%s1352_s0 + $0x70] sm:$0xf0] }
  0x18   :  { %154 = vperm.xlu0 %1009, %v120_v40   ;;  %v720_v16 = vor.u32 %v925_v15, %v719_v14  ;;  %v933_v22 = vld [vmem:[%s1352_s0 + $0x84] sm:$0xf]  ;;  %v761_v23 = vld [vmem:[%s1352_s0 + $0x94] sm:$0xf0]  ;;  %v733_v30 = vld [vmem:[%s1352_s0 + $0x64] sm:$0xf0] }
  0x19   :  { %v739_v26 = vld [vmem:[%s1352_s0 + $0x58] sm:$0xf]  ;;  %v767_v32 = vld [vmem:[%s1352_s0 + $0x88] sm:$0xf]  ;;  %v935_v36 = vld [vmem:[%s1352_s0 + $0x90] sm:$0xf0] }
  0x1a   :  { %1004 = vmatpush.bf16.msra.mxu1 %v938_v17  ;;  %1005 = vmatpush.bf16.msra.mxu2 %v938_v17 }
  0x1b   :  { %497 = vmatpush.bf16.msra.mxu0 %v938_v17  ;;  %584 = vmatpush.bf16.msra.mxu3 %v962_v18  ;;  %v922_v17 = vld [vmem:[%s1352_s0 + $0x2c] sm:$0xf]  ;;  %v713_v18 = vld [vmem:[%s1352_s0 + $0x3c] sm:$0xf0] }
  0x1c   :  { %149 = vperm.xlu2 %1011, %v119_v3   ;;  %v716_v20 = vor.u32 %v922_v17, %v713_v18 }
  0x1e   :  { %1006 = vmatpush.bf16.msra.mxu1 %v937_v19  ;;  %1007 = vmatpush.bf16.msra.mxu2 %v937_v19 }
  0x1f   :  { %498 = vmatpush.bf16.msra.mxu0 %v937_v19  ;;  %585 = vmatpush.bf16.msra.mxu3 %v961_v27  ;;  %v747_v19 = vld [vmem:[%s1352_s0 + $0x60] sm:$0xf]  ;;  %v930_v27 = vld [vmem:[%s1352_s0 + $0x68] sm:$0xf0] }
  0x21   :  { %504 = vmatmul.bf16.vlgmr.msra.gmra.mxu1 %v712_v28  ;;  %514 = vmatmul.bf16.vlgmr.msra.gmra.mxu2 %v752_v29  ;;  %v740_v28 = vor.u32 %v930_v27, %v739_v26  ;;  %v927_v29 = vld [vmem:[%s1352_s0 + $0x54] sm:$0xf] }
  0x22   :  { %549 = vmatpush.bf16.msrb.mxu2 %v960_v24  ;;  %520 = vmatpush.bf16.msrb.mxu1 %v952_v25  ;;  %v748_v24 = vor.u32 %v931_v21, %v747_v19  ;;  %v764_v25 = vor.u32 %v933_v22, %v761_v23  ;;  %v736_v31 = vor.u32 %v927_v29, %v733_v30  ;;  %v989_v19 = vld [vmem:[%s1353_s3 + $0x8] sm:$0xff]  }
  0x23   :  { %611 = vmatpush.bf16.msrb.mxu0 %v972_v33  ;;  %586 = vmatmul.bf16.vlgmr.msra.gmra.mxu3 %v704_v38  ;;  %v936_v33 = vld [vmem:[%s1352_s0 + $0x98] sm:$0xf0]  ;;  %v979_v26 = vunpack.c.l.bf16 %v989_v19 }
  0x24   :  { %499 = vmatmul.bf16.vlgmr.msra.gmra.mxu0 %v692_v37  ;;  %v932_v38 = vld [vmem:[%s1352_s0 + $0x7c] sm:$0xf] }
  0x26   :  { %550 = vmatpush.bf16.msrb.mxu2 %v959_v34  ;;  %521 = vmatpush.bf16.msrb.mxu1 %v951_v35  ;;  %v768_v34 = vor.u32 %v936_v33, %v767_v32  ;;  %v759_v35 = vld [vmem:[%s1352_s0 + $0x80] sm:$0xf] }
  0x27   :  { %612 = vmatpush.bf16.msrb.mxu0 %v971_v39  ;;  %v760_v37 = vor.u32 %v935_v36, %v759_v35  ;;  %v753_v39 = vld [vmem:[%s1352_s0 + $0x8c] sm:$0xf0] }
  0x28   :  { %v756_v40 = vor.u32 %v932_v38, %v753_v39  ;;  %v980_v39 = vunpack.c.h.bf16 %v989_v19 }
  0x2a   :  { %551 = vmatpush.bf16.msrb.mxu2 %v958_v41  ;;  %522 = vmatpush.bf16.msrb.mxu1 %v950_v42 }
  0x2b   :  { %613 = vmatpush.bf16.msrb.mxu0 %v970_v43 }
  0x2e   :  { %552 = vmatpush.bf16.msrb.mxu2 %v957_v44  ;;  %523 = vmatpush.bf16.msrb.mxu1 %v949_v45 }
  0x2f   :  { %614 = vmatpush.bf16.msrb.mxu0 %v969_v48 }
  0x31   :  { %509 = vmatmul.bf16.gmra.mxu1 %v732_v52 }
  0x32   :  { %553 = vmatpush.bf16.msrb.mxu2 %v956_v49  ;;  %524 = vmatpush.bf16.msrb.mxu1 %v948_v50 }
  0x33   :  { %591 = vmatmul.bf16.gmra.mxu3 %v724_v59 }
  0x34   :  { %913 = vmatmul.msk.bf16.vlgmr.msrb.gmra.mxu0 %vm478_vm0, %v708_v58 }
  0x36   :  { %554 = vmatpush.bf16.msrb.mxu2 %v955_v56  ;;  %525 = vmatpush.bf16.msrb.mxu1 %v947_v57  ;;  %v974_v57 = vld [vmem:[%s1353_s3] sm:$0xff]  }
  0x3a   :  { %555 = vmatpush.bf16.msrb.mxu2 %v954_v61  ;;  %526 = vmatpush.bf16.msrb.mxu1 %v946_v62  ;;  %v975_v62 = vunpack.c.l.bf16 %v974_v57 }
  0x3e   :  { %556 = vmatpush.bf16.msrb.mxu2 %v953_v63  ;;  %527 = vmatpush.bf16.msrb.mxu1 %v945_v0 }
  0x41   :  { %557 = vmatmul.bf16.vlgmr.msrb.gmra.mxu2 %v700_v4  ;;  %528 = vmatmul.bf16.vlgmr.msrb.gmra.mxu1 %v696_v8 }
  0x43   :  { %596 = vmatmul.bf16.gmra.mxu3 %v744_v13 }
  0x44   :  { %914 = vmatmul.msk.bf16.gmra.mxu0 %vm478_vm0, %v728_v12  ;;  %v976_v12 = vunpack.c.h.bf16 %v974_v57 }
  0x51   :  { %562 = vmatmul.bf16.gmra.mxu2 %v720_v16  ;;  %533 = vmatmul.bf16.gmra.mxu1 %v716_v20 }
  0x53   :  { %601 = vmatmul.bf16.gmra.mxu3 %v764_v25 }
  0x54   :  { %915 = vmatmul.msk.bf16.gmra.mxu0 %vm478_vm0, %v748_v24 }
  0x61   :  { %567 = vmatmul.bf16.gmra.mxu2 %v740_v28  ;;  %538 = vmatmul.bf16.gmra.mxu1 %v736_v31 }
  0x64   :  { %916 = vmatmul.msk.bf16.gmra.mxu0 %vm478_vm0, %v768_v34 }
  0x6e   :  { %v145_v32 = vpop.permute.xlu2 %144 }
  0x71   :  { %572 = vmatmul.bf16.gmra.mxu2 %v760_v37  ;;  %543 = vmatmul.bf16.gmra.mxu1 %v756_v40 }
  0x76   :  { %v135_v3 = vpop.permute.xlu1 %134 }
  0x7a   :  { %v125_v51 = vpop.permute.xlu0 %124 }
  0x7e   :  { %v140_v20 = vpop.permute.xlu1 %139 }
  0x82   :  { %v130_v60 = vpop.permute.xlu0 %129 }
  0x9e   :  { %v505_v41 = vpop.f32.mrf.mxu1 }
  0x9f   :  { %v506_v13 = vadd.f32 %v505_v41, %v135_v3 }
  0xa1   :  { %v500_v42 = vpop.f32.mrf.mxu0 }
  0xa2   :  { %v501_v52 = vadd.f32 %v500_v42, %v125_v51 }
  0xa4   :  { %v1296_v46 = vpop.f32.mrf.mxu2 }
  0xa6   :  { %v507_v43 = vpop.f32.mrf.mxu1  ;;  %v587_v47 = vpop.f32.mrf.mxu3 }
  0xa7   :  { %v508_v27 = vadd.f32 %v507_v43, %v140_v20 }
  0xa9   :  { %v502_v44 = vpop.f32.mrf.mxu0 }
  0xaa   :  { %v503_v63 = vadd.f32 %v502_v44, %v130_v60 }
  0xac   :  { %v1300_v50 = vpop.f32.mrf.mxu2 }
  0xae   :  { %v1294_v45 = vpop.f32.mrf.mxu1  ;;  %v589_v55 = vpop.f32.mrf.mxu3 }
  0xaf   :  { %v511_v40 = vadd.f32 %v1294_v45, %v145_v32 }
  0xb1   :  { %v616_v49 = vpop.f32.mrf.mxu0 }
  0xb6   :  { %v1298_v48 = vpop.f32.mrf.mxu1  ;;  %v592_v6 = vpop.f32.mrf.mxu3 }
  0xb9   :  { %v618_v58 = vpop.f32.mrf.mxu0 }
  0xbe   :  { %v529_v53 = vpop.f32.mrf.mxu1  ;;  %v594_v23 = vpop.f32.mrf.mxu3 }
  0xbf   :  { %v530_v54 = vadd.f32 %v529_v53, %v501_v52  ;;  %v990_v52 = vld [vmem:[%s1353_s3 + $0x10] sm:$0xff]   ;;  %v150_v53 = vpop.permute.xlu2 %149 }
  0xc0   :  { %v983_v57 = vunpack.c.l.bf16 %v990_v52 }
  0xc1   :  { %v621_v9 = vpop.f32.mrf.mxu0 }
  0xc4   :  { %v558_v56 = vpop.f32.mrf.mxu2 }
  0xc5   :  { %v559_v59 = vadd.f32 %v558_v56, %v530_v54 }
  0xc6   :  { %v531_v1 = vpop.f32.mrf.mxu1  ;;  %v597_v41 = vpop.f32.mrf.mxu3 }
  0xc7   :  { %v588_v61 = vadd.f32 %v587_v47, %v559_v59  ;;  %v532_v2 = vadd.f32 %v531_v1, %v503_v63 }
  0xc9   :  { %v617_v0 = vadd.f32 %v616_v49, %v588_v61  ;;  %v623_v28 = vpop.f32.mrf.mxu0 }
  0xcb   :  { %v652_v4 = vadd.f32 %v975_v62, %v617_v0 }
  0xcc   :  { %v560_v5 = vpop.f32.mrf.mxu2 }
  0xcd   :  { %v660_v7 = vmax.f32 %v652_v4, 0.0  ;;  %v561_v8 = vadd.f32 %v560_v5, %v532_v2  ;;  %v155_v2 = vpop.permute.xlu0 %154 }
  0xce   :  { %v534_v15 = vpop.f32.mrf.mxu1  ;;  %v599_v61 = vpop.f32.mrf.mxu3 }
  0xcf   :  { %v668_v10 = vpack.c.bf16 %v660_v7, %v660_v7  ;;  %v590_v11 = vadd.f32 %v589_v55, %v561_v8  ;;  %v535_v16 = vadd.f32 %v534_v15, %v506_v13  ;;  %v984_v7 = vunpack.c.h.bf16 %v990_v52  ;;  %v160_v15 = vpop.permute.xlu1 %159 }
  0xd1   :  { %677 = vst.msk [vmem:[%s1354_s4] sm:$0xf] %vm676_vm1, %v668_v10  ;;  %v619_v14 = vadd.f32 %v618_v58, %v590_v11  ;;  %v626_v44 = vpop.f32.mrf.mxu0  ;;  %v513_v58 = vadd.f32 %v1298_v48, %v150_v53  ;;  %v516_v48 = vadd.f32 %v1296_v46, %v155_v2 }
  0xd3   :  { %v653_v17 = vadd.f32 %v976_v12, %v619_v14  ;;  %v991_v14 = vld [vmem:[%s1353_s3 + $0x18] sm:$0xff]  }
  0xd4   :  { %v563_v18 = vpop.f32.mrf.mxu2  ;;  %v987_v20 = vunpack.c.l.bf16 %v991_v14  ;;  %v988_v32 = vunpack.c.h.bf16 %v991_v14 }
  0xd5   :  { %v661_v21 = vmax.f32 %v653_v17, 0.0  ;;  %v564_v22 = vadd.f32 %v563_v18, %v535_v16 }
  0xd6   :  { %v536_v30 = vpop.f32.mrf.mxu1  ;;  %v602_v12 = vpop.f32.mrf.mxu3 }
  0xd7   :  { %v669_v24 = vpack.c.bf16 %v661_v21, %v661_v21  ;;  %v593_v25 = vadd.f32 %v592_v6, %v564_v22  ;;  %v537_v31 = vadd.f32 %v536_v30, %v508_v27  ;;  %v518_v21 = vadd.f32 %v1300_v50, %v160_v15 }
  0xd9   :  { %678 = vst.msk [vmem:[%s1354_s4 + $0x4] sm:$0xf] %vm676_vm1, %v669_v24  ;;  %v622_v29 = vadd.f32 %v621_v9, %v593_v25  ;;  %v628_v0 = vpop.f32.mrf.mxu0 }
  0xdb   :  { %v654_v33 = vadd.f32 %v979_v26, %v622_v29 }
  0xdc   :  { %v565_v34 = vpop.f32.mrf.mxu2 }
  0xdd   :  { %v662_v35 = vmax.f32 %v654_v33, 0.0  ;;  %v566_v36 = vadd.f32 %v565_v34, %v537_v31 }
  0xde   :  { %v539_v43 = vpop.f32.mrf.mxu1  ;;  %v604_v29 = vpop.f32.mrf.mxu3 }
  0xdf   :  { %v670_v37 = vpack.c.bf16 %v662_v35, %v662_v35  ;;  %v595_v38 = vadd.f32 %v594_v23, %v566_v36  ;;  %v540_v47 = vadd.f32 %v539_v43, %v511_v40 }
  0xe1   :  { %679 = vst.msk [vmem:[%s1354_s4 + $0x8] sm:$0xf] %vm676_vm1, %v670_v37  ;;  %v624_v42 = vadd.f32 %v623_v28, %v595_v38  ;;  %v631_v18 = vpop.f32.mrf.mxu0 }
  0xe3   :  { %v655_v49 = vadd.f32 %v980_v39, %v624_v42 }
  0xe4   :  { %v568_v51 = vpop.f32.mrf.mxu2 }
  0xe5   :  { %v663_v54 = vmax.f32 %v655_v49, 0.0  ;;  %v569_v55 = vadd.f32 %v568_v51, %v540_v47 }
  0xe6   :  { %v541_v60 = vpop.f32.mrf.mxu1 }
  0xe7   :  { %v671_v45 = vpack.c.bf16 %v663_v54, %v663_v54  ;;  %v598_v56 = vadd.f32 %v597_v41, %v569_v55  ;;  %v542_v62 = vadd.f32 %v541_v60, %v513_v58 }
  0xe9   :  { %680 = vst.msk [vmem:[%s1354_s4 + $0xc] sm:$0xf] %vm676_vm1, %v671_v45  ;;  %v627_v59 = vadd.f32 %v626_v44, %v598_v56  ;;  %v633_v33 = vpop.f32.mrf.mxu0 }
  0xeb   :  { %v656_v63 = vadd.f32 %v983_v57, %v627_v59 }
  0xec   :  { %v570_v1 = vpop.f32.mrf.mxu2 }
  0xed   :  { %v664_v3 = vmax.f32 %v656_v63, 0.0  ;;  %v571_v4 = vadd.f32 %v570_v1, %v542_v62 }
  0xee   :  { %v544_v9 = vpop.f32.mrf.mxu1 }
  0xef   :  { %v672_v5 = vpack.c.bf16 %v664_v3, %v664_v3  ;;  %v600_v6 = vadd.f32 %v599_v61, %v571_v4  ;;  %v545_v10 = vadd.f32 %v544_v9, %v516_v48 }
  0xf1   :  { %681 = vst.msk [vmem:[%s1354_s4 + $0x10] sm:$0xf] %vm676_vm1, %v672_v5  ;;  %v629_v8 = vadd.f32 %v628_v0, %v600_v6 }
  0xf3   :  { %v657_v11 = vadd.f32 %v984_v7, %v629_v8 }
  0xf4   :  { %v573_v13 = vpop.f32.mrf.mxu2 }
  0xf5   :  { %v665_v16 = vmax.f32 %v657_v11, 0.0  ;;  %v574_v17 = vadd.f32 %v573_v13, %v545_v10 }
  0xf6   :  { %v546_v23 = vpop.f32.mrf.mxu1 }
  0xf7   :  { %v673_v46 = vpack.c.bf16 %v665_v16, %v665_v16  ;;  %v603_v19 = vadd.f32 %v602_v12, %v574_v17  ;;  %v547_v24 = vadd.f32 %v546_v23, %v518_v21 }
  0xf9   :  { %682 = vst.msk [vmem:[%s1354_s4 + $0x14] sm:$0xf] %vm676_vm1, %v673_v46  ;;  %v632_v22 = vadd.f32 %v631_v18, %v603_v19 }
  0xfb   :  { %v658_v25 = vadd.f32 %v987_v20, %v632_v22 }
  0xfc   :  { %v575_v26 = vpop.f32.mrf.mxu2 }
  0xfd   :  { %v666_v27 = vmax.f32 %v658_v25, 0.0  ;;  %v576_v28 = vadd.f32 %v575_v26, %v547_v24 }
  0xff   :  { %v674_v30 = vpack.c.bf16 %v666_v27, %v666_v27  ;;  %v605_v31 = vadd.f32 %v604_v29, %v576_v28 }
 0x101   :  { %683 = vst.msk [vmem:[%s1354_s4 + $0x18] sm:$0xf] %vm676_vm1, %v674_v30  ;;  %v634_v50 = vadd.f32 %v633_v33, %v605_v31 }
 0x103   :  { %v659_v34 = vadd.f32 %v988_v32, %v634_v50 }
 0x105   :  { %v667_v35 = vmax.f32 %v659_v34, 0.0 }
 0x107   :  { %v675_v36 = vpack.c.bf16 %v667_v35, %v667_v35 }
 0x109   :  { %684 = vst.msk [vmem:[%s1354_s4 + $0x1c] sm:$0xf] %vm676_vm1, %v675_v36 }

// kernel: _lambda_.43
= control target key start
LH: loop header
LB: loop body
LE: loop exit
PB: predicated region body
PF: predicated region fallthrough
CT: control target
= control target key end

     0   :  { %vm24_vm0 = vcmask 64512   ;;  %v82_v7 = vmov 64.0   ;;  %vm54_vm2 = vcmask 57344   ;;  %s116_s0 = inlined_call_operand.vmem [shape: bf16[64,8], index: 0, kind: input, shape index: {}]   ;;  %s117_s1 = inlined_call_operand.vmem [shape: f32[1,8], index: 1, kind: output, shape index: {}]  }
   0x1   :  { %v61_v0 = vld [vmem:[%s116_s0] sm:$0xff]   ;;  %v76_v1 = vld [vmem:[%s116_s0 + $0x8] sm:$0xff]   ;;  %v77_v2 = vld [vmem:[%s116_s0 + $0x10] sm:$0xff]   ;;  %80 = vrcp.f32 %v82_v7 }
   0x2   :  { %v62_v3 = vunpack.c.l.bf16 %v61_v0  ;;  %v63_v4 = vunpack.c.h.bf16 %v61_v0  ;;  %v66_v5 = vunpack.c.l.bf16 %v76_v1  ;;  %v67_v6 = vunpack.c.h.bf16 %v76_v1  ;;  %v78_v12 = vld [vmem:[%s116_s0 + $0x18] sm:$0xff]  }
   0x3   :  { %v70_v8 = vunpack.c.l.bf16 %v77_v2  ;;  %v71_v14 = vunpack.c.h.bf16 %v77_v2  ;;  %v74_v17 = vunpack.c.l.bf16 %v78_v12  ;;  %v75_v21 = vunpack.c.h.bf16 %v78_v12 }
   0x4   :  { %v25_v9 = vsel %vm24_vm0, %v62_v3, 0.0  ;;  %v26_v10 = vsel %vm24_vm0, %v63_v4, 0.0  ;;  %v28_v11 = vsel %vm24_vm0, %v66_v5, 0.0  ;;  %v30_v15 = vsel %vm24_vm0, %v67_v6, 0.0 }
   0x5   :  { %v27_v13 = vadd.f32 %v26_v10, %v25_v9  ;;  %v32_v18 = vsel %vm24_vm0, %v70_v8, 0.0  ;;  %v34_v22 = vsel %vm24_vm0, %v71_v14, 0.0  ;;  %v36_v24 = vsel %vm24_vm0, %v74_v17, 0.0 }
   0x6   :  { %v38_v27 = vsel %vm24_vm0, %v75_v21, 0.0 }
   0x7   :  { %v29_v16 = vadd.f32 %v28_v11, %v27_v13  ;;  %v81_v19 = vpop.eup %80 }
   0x8   :  { %v47_v25 = vmul.f32 64.0, %v81_v19  ;;  %vm51_vm1 = vweird.f32 %v81_v19 }
   0x9   :  { %v31_v20 = vadd.f32 %v30_v15, %v29_v16 }
   0xa   :  { %v48_v29 = vsub.f32 1.0, %v47_v25 }
   0xb   :  { %v33_v23 = vadd.f32 %v32_v18, %v31_v20 }
   0xc   :  { %v49_v32 = vmul.f32 %v81_v19, %v48_v29 }
   0xd   :  { %v35_v26 = vadd.f32 %v34_v22, %v33_v23 }
   0xe   :  { %v50_v35 = vadd.f32 %v81_v19, %v49_v32 }
   0xf   :  { %v37_v28 = vadd.f32 %v36_v24, %v35_v26 }
  0x10   :  { %v52_v38 = vsel %vm51_vm1, %v81_v19, %v50_v35 }
  0x11   :  { %v39_v30 = vadd.f32 %v38_v27, %v37_v28 }
  0x13   :  { %v40_v31 = vrot.slane %v39_v30, 4 }
  0x15   :  { %v41_v33 = vadd.f32 %v40_v31, %v39_v30 }
  0x17   :  { %v42_v34 = vrot.slane %v41_v33, 2 }
  0x19   :  { %v43_v36 = vadd.f32 %v42_v34, %v41_v33 }
  0x1b   :  { %v44_v37 = vrot.slane %v43_v36, 1 }
  0x1d   :  { %v45_v39 = vadd.f32 %v44_v37, %v43_v36 }
  0x1f   :  { %v53_v40 = vmul.f32 %v52_v38, %v45_v39 }
  0x21   :  { %55 = vst.msk [vmem:[%s117_s1] sm:$0x1] %vm54_vm2, %v53_v40 }

// kernel: _lambda_.41
= control target key start
LH: loop header
LB: loop body
LE: loop exit
PB: predicated region body
PF: predicated region fallthrough
CT: control target
= control target key end

     0   :  { %v966_v6 = vmov 0   ;;  %vm475_vm0 = vcmask 523264   ;;  %vm649_vm1 = vcmask 60416   ;;  %s1284_s1 = inlined_call_operand.vmem [shape: bf16[576,8], index: 1, kind: input, shape index: {}]   ;;  %s1285_s2 = inlined_call_operand.vmem [shape: f32[64,1], index: 2, kind: input, shape index: {}]   ;;  %s1286_s0 = inlined_call_operand.vmem [shape: bf16[64,576], index: 0, kind: input, shape index: {}]   ;;  %s1287_s3 = inlined_call_operand.vmem [shape: bf16[64,8], index: 3, kind: output, shape index: {}]  }
   0x1   :  { %v917_v0 = vld [vmem:[%s1284_s1 + $0x38] sm:$0xff]  ;;  %v916_v1 = vld [vmem:[%s1284_s1 + $0x30] sm:$0xff]  ;;  %v915_v4 = vld [vmem:[%s1284_s1 + $0x28] sm:$0xff]  ;;  %964 = vset.pattern.permute.xlu1 %v966_v6  ;;  %963 = vset.pattern.permute.xlu0 %v966_v6 }
   0x2   :  { %946 = vmatpush.bf16.msra.mxu1 %v917_v0  ;;  %947 = vmatpush.bf16.msra.mxu2 %v917_v0  ;;  %v941_v2 = vld [vmem:[%s1284_s1 + $0xf8] sm:$0xff]  ;;  %v940_v3 = vld [vmem:[%s1284_s1 + $0xf0] sm:$0xff]  ;;  %v939_v5 = vld [vmem:[%s1284_s1 + $0xe8] sm:$0xff] }
   0x3   :  { %488 = vmatpush.bf16.msra.mxu0 %v917_v0  ;;  %575 = vmatpush.bf16.msra.mxu3 %v941_v2  ;;  %v914_v7 = vld [vmem:[%s1284_s1 + $0x20] sm:$0xff]  ;;  %v113_v8 = vld [vmem:[%s1285_s2 + $0x10] sm:$0xff]  ;;  %v913_v11 = vld [vmem:[%s1284_s1 + $0x18] sm:$0xff] }
   0x4   :  { %965 = vset.pattern.permute.xlu2 %v966_v6  ;;  %v938_v9 = vld [vmem:[%s1284_s1 + $0xe0] sm:$0xff]  ;;  %131 = vperm.xlu1 %964, %v113_v8   ;;  %v937_v12 = vld [vmem:[%s1284_s1 + $0xd8] sm:$0xff]  ;;  %v912_v13 = vld [vmem:[%s1284_s1 + $0x10] sm:$0xff] }
   0x5   :  { %v111_v10 = vld [vmem:[%s1285_s2] sm:$0xff]  ;;  %v114_v14 = vld [vmem:[%s1285_s2 + $0x18] sm:$0xff]  ;;  %v936_v15 = vld [vmem:[%s1284_s1 + $0xd0] sm:$0xff] }
   0x6   :  { %948 = vmatpush.bf16.msra.mxu1 %v916_v1  ;;  %949 = vmatpush.bf16.msra.mxu2 %v916_v1  ;;  %v112_v16 = vld [vmem:[%s1285_s2 + $0x8] sm:$0xff]  ;;  %v910_v19 = vld [vmem:[%s1284_s1] sm:$0xff]  ;;  %v897_v21 = vld [vmem:[%s1286_s0 + $0x38] sm:$0xf0] }
   0x7   :  { %489 = vmatpush.bf16.msra.mxu0 %v916_v1  ;;  %576 = vmatpush.bf16.msra.mxu3 %v940_v3  ;;  %v911_v17 = vld [vmem:[%s1284_s1 + $0x8] sm:$0xff]  ;;  %v724_v22 = vld [vmem:[%s1286_s0 + $0x78] sm:$0xf]  ;;  %v664_v26 = vld [vmem:[%s1286_s0] sm:$0xf] }
   0x8   :  { %121 = vperm.xlu0 %963, %v111_v10   ;;  %v935_v18 = vld [vmem:[%s1284_s1 + $0xc8] sm:$0xff]  ;;  %v933_v24 = vld [vmem:[%s1284_s1 + $0xb8] sm:$0xff]  ;;  %v934_v27 = vld [vmem:[%s1284_s1 + $0xc0] sm:$0xff] }
   0x9   :  { %v684_v20 = vld [vmem:[%s1286_s0 + $0x28] sm:$0xf]  ;;  %v907_v23 = vld [vmem:[%s1286_s0 + $0x88] sm:$0xf0]  ;;  %v925_v25 = vld [vmem:[%s1284_s1 + $0x78] sm:$0xff] }
   0xa   :  { %950 = vmatpush.bf16.msra.mxu1 %v915_v4  ;;  %951 = vmatpush.bf16.msra.mxu2 %v915_v4  ;;  %v685_v28 = vor.u32 %v897_v21, %v684_v20  ;;  %v725_v29 = vor.u32 %v907_v23, %v724_v22  ;;  %v892_v30 = vld [vmem:[%s1286_s0 + $0x10] sm:$0xf0]  ;;  %v891_v31 = vld [vmem:[%s1286_s0 + $0xc] sm:$0xf]  ;;  %v674_v32 = vld [vmem:[%s1286_s0 + $0x1c] sm:$0xf0] }
   0xb   :  { %490 = vmatpush.bf16.msra.mxu0 %v915_v4  ;;  %577 = vmatpush.bf16.msra.mxu3 %v939_v5  ;;  %v945_v33 = vld [vmem:[%s1284_s1 + $0x118] sm:$0xff]  ;;  %v932_v34 = vld [vmem:[%s1284_s1 + $0xb0] sm:$0xff]  ;;  %v665_v37 = vor.u32 %v892_v30, %v664_v26  ;;  %v677_v38 = vor.u32 %v891_v31, %v674_v32  ;;  %v931_v41 = vld [vmem:[%s1284_s1 + $0xa8] sm:$0xff] }
   0xc   :  { %136 = vperm.xlu1 %964, %v114_v14   ;;  %v924_v35 = vld [vmem:[%s1284_s1 + $0x70] sm:$0xff]  ;;  %v118_v36 = vld [vmem:[%s1285_s2 + $0x38] sm:$0xff]  ;;  %v923_v42 = vld [vmem:[%s1284_s1 + $0x68] sm:$0xff] }
   0xd   :  { %v944_v39 = vld [vmem:[%s1284_s1 + $0x110] sm:$0xff]  ;;  %v943_v43 = vld [vmem:[%s1284_s1 + $0x108] sm:$0xff]  ;;  %v930_v44 = vld [vmem:[%s1284_s1 + $0xa0] sm:$0xff] }
   0xe   :  { %952 = vmatpush.bf16.msra.mxu1 %v914_v7  ;;  %953 = vmatpush.bf16.msra.mxu2 %v914_v7  ;;  %v117_v40 = vld [vmem:[%s1285_s2 + $0x30] sm:$0xff]  ;;  %v922_v45 = vld [vmem:[%s1284_s1 + $0x60] sm:$0xff]  ;;  %v929_v49 = vld [vmem:[%s1284_s1 + $0x98] sm:$0xff] }
   0xf   :  { %491 = vmatpush.bf16.msra.mxu0 %v914_v7  ;;  %578 = vmatpush.bf16.msra.mxu3 %v938_v9  ;;  %v704_v46 = vld [vmem:[%s1286_s0 + $0x50] sm:$0xf]  ;;  %v902_v47 = vld [vmem:[%s1286_s0 + $0x60] sm:$0xf0]  ;;  %v921_v50 = vld [vmem:[%s1284_s1 + $0x58] sm:$0xff] }
  0x10   :  { %126 = vperm.xlu0 %963, %v112_v16   ;;  %v942_v48 = vld [vmem:[%s1284_s1 + $0x100] sm:$0xff]  ;;  %v680_v51 = vld [vmem:[%s1286_s0 + $0x10] sm:$0xf]  ;;  %v705_v52 = vor.u32 %v902_v47, %v704_v46  ;;  %v896_v54 = vld [vmem:[%s1286_s0 + $0x34] sm:$0xf] }
  0x11   :  { %v894_v53 = vld [vmem:[%s1286_s0 + $0x20] sm:$0xf0]  ;;  %v694_v55 = vld [vmem:[%s1286_s0 + $0x44] sm:$0xf0]  ;;  %v928_v56 = vld [vmem:[%s1284_s1 + $0x90] sm:$0xff] }
  0x12   :  { %954 = vmatpush.bf16.msra.mxu1 %v913_v11  ;;  %955 = vmatpush.bf16.msra.mxu2 %v913_v11  ;;  %v920_v57 = vld [vmem:[%s1284_s1 + $0x50] sm:$0xff]  ;;  %v681_v58 = vor.u32 %v894_v53, %v680_v51  ;;  %v697_v59 = vor.u32 %v896_v54, %v694_v55  ;;  %v115_v60 = vld [vmem:[%s1285_s2 + $0x20] sm:$0xff]  ;;  %v927_v61 = vld [vmem:[%s1284_s1 + $0x88] sm:$0xff] }
  0x13   :  { %492 = vmatpush.bf16.msra.mxu0 %v913_v11  ;;  %579 = vmatpush.bf16.msra.mxu3 %v937_v12  ;;  %v919_v62 = vld [vmem:[%s1284_s1 + $0x48] sm:$0xff]  ;;  %v926_v63 = vld [vmem:[%s1284_s1 + $0x80] sm:$0xff]  ;;  %v893_v2 = vld [vmem:[%s1286_s0 + $0x18] sm:$0xf0] }
  0x14   :  { %156 = vperm.xlu1 %964, %v118_v36   ;;  %141 = vperm.xlu2 %965, %v115_v60   ;;  %v918_v0 = vld [vmem:[%s1284_s1 + $0x40] sm:$0xff]  ;;  %v672_v1 = vld [vmem:[%s1286_s0 + $0x8] sm:$0xf]  ;;  %v666_v6 = vld [vmem:[%s1286_s0 + $0x14] sm:$0xf0] }
  0x15   :  { %v116_v3 = vld [vmem:[%s1285_s2 + $0x28] sm:$0xff]  ;;  %v673_v4 = vor.u32 %v893_v2, %v672_v1  ;;  %v890_v5 = vld [vmem:[%s1286_s0 + $0x4] sm:$0xf]  ;;  %v700_v7 = vld [vmem:[%s1286_s0 + $0x38] sm:$0xf] }
  0x16   :  { %956 = vmatpush.bf16.msra.mxu1 %v912_v13  ;;  %957 = vmatpush.bf16.msra.mxu2 %v912_v13  ;;  %v669_v8 = vor.u32 %v890_v5, %v666_v6  ;;  %v899_v9 = vld [vmem:[%s1286_s0 + $0x48] sm:$0xf0]  ;;  %v901_v10 = vld [vmem:[%s1286_s0 + $0x5c] sm:$0xf]  ;;  %v714_v11 = vld [vmem:[%s1286_s0 + $0x6c] sm:$0xf0] }
  0x17   :  { %493 = vmatpush.bf16.msra.mxu0 %v912_v13  ;;  %580 = vmatpush.bf16.msra.mxu3 %v936_v15  ;;  %v701_v12 = vor.u32 %v899_v9, %v700_v7  ;;  %v717_v13 = vor.u32 %v901_v10, %v714_v11  ;;  %v692_v14 = vld [vmem:[%s1286_s0 + $0x30] sm:$0xf]  ;;  %v898_v15 = vld [vmem:[%s1286_s0 + $0x40] sm:$0xf0]  ;;  %v904_v21 = vld [vmem:[%s1286_s0 + $0x70] sm:$0xf0] }
  0x18   :  { %151 = vperm.xlu0 %963, %v117_v40   ;;  %v693_v16 = vor.u32 %v898_v15, %v692_v14  ;;  %v906_v22 = vld [vmem:[%s1286_s0 + $0x84] sm:$0xf]  ;;  %v734_v23 = vld [vmem:[%s1286_s0 + $0x94] sm:$0xf0]  ;;  %v706_v30 = vld [vmem:[%s1286_s0 + $0x64] sm:$0xf0] }
  0x19   :  { %v712_v26 = vld [vmem:[%s1286_s0 + $0x58] sm:$0xf]  ;;  %v740_v32 = vld [vmem:[%s1286_s0 + $0x88] sm:$0xf]  ;;  %v908_v36 = vld [vmem:[%s1286_s0 + $0x90] sm:$0xf0] }
  0x1a   :  { %958 = vmatpush.bf16.msra.mxu1 %v911_v17  ;;  %959 = vmatpush.bf16.msra.mxu2 %v911_v17 }
  0x1b   :  { %494 = vmatpush.bf16.msra.mxu0 %v911_v17  ;;  %581 = vmatpush.bf16.msra.mxu3 %v935_v18  ;;  %v895_v17 = vld [vmem:[%s1286_s0 + $0x2c] sm:$0xf]  ;;  %v686_v18 = vld [vmem:[%s1286_s0 + $0x3c] sm:$0xf0] }
  0x1c   :  { %146 = vperm.xlu2 %965, %v116_v3   ;;  %v689_v20 = vor.u32 %v895_v17, %v686_v18 }
  0x1e   :  { %960 = vmatpush.bf16.msra.mxu1 %v910_v19  ;;  %961 = vmatpush.bf16.msra.mxu2 %v910_v19 }
  0x1f   :  { %495 = vmatpush.bf16.msra.mxu0 %v910_v19  ;;  %582 = vmatpush.bf16.msra.mxu3 %v934_v27  ;;  %v720_v19 = vld [vmem:[%s1286_s0 + $0x60] sm:$0xf]  ;;  %v903_v27 = vld [vmem:[%s1286_s0 + $0x68] sm:$0xf0] }
  0x21   :  { %501 = vmatmul.bf16.vlgmr.msra.gmra.mxu1 %v685_v28  ;;  %511 = vmatmul.bf16.vlgmr.msra.gmra.mxu2 %v725_v29  ;;  %v713_v28 = vor.u32 %v903_v27, %v712_v26  ;;  %v900_v29 = vld [vmem:[%s1286_s0 + $0x54] sm:$0xf] }
  0x22   :  { %546 = vmatpush.bf16.msrb.mxu2 %v933_v24  ;;  %517 = vmatpush.bf16.msrb.mxu1 %v925_v25  ;;  %v721_v24 = vor.u32 %v904_v21, %v720_v19  ;;  %v737_v25 = vor.u32 %v906_v22, %v734_v23  ;;  %v709_v31 = vor.u32 %v900_v29, %v706_v30 }
  0x23   :  { %608 = vmatpush.bf16.msrb.mxu0 %v945_v33  ;;  %583 = vmatmul.bf16.vlgmr.msra.gmra.mxu3 %v677_v38  ;;  %v909_v33 = vld [vmem:[%s1286_s0 + $0x98] sm:$0xf0] }
  0x24   :  { %496 = vmatmul.bf16.vlgmr.msra.gmra.mxu0 %v665_v37  ;;  %v905_v38 = vld [vmem:[%s1286_s0 + $0x7c] sm:$0xf] }
  0x26   :  { %547 = vmatpush.bf16.msrb.mxu2 %v932_v34  ;;  %518 = vmatpush.bf16.msrb.mxu1 %v924_v35  ;;  %v741_v34 = vor.u32 %v909_v33, %v740_v32  ;;  %v732_v35 = vld [vmem:[%s1286_s0 + $0x80] sm:$0xf] }
  0x27   :  { %609 = vmatpush.bf16.msrb.mxu0 %v944_v39  ;;  %v733_v37 = vor.u32 %v908_v36, %v732_v35  ;;  %v726_v39 = vld [vmem:[%s1286_s0 + $0x8c] sm:$0xf0] }
  0x28   :  { %v729_v40 = vor.u32 %v905_v38, %v726_v39 }
  0x2a   :  { %548 = vmatpush.bf16.msrb.mxu2 %v931_v41  ;;  %519 = vmatpush.bf16.msrb.mxu1 %v923_v42 }
  0x2b   :  { %610 = vmatpush.bf16.msrb.mxu0 %v943_v43 }
  0x2e   :  { %549 = vmatpush.bf16.msrb.mxu2 %v930_v44  ;;  %520 = vmatpush.bf16.msrb.mxu1 %v922_v45 }
  0x2f   :  { %611 = vmatpush.bf16.msrb.mxu0 %v942_v48 }
  0x31   :  { %506 = vmatmul.bf16.gmra.mxu1 %v705_v52 }
  0x32   :  { %550 = vmatpush.bf16.msrb.mxu2 %v929_v49  ;;  %521 = vmatpush.bf16.msrb.mxu1 %v921_v50 }
  0x33   :  { %588 = vmatmul.bf16.gmra.mxu3 %v697_v59 }
  0x34   :  { %886 = vmatmul.msk.bf16.vlgmr.msrb.gmra.mxu0 %vm475_vm0, %v681_v58 }
  0x36   :  { %551 = vmatpush.bf16.msrb.mxu2 %v928_v56  ;;  %522 = vmatpush.bf16.msrb.mxu1 %v920_v57 }
  0x3a   :  { %552 = vmatpush.bf16.msrb.mxu2 %v927_v61  ;;  %523 = vmatpush.bf16.msrb.mxu1 %v919_v62 }
  0x3e   :  { %553 = vmatpush.bf16.msrb.mxu2 %v926_v63  ;;  %524 = vmatpush.bf16.msrb.mxu1 %v918_v0 }
  0x41   :  { %554 = vmatmul.bf16.vlgmr.msrb.gmra.mxu2 %v673_v4  ;;  %525 = vmatmul.bf16.vlgmr.msrb.gmra.mxu1 %v669_v8 }
  0x43   :  { %593 = vmatmul.bf16.gmra.mxu3 %v717_v13 }
  0x44   :  { %887 = vmatmul.msk.bf16.gmra.mxu0 %vm475_vm0, %v701_v12 }
  0x51   :  { %559 = vmatmul.bf16.gmra.mxu2 %v693_v16  ;;  %530 = vmatmul.bf16.gmra.mxu1 %v689_v20 }
  0x53   :  { %598 = vmatmul.bf16.gmra.mxu3 %v737_v25 }
  0x54   :  { %888 = vmatmul.msk.bf16.gmra.mxu0 %vm475_vm0, %v721_v24 }
  0x61   :  { %564 = vmatmul.bf16.gmra.mxu2 %v713_v28  ;;  %535 = vmatmul.bf16.gmra.mxu1 %v709_v31 }
  0x64   :  { %889 = vmatmul.msk.bf16.gmra.mxu0 %vm475_vm0, %v741_v34 }
  0x6e   :  { %v142_v25 = vpop.permute.xlu2 %141 }
  0x71   :  { %569 = vmatmul.bf16.gmra.mxu2 %v733_v37  ;;  %540 = vmatmul.bf16.gmra.mxu1 %v729_v40 }
  0x76   :  { %v132_v1 = vpop.permute.xlu1 %131  ;;  %v147_v39 = vpop.permute.xlu2 %146 }
  0x7a   :  { %v122_v51 = vpop.permute.xlu0 %121 }
  0x7e   :  { %v137_v15 = vpop.permute.xlu1 %136 }
  0x82   :  { %v127_v59 = vpop.permute.xlu0 %126 }
  0x9e   :  { %v502_v41 = vpop.f32.mrf.mxu1 }
  0x9f   :  { %v503_v9 = vadd.f32 %v502_v41, %v132_v1 }
  0xa1   :  { %v497_v42 = vpop.f32.mrf.mxu0 }
  0xa2   :  { %v498_v52 = vadd.f32 %v497_v42, %v122_v51 }
  0xa4   :  { %v1243_v46 = vpop.f32.mrf.mxu2 }
  0xa6   :  { %v504_v43 = vpop.f32.mrf.mxu1  ;;  %v584_v47 = vpop.f32.mrf.mxu3 }
  0xa7   :  { %v505_v20 = vadd.f32 %v504_v43, %v137_v15 }
  0xa9   :  { %v499_v44 = vpop.f32.mrf.mxu0 }
  0xaa   :  { %v500_v61 = vadd.f32 %v499_v44, %v127_v59 }
  0xac   :  { %v1247_v50 = vpop.f32.mrf.mxu2 }
  0xae   :  { %v507_v45 = vpop.f32.mrf.mxu1  ;;  %v586_v55 = vpop.f32.mrf.mxu3 }
  0xaf   :  { %v508_v31 = vadd.f32 %v507_v45, %v142_v25 }
  0xb1   :  { %v613_v49 = vpop.f32.mrf.mxu0 }
  0xb6   :  { %v1245_v48 = vpop.f32.mrf.mxu1  ;;  %v589_v4 = vpop.f32.mrf.mxu3 }
  0xb7   :  { %v510_v43 = vadd.f32 %v1245_v48, %v147_v39 }
  0xb9   :  { %v615_v57 = vpop.f32.mrf.mxu0 }
  0xbe   :  { %v526_v53 = vpop.f32.mrf.mxu1  ;;  %v591_v18 = vpop.f32.mrf.mxu3 }
  0xbf   :  { %v527_v54 = vadd.f32 %v526_v53, %v498_v52 }
  0xc1   :  { %v618_v7 = vpop.f32.mrf.mxu0 }
  0xc4   :  { %v555_v56 = vpop.f32.mrf.mxu2 }
  0xc5   :  { %v556_v58 = vadd.f32 %v555_v56, %v527_v54  ;;  %v152_v54 = vpop.permute.xlu0 %151 }
  0xc6   :  { %v528_v63 = vpop.f32.mrf.mxu1  ;;  %v594_v32 = vpop.f32.mrf.mxu3 }
  0xc7   :  { %v585_v60 = vadd.f32 %v584_v47, %v556_v58  ;;  %v529_v0 = vadd.f32 %v528_v63, %v500_v61  ;;  %v513_v58 = vadd.f32 %v1243_v46, %v152_v54 }
  0xc9   :  { %v614_v62 = vadd.f32 %v613_v49, %v585_v60  ;;  %v620_v21 = vpop.f32.mrf.mxu0 }
  0xcb   :  { %v633_v2 = vmax.f32 %v614_v62, 0.0 }
  0xcc   :  { %v557_v3 = vpop.f32.mrf.mxu2 }
  0xcd   :  { %v641_v5 = vpack.c.bf16 %v633_v2, %v633_v2  ;;  %v558_v6 = vadd.f32 %v557_v3, %v529_v0  ;;  %v157_v0 = vpop.permute.xlu1 %156 }
  0xce   :  { %v531_v11 = vpop.f32.mrf.mxu1  ;;  %v596_v47 = vpop.f32.mrf.mxu3 }
  0xcf   :  { %650 = vst.msk [vmem:[%s1287_s3] sm:$0xf] %vm649_vm1, %v641_v5  ;;  %v587_v8 = vadd.f32 %v586_v55, %v558_v6  ;;  %v532_v12 = vadd.f32 %v531_v11, %v503_v9  ;;  %v515_v5 = vadd.f32 %v1247_v50, %v157_v0 }
  0xd1   :  { %v616_v10 = vadd.f32 %v615_v57, %v587_v8  ;;  %v623_v35 = vpop.f32.mrf.mxu0 }
  0xd3   :  { %v634_v13 = vmax.f32 %v616_v10, 0.0 }
  0xd4   :  { %v560_v14 = vpop.f32.mrf.mxu2 }
  0xd5   :  { %v642_v16 = vpack.c.bf16 %v634_v13, %v634_v13  ;;  %v561_v17 = vadd.f32 %v560_v14, %v532_v12 }
  0xd6   :  { %v533_v23 = vpop.f32.mrf.mxu1  ;;  %v599_v62 = vpop.f32.mrf.mxu3 }
  0xd7   :  { %651 = vst.msk [vmem:[%s1287_s3 + $0x4] sm:$0xf] %vm649_vm1, %v642_v16  ;;  %v590_v19 = vadd.f32 %v589_v4, %v561_v17  ;;  %v534_v24 = vadd.f32 %v533_v23, %v505_v20 }
  0xd9   :  { %v619_v22 = vadd.f32 %v618_v7, %v590_v19  ;;  %v625_v52 = vpop.f32.mrf.mxu0 }
  0xdb   :  { %v635_v26 = vmax.f32 %v619_v22, 0.0 }
  0xdc   :  { %v562_v27 = vpop.f32.mrf.mxu2 }
  0xdd   :  { %v643_v28 = vpack.c.bf16 %v635_v26, %v635_v26  ;;  %v563_v29 = vadd.f32 %v562_v27, %v534_v24 }
  0xde   :  { %v536_v34 = vpop.f32.mrf.mxu1  ;;  %v601_v12 = vpop.f32.mrf.mxu3 }
  0xdf   :  { %652 = vst.msk [vmem:[%s1287_s3 + $0x8] sm:$0xf] %vm649_vm1, %v643_v28  ;;  %v592_v30 = vadd.f32 %v591_v18, %v563_v29  ;;  %v537_v36 = vadd.f32 %v536_v34, %v508_v31 }
  0xe1   :  { %v621_v33 = vadd.f32 %v620_v21, %v592_v30  ;;  %v628_v3 = vpop.f32.mrf.mxu0 }
  0xe3   :  { %v636_v37 = vmax.f32 %v621_v33, 0.0 }
  0xe4   :  { %v565_v38 = vpop.f32.mrf.mxu2 }
  0xe5   :  { %v644_v40 = vpack.c.bf16 %v636_v37, %v636_v37  ;;  %v566_v41 = vadd.f32 %v565_v38, %v537_v36 }
  0xe6   :  { %v538_v45 = vpop.f32.mrf.mxu1 }
  0xe7   :  { %653 = vst.msk [vmem:[%s1287_s3 + $0xc] sm:$0xf] %vm649_vm1, %v644_v40  ;;  %v595_v42 = vadd.f32 %v594_v32, %v566_v41  ;;  %v539_v49 = vadd.f32 %v538_v45, %v510_v43 }
  0xe9   :  { %v624_v44 = vadd.f32 %v623_v35, %v595_v42  ;;  %v630_v14 = vpop.f32.mrf.mxu0 }
  0xeb   :  { %v637_v51 = vmax.f32 %v624_v44, 0.0 }
  0xec   :  { %v567_v53 = vpop.f32.mrf.mxu2 }
  0xed   :  { %v645_v55 = vpack.c.bf16 %v637_v51, %v637_v51  ;;  %v568_v56 = vadd.f32 %v567_v53, %v539_v49 }
  0xee   :  { %v541_v48 = vpop.f32.mrf.mxu1 }
  0xef   :  { %654 = vst.msk [vmem:[%s1287_s3 + $0x10] sm:$0xf] %vm649_vm1, %v645_v55  ;;  %v597_v57 = vadd.f32 %v596_v47, %v568_v56  ;;  %v542_v60 = vadd.f32 %v541_v48, %v513_v58 }
  0xf1   :  { %v626_v59 = vadd.f32 %v625_v52, %v597_v57 }
  0xf3   :  { %v638_v61 = vmax.f32 %v626_v59, 0.0 }
  0xf4   :  { %v570_v63 = vpop.f32.mrf.mxu2 }
  0xf5   :  { %v646_v1 = vpack.c.bf16 %v638_v61, %v638_v61  ;;  %v571_v2 = vadd.f32 %v570_v63, %v542_v60 }
  0xf6   :  { %v543_v46 = vpop.f32.mrf.mxu1 }
  0xf7   :  { %655 = vst.msk [vmem:[%s1287_s3 + $0x14] sm:$0xf] %vm649_vm1, %v646_v1  ;;  %v600_v4 = vadd.f32 %v599_v62, %v571_v2  ;;  %v544_v7 = vadd.f32 %v543_v46, %v515_v5 }
  0xf9   :  { %v629_v6 = vadd.f32 %v628_v3, %v600_v4 }
  0xfb   :  { %v639_v8 = vmax.f32 %v629_v6, 0.0 }
  0xfc   :  { %v572_v9 = vpop.f32.mrf.mxu2 }
  0xfd   :  { %v647_v10 = vpack.c.bf16 %v639_v8, %v639_v8  ;;  %v573_v11 = vadd.f32 %v572_v9, %v544_v7 }
  0xff   :  { %656 = vst.msk [vmem:[%s1287_s3 + $0x18] sm:$0xf] %vm649_vm1, %v647_v10  ;;  %v602_v13 = vadd.f32 %v601_v12, %v573_v11 }
 0x101   :  { %v631_v15 = vadd.f32 %v630_v14, %v602_v13 }
 0x103   :  { %v640_v16 = vmax.f32 %v631_v15, 0.0 }
 0x105   :  { %v648_v17 = vpack.c.bf16 %v640_v16, %v640_v16 }
 0x107   :  { %657 = vst.msk [vmem:[%s1287_s3 + $0x1c] sm:$0xf] %vm649_vm1, %v648_v17 }

</bundles_post_ra>
